<compile_context>
chip_gen: v7x
topology: tpu7x:2x2x1
jax: 0.10.0
libtpu: 0.0.40
codegen_flags: <defaults>
</compile_context>

<pallas_src>
import jax
import jax.numpy as jnp
from jax.experimental import pallas as pl
from jax.experimental.pallas import tpu as pltpu


# ----------------------------------------------------------------------------
# Kernel
# ----------------------------------------------------------------------------
def make_lstm_kernel(T, Bp, Hp, I):
    """Kernel closed over static sizes (timesteps, padded batch, padded H, input)."""
    Hp2 = 2 * Hp      # packed hidden/cell width: [layer0 | layer1]
    Hp6 = 6 * Hp      # contiguous sigmoid-gate slab (i0 i1 f0 f1 o0 o1)
    Hp8 = 8 * Hp      # full fused gate width

    def packed_cell(acts, c):
        # acts: (Bp, 8*Hp), columns ordered [i0 i1 | f0 f1 | o0 o1 | g0 g1]
        sig = jax.nn.sigmoid(acts[:, 0:Hp6])        # one EUP op, 6*Hp wide
        i = sig[:, 0:Hp2]
        f = sig[:, Hp2:2 * Hp2]
        o = sig[:, 2 * Hp2:Hp6]
        g = jnp.tanh(acts[:, Hp6:Hp8])              # one EUP op, 2*Hp wide
        c_new = f * c + i * g                       # both layers at once
        h_new = o * jnp.tanh(c_new)
        return h_new, c_new

    def kernel(x_ref, wih0_ref, bcomb_ref, wfused_ref, fcw_ref, fcb_ref, out_ref):
        bcomb = bcomb_ref[...]                      # (1, 8*Hp): b0 | b1 columns

        # Hoisted layer-0 input projection over ALL T steps (layer-1 columns of
        # wih0 are zero, so those columns just hold the layer-1 bias b1).
        if I == 1:
            # Degenerate K=1 matmul -> VPU broadcast multiply (outer product).
            xproj = x_ref[...] * wih0_ref[...] + bcomb          # (T*Bp, 8*Hp)
        else:
            xproj = jnp.dot(x_ref[...], wih0_ref[...],
                            preferred_element_type=jnp.float32) + bcomb

        wfused = wfused_ref[...]                    # (2*Hp, 8*Hp) block matrix

        # --- iteration 0: layer-0 step 0 only (initial state is zero) --------
        h_state, c_state = packed_cell(xproj[0:Bp, :],
                                       jnp.zeros((Bp, Hp2), jnp.float32))
        z = jnp.zeros((Bp, Hp), jnp.float32)
        h_state = jnp.concatenate([h_state[:, 0:Hp], z], axis=1)   # zero layer-1 half
        c_state = jnp.concatenate([c_state[:, 0:Hp], z], axis=1)

        # --- iterations 1..T-1: layer-0 step t + layer-1 step t-1, fused -----
        for t in range(1, T):                       # fully unrolled (T static, small)
            fused = jnp.dot(h_state, wfused, preferred_element_type=jnp.float32)
            acts = fused + xproj[t * Bp:(t + 1) * Bp, :]
            h_state, c_state = packed_cell(acts, c_state)

        # --- iteration T: layer-1 step T-1 only (layer-0 half unused junk) ---
        fused = jnp.dot(h_state, wfused, preferred_element_type=jnp.float32)
        h_state, _ = packed_cell(fused + bcomb, c_state)
        h1 = h_state[:, Hp:Hp2]                     # layer-1 hidden at last step

        # --- fc on last step's layer-1 hidden state (lane-dense output) ------
        out_ref[...] = (jnp.dot(h1, fcw_ref[...],
                                preferred_element_type=jnp.float32) + fcb_ref[...])

    return kernel


# ----------------------------------------------------------------------------
# Wrapper-side weight packing (pure layout plumbing, one-time cost)
# ----------------------------------------------------------------------------
_GATE_ORDER = ("i", "f", "o", "g")   # sigmoid gates first, tanh gate last


def _split_gates(w, H):
    """(in, 4H) in PyTorch (i, f, g, o) order -> dict of (in, H) blocks."""
    return {"i": w[:, 0:H], "f": w[:, H:2 * H],
            "g": w[:, 2 * H:3 * H], "o": w[:, 3 * H:4 * H]}


def _pad_cols(w, H, Hp):
    return jnp.pad(w, ((0, 0), (0, Hp - H)))


def _pad_rows_cols(w, H, Hp):
    return jnp.pad(w, ((0, Hp - H), (0, Hp - H)))


def _pack_recurrent(whh0, wih1, whh1, H, Hp):
    """Block matrix [[whh0, wih1], [0, whh1]] with gate columns permuted to
    [i0 i1 f0 f1 o0 o1 g0 g1]; result shape (2*Hp, 8*Hp)."""
    g_hh0 = _split_gates(whh0, H)
    g_ih1 = _split_gates(wih1, H)
    g_hh1 = _split_gates(whh1, H)
    zero = jnp.zeros((Hp, Hp), jnp.float32)
    cols = []
    for name in _GATE_ORDER:
        cols.append(jnp.concatenate(        # layer-0 gate column block
            [_pad_rows_cols(g_hh0[name], H, Hp), zero], axis=0))
        cols.append(jnp.concatenate(        # layer-1 gate column block
            [_pad_rows_cols(g_ih1[name], H, Hp),
             _pad_rows_cols(g_hh1[name], H, Hp)], axis=0))
    return jnp.concatenate(cols, axis=1)


def _pack_input_proj(wih0, H, Hp):
    """wih0 (I, 4H) -> (I, 8*Hp): layer-0 gate columns filled, layer-1 zero."""
    I = wih0.shape[0]
    g = _split_gates(wih0, H)
    zero = jnp.zeros((I, Hp), jnp.float32)
    cols = []
    for name in _GATE_ORDER:
        cols.append(_pad_cols(g[name], H, Hp))
        cols.append(zero)
    return jnp.concatenate(cols, axis=1)


def _pack_bias(b0, b1, H, Hp):
    """(1, 4H) each -> combined (1, 8*Hp): b0 in layer-0 columns, b1 in layer-1."""
    g0, g1 = _split_gates(b0, H), _split_gates(b1, H)
    cols = []
    for name in _GATE_ORDER:
        cols.append(_pad_cols(g0[name], H, Hp))
        cols.append(_pad_cols(g1[name], H, Hp))
    return jnp.concatenate(cols, axis=1)


def lstm_model_forward(x, params):
    """x: (B, T, I) float32  ->  (B, 1) float32."""
    B, T, I = x.shape
    H = params["whh0"].shape[0]
    Bp = ((B + 7) // 8) * 8          # batch padded to full sublane groups
    Hp = ((H + 127) // 128) * 128    # each gate padded to a full 128-lane tile
    OUT_LANES = 128                  # lane-dense fc output

    # Time-major, batch-padded input: (T*Bp, I)
    x_pad = jnp.pad(x, ((0, Bp - B), (0, 0), (0, 0)))
    x_flat = jnp.transpose(x_pad, (1, 0, 2)).reshape(T * Bp, I)

    wih0 = _pack_input_proj(params["wih0"], H, Hp)                       # (I, 8Hp)
    bcomb = _pack_bias(params["b0"], params["b1"], H, Hp)                # (1, 8Hp)
    wfused = _pack_recurrent(params["whh0"], params["wih1"],
                             params["whh1"], H, Hp)                      # (2Hp, 8Hp)
    fcw = jnp.pad(params["fcw"], ((0, Hp - H), (0, OUT_LANES - 1)))      # (Hp, 128)
    fcb = jnp.pad(params["fcb"], ((0, 0), (0, OUT_LANES - 1)))           # (1, 128)

    args = (x_flat, wih0, bcomb, wfused, fcw, fcb)
    out_pad = pl.pallas_call(
        make_lstm_kernel(T, Bp, Hp, I),
        out_shape=jax.ShapeDtypeStruct((Bp, OUT_LANES), jnp.float32),
        in_specs=[pl.BlockSpec(memory_space=pltpu.MemorySpace.VMEM)] * len(args),
        out_specs=pl.BlockSpec(memory_space=pltpu.MemorySpace.VMEM),
    )(*args)
    return out_pad[:B, :1]


# ----------------------------------------------------------------------------
# Pure-JAX reference (unpadded, PyTorch semantics)
# ----------------------------------------------------------------------------
def _reference(x, params):
    B, T, _ = x.shape
    H = params["whh0"].shape[0]

    def run_layer(seq, wih, whh, b):
        h = jnp.zeros((B, H), jnp.float32)
        c = jnp.zeros((B, H), jnp.float32)
        outs = []
        for t in range(T):
            gates = seq[:, t, :] @ wih + h @ whh + b
            i = jax.nn.sigmoid(gates[:, 0:H])
            f = jax.nn.sigmoid(gates[:, H:2 * H])
            g = jnp.tanh(gates[:, 2 * H:3 * H])
            o = jax.nn.sigmoid(gates[:, 3 * H:4 * H])
            c = f * c + i * g
            h = o * jnp.tanh(c)
            outs.append(h)
        return jnp.stack(outs, axis=1), h

    seq0, _ = run_layer(x, params["wih0"], params["whh0"], params["b0"])
    _, h1 = run_layer(seq0, params["wih1"], params["whh1"], params["b1"])
    return h1 @ params["fcw"] + params["fcb"]


def init_params(key, input_size, hidden_size):
    """Deterministic init mimicking PyTorch LSTM/Linear defaults U(-1/sqrt(H), 1/sqrt(H))."""
    H, I = hidden_size, input_size
    bound = 1.0 / (H ** 0.5)
    ks = jax.random.split(key, 10)

    def u(k, shape):
        return jax.random.uniform(k, shape, jnp.float32, -bound, bound)

    return {
        # layer 0: weight_ih_l0 (4H, I) / weight_hh_l0 (4H, H), stored transposed
        "wih0": u(ks[0], (I, 4 * H)),
        "whh0": u(ks[1], (H, 4 * H)),
        "b0": u(ks[2], (1, 4 * H)) + u(ks[3], (1, 4 * H)),  # b_ih + b_hh
        # layer 1
        "wih1": u(ks[4], (H, 4 * H)),
        "whh1": u(ks[5], (H, 4 * H)),
        "b1": u(ks[6], (1, 4 * H)) + u(ks[7], (1, 4 * H)),
        # fc: Linear(H, 1) -> weight stored transposed (H, 1), bias (1, 1)
        "fcw": u(ks[8], (H, 1)),
        "fcb": u(ks[9], (1, 1)),
    }


if __name__ == "__main__":
    B, T, I, H = 4, 8, 1, 50  # module defaults: input_size=1, hidden_size=50

    key = jax.random.PRNGKey(0)
    k_x, k_p = jax.random.split(key)
    x = jax.random.normal(k_x, (B, T, I), jnp.float32)
    params = init_params(k_p, I, H)

    out = jax.block_until_ready(lstm_model_forward(x, params))
    ref = _reference(x, params)

    assert out.shape == (B, 1), out.shape
    assert jnp.allclose(out, ref, rtol=1e-4, atol=1e-4), (out, ref)
    print("KERNEL_OK")
</pallas_src>

<mosaic_0001>
module attributes {stable_mosaic.version = 11 : i64} {
  func.func @kernel(%arg0: memref<64x1xf32, #tpu.memory_space<vmem>>, %arg1: memref<1x1024xf32, #tpu.memory_space<vmem>>, %arg2: memref<1x1024xf32, #tpu.memory_space<vmem>>, %arg3: memref<256x1024xf32, #tpu.memory_space<vmem>>, %arg4: memref<128x128xf32, #tpu.memory_space<vmem>>, %arg5: memref<1x128xf32, #tpu.memory_space<vmem>>, %arg6: memref<8x128xf32, #tpu.memory_space<vmem>>) attributes {dimension_semantics = [], scalar_prefetch = 0 : i64, scratch_operands = 0 : i64, tpu.core_type = #tpu.core_type<tc>} {
    %c0 = arith.constant 0 : index
    %c0_0 = arith.constant 0 : index
    %0 = vector.load %arg2[%c0, %c0_0] : memref<1x1024xf32, #tpu.memory_space<vmem>>, vector<1x1024xf32>
    %c0_1 = arith.constant 0 : index
    %c0_2 = arith.constant 0 : index
    %1 = vector.load %arg0[%c0_1, %c0_2] : memref<64x1xf32, #tpu.memory_space<vmem>>, vector<64x1xf32>
    %c0_3 = arith.constant 0 : index
    %c0_4 = arith.constant 0 : index
    %2 = vector.load %arg1[%c0_3, %c0_4] : memref<1x1024xf32, #tpu.memory_space<vmem>>, vector<1x1024xf32>
    %3 = vector.broadcast %1 : vector<64x1xf32> to vector<64x1024xf32>
    %4 = vector.broadcast %2 : vector<1x1024xf32> to vector<64x1024xf32>
    %5 = arith.mulf %3, %4 : vector<64x1024xf32>
    %6 = vector.broadcast %0 : vector<1x1024xf32> to vector<64x1024xf32>
    %7 = arith.addf %5, %6 : vector<64x1024xf32>
    %c0_5 = arith.constant 0 : index
    %c0_6 = arith.constant 0 : index
    %8 = vector.load %arg3[%c0_5, %c0_6] : memref<256x1024xf32, #tpu.memory_space<vmem>>, vector<256x1024xf32>
    %9 = vector.extract_strided_slice %7 {offsets = [0, 0], sizes = [8, 1024], strides = [1, 1]} : vector<64x1024xf32> to vector<8x1024xf32>
    %cst = arith.constant 0.000000e+00 : f32
    %10 = vector.broadcast %cst : f32 to vector<8x256xf32>
    %11 = vector.extract_strided_slice %9 {offsets = [0, 0], sizes = [8, 768], strides = [1, 1]} : vector<8x1024xf32> to vector<8x768xf32>
    %12 = arith.negf %11 : vector<8x768xf32>
    %13 = math.exp %12 : vector<8x768xf32>
    %cst_7 = arith.constant 1.000000e+00 : f32
    %14 = vector.broadcast %cst_7 : f32 to vector<8x768xf32>
    %15 = arith.addf %14, %13 : vector<8x768xf32>
    %16 = arith.divf %14, %15 : vector<8x768xf32>
    %17 = vector.extract_strided_slice %16 {offsets = [0, 0], sizes = [8, 256], strides = [1, 1]} : vector<8x768xf32> to vector<8x256xf32>
    %18 = vector.extract_strided_slice %16 {offsets = [0, 256], sizes = [8, 256], strides = [1, 1]} : vector<8x768xf32> to vector<8x256xf32>
    %19 = vector.extract_strided_slice %16 {offsets = [0, 512], sizes = [8, 256], strides = [1, 1]} : vector<8x768xf32> to vector<8x256xf32>
    %20 = vector.extract_strided_slice %9 {offsets = [0, 768], sizes = [8, 256], strides = [1, 1]} : vector<8x1024xf32> to vector<8x256xf32>
    %21 = math.tanh %20 : vector<8x256xf32>
    %22 = arith.mulf %18, %10 : vector<8x256xf32>
    %23 = arith.mulf %17, %21 : vector<8x256xf32>
    %24 = arith.addf %22, %23 : vector<8x256xf32>
    %25 = math.tanh %24 : vector<8x256xf32>
    %26 = arith.mulf %19, %25 : vector<8x256xf32>
    %cst_8 = arith.constant 0.000000e+00 : f32
    %27 = vector.broadcast %cst_8 : f32 to vector<8x128xf32>
    %28 = vector.extract_strided_slice %26 {offsets = [0, 0], sizes = [8, 128], strides = [1, 1]} : vector<8x256xf32> to vector<8x128xf32>
    %29 = tpu.concatenate %28, %27 in 1 : vector<8x128xf32>, vector<8x128xf32> -> vector<8x256xf32>
    %30 = vector.extract_strided_slice %24 {offsets = [0, 0], sizes = [8, 128], strides = [1, 1]} : vector<8x256xf32> to vector<8x128xf32>
    %31 = tpu.concatenate %30, %27 in 1 : vector<8x128xf32>, vector<8x128xf32> -> vector<8x256xf32>
    %cst_9 = arith.constant dense<0.000000e+00> : vector<8x1024xf32>
    %32 = tpu.matmul %29, %8, %cst_9 {dimension_numbers = #tpu.dot_dimension_numbers<[1], [0], [0], [1], [0, 0, 1, 1], [], []>} : vector<8x256xf32>, vector<256x1024xf32>, vector<8x1024xf32> -> vector<8x1024xf32>
    %33 = vector.extract_strided_slice %7 {offsets = [8, 0], sizes = [8, 1024], strides = [1, 1]} : vector<64x1024xf32> to vector<8x1024xf32>
    %34 = arith.addf %32, %33 : vector<8x1024xf32>
    %35 = vector.extract_strided_slice %34 {offsets = [0, 0], sizes = [8, 768], strides = [1, 1]} : vector<8x1024xf32> to vector<8x768xf32>
    %36 = arith.negf %35 : vector<8x768xf32>
    %37 = math.exp %36 : vector<8x768xf32>
    %cst_10 = arith.constant 1.000000e+00 : f32
    %38 = vector.broadcast %cst_10 : f32 to vector<8x768xf32>
    %39 = arith.addf %38, %37 : vector<8x768xf32>
    %40 = arith.divf %38, %39 : vector<8x768xf32>
    %41 = vector.extract_strided_slice %40 {offsets = [0, 0], sizes = [8, 256], strides = [1, 1]} : vector<8x768xf32> to vector<8x256xf32>
    %42 = vector.extract_strided_slice %40 {offsets = [0, 256], sizes = [8, 256], strides = [1, 1]} : vector<8x768xf32> to vector<8x256xf32>
    %43 = vector.extract_strided_slice %40 {offsets = [0, 512], sizes = [8, 256], strides = [1, 1]} : vector<8x768xf32> to vector<8x256xf32>
    %44 = vector.extract_strided_slice %34 {offsets = [0, 768], sizes = [8, 256], strides = [1, 1]} : vector<8x1024xf32> to vector<8x256xf32>
    %45 = math.tanh %44 : vector<8x256xf32>
    %46 = arith.mulf %42, %31 : vector<8x256xf32>
    %47 = arith.mulf %41, %45 : vector<8x256xf32>
    %48 = arith.addf %46, %47 : vector<8x256xf32>
    %49 = math.tanh %48 : vector<8x256xf32>
    %50 = arith.mulf %43, %49 : vector<8x256xf32>
    %cst_11 = arith.constant dense<0.000000e+00> : vector<8x1024xf32>
    %51 = tpu.matmul %50, %8, %cst_11 {dimension_numbers = #tpu.dot_dimension_numbers<[1], [0], [0], [1], [0, 0, 1, 1], [], []>} : vector<8x256xf32>, vector<256x1024xf32>, vector<8x1024xf32> -> vector<8x1024xf32>
    %52 = vector.extract_strided_slice %7 {offsets = [16, 0], sizes = [8, 1024], strides = [1, 1]} : vector<64x1024xf32> to vector<8x1024xf32>
    %53 = arith.addf %51, %52 : vector<8x1024xf32>
    %54 = vector.extract_strided_slice %53 {offsets = [0, 0], sizes = [8, 768], strides = [1, 1]} : vector<8x1024xf32> to vector<8x768xf32>
    %55 = arith.negf %54 : vector<8x768xf32>
    %56 = math.exp %55 : vector<8x768xf32>
    %cst_12 = arith.constant 1.000000e+00 : f32
    %57 = vector.broadcast %cst_12 : f32 to vector<8x768xf32>
    %58 = arith.addf %57, %56 : vector<8x768xf32>
    %59 = arith.divf %57, %58 : vector<8x768xf32>
    %60 = vector.extract_strided_slice %59 {offsets = [0, 0], sizes = [8, 256], strides = [1, 1]} : vector<8x768xf32> to vector<8x256xf32>
    %61 = vector.extract_strided_slice %59 {offsets = [0, 256], sizes = [8, 256], strides = [1, 1]} : vector<8x768xf32> to vector<8x256xf32>
    %62 = vector.extract_strided_slice %59 {offsets = [0, 512], sizes = [8, 256], strides = [1, 1]} : vector<8x768xf32> to vector<8x256xf32>
    %63 = vector.extract_strided_slice %53 {offsets = [0, 768], sizes = [8, 256], strides = [1, 1]} : vector<8x1024xf32> to vector<8x256xf32>
    %64 = math.tanh %63 : vector<8x256xf32>
    %65 = arith.mulf %61, %48 : vector<8x256xf32>
    %66 = arith.mulf %60, %64 : vector<8x256xf32>
    %67 = arith.addf %65, %66 : vector<8x256xf32>
    %68 = math.tanh %67 : vector<8x256xf32>
    %69 = arith.mulf %62, %68 : vector<8x256xf32>
    %cst_13 = arith.constant dense<0.000000e+00> : vector<8x1024xf32>
    %70 = tpu.matmul %69, %8, %cst_13 {dimension_numbers = #tpu.dot_dimension_numbers<[1], [0], [0], [1], [0, 0, 1, 1], [], []>} : vector<8x256xf32>, vector<256x1024xf32>, vector<8x1024xf32> -> vector<8x1024xf32>
    %71 = vector.extract_strided_slice %7 {offsets = [24, 0], sizes = [8, 1024], strides = [1, 1]} : vector<64x1024xf32> to vector<8x1024xf32>
    %72 = arith.addf %70, %71 : vector<8x1024xf32>
    %73 = vector.extract_strided_slice %72 {offsets = [0, 0], sizes = [8, 768], strides = [1, 1]} : vector<8x1024xf32> to vector<8x768xf32>
    %74 = arith.negf %73 : vector<8x768xf32>
    %75 = math.exp %74 : vector<8x768xf32>
    %cst_14 = arith.constant 1.000000e+00 : f32
    %76 = vector.broadcast %cst_14 : f32 to vector<8x768xf32>
    %77 = arith.addf %76, %75 : vector<8x768xf32>
    %78 = arith.divf %76, %77 : vector<8x768xf32>
    %79 = vector.extract_strided_slice %78 {offsets = [0, 0], sizes = [8, 256], strides = [1, 1]} : vector<8x768xf32> to vector<8x256xf32>
    %80 = vector.extract_strided_slice %78 {offsets = [0, 256], sizes = [8, 256], strides = [1, 1]} : vector<8x768xf32> to vector<8x256xf32>
    %81 = vector.extract_strided_slice %78 {offsets = [0, 512], sizes = [8, 256], strides = [1, 1]} : vector<8x768xf32> to vector<8x256xf32>
    %82 = vector.extract_strided_slice %72 {offsets = [0, 768], sizes = [8, 256], strides = [1, 1]} : vector<8x1024xf32> to vector<8x256xf32>
    %83 = math.tanh %82 : vector<8x256xf32>
    %84 = arith.mulf %80, %67 : vector<8x256xf32>
    %85 = arith.mulf %79, %83 : vector<8x256xf32>
    %86 = arith.addf %84, %85 : vector<8x256xf32>
    %87 = math.tanh %86 : vector<8x256xf32>
    %88 = arith.mulf %81, %87 : vector<8x256xf32>
    %cst_15 = arith.constant dense<0.000000e+00> : vector<8x1024xf32>
    %89 = tpu.matmul %88, %8, %cst_15 {dimension_numbers = #tpu.dot_dimension_numbers<[1], [0], [0], [1], [0, 0, 1, 1], [], []>} : vector<8x256xf32>, vector<256x1024xf32>, vector<8x1024xf32> -> vector<8x1024xf32>
    %90 = vector.extract_strided_slice %7 {offsets = [32, 0], sizes = [8, 1024], strides = [1, 1]} : vector<64x1024xf32> to vector<8x1024xf32>
    %91 = arith.addf %89, %90 : vector<8x1024xf32>
    %92 = vector.extract_strided_slice %91 {offsets = [0, 0], sizes = [8, 768], strides = [1, 1]} : vector<8x1024xf32> to vector<8x768xf32>
    %93 = arith.negf %92 : vector<8x768xf32>
    %94 = math.exp %93 : vector<8x768xf32>
    %cst_16 = arith.constant 1.000000e+00 : f32
    %95 = vector.broadcast %cst_16 : f32 to vector<8x768xf32>
    %96 = arith.addf %95, %94 : vector<8x768xf32>
    %97 = arith.divf %95, %96 : vector<8x768xf32>
    %98 = vector.extract_strided_slice %97 {offsets = [0, 0], sizes = [8, 256], strides = [1, 1]} : vector<8x768xf32> to vector<8x256xf32>
    %99 = vector.extract_strided_slice %97 {offsets = [0, 256], sizes = [8, 256], strides = [1, 1]} : vector<8x768xf32> to vector<8x256xf32>
    %100 = vector.extract_strided_slice %97 {offsets = [0, 512], sizes = [8, 256], strides = [1, 1]} : vector<8x768xf32> to vector<8x256xf32>
    %101 = vector.extract_strided_slice %91 {offsets = [0, 768], sizes = [8, 256], strides = [1, 1]} : vector<8x1024xf32> to vector<8x256xf32>
    %102 = math.tanh %101 : vector<8x256xf32>
    %103 = arith.mulf %99, %86 : vector<8x256xf32>
    %104 = arith.mulf %98, %102 : vector<8x256xf32>
    %105 = arith.addf %103, %104 : vector<8x256xf32>
    %106 = math.tanh %105 : vector<8x256xf32>
    %107 = arith.mulf %100, %106 : vector<8x256xf32>
    %cst_17 = arith.constant dense<0.000000e+00> : vector<8x1024xf32>
    %108 = tpu.matmul %107, %8, %cst_17 {dimension_numbers = #tpu.dot_dimension_numbers<[1], [0], [0], [1], [0, 0, 1, 1], [], []>} : vector<8x256xf32>, vector<256x1024xf32>, vector<8x1024xf32> -> vector<8x1024xf32>
    %109 = vector.extract_strided_slice %7 {offsets = [40, 0], sizes = [8, 1024], strides = [1, 1]} : vector<64x1024xf32> to vector<8x1024xf32>
    %110 = arith.addf %108, %109 : vector<8x1024xf32>
    %111 = vector.extract_strided_slice %110 {offsets = [0, 0], sizes = [8, 768], strides = [1, 1]} : vector<8x1024xf32> to vector<8x768xf32>
    %112 = arith.negf %111 : vector<8x768xf32>
    %113 = math.exp %112 : vector<8x768xf32>
    %cst_18 = arith.constant 1.000000e+00 : f32
    %114 = vector.broadcast %cst_18 : f32 to vector<8x768xf32>
    %115 = arith.addf %114, %113 : vector<8x768xf32>
    %116 = arith.divf %114, %115 : vector<8x768xf32>
    %117 = vector.extract_strided_slice %116 {offsets = [0, 0], sizes = [8, 256], strides = [1, 1]} : vector<8x768xf32> to vector<8x256xf32>
    %118 = vector.extract_strided_slice %116 {offsets = [0, 256], sizes = [8, 256], strides = [1, 1]} : vector<8x768xf32> to vector<8x256xf32>
    %119 = vector.extract_strided_slice %116 {offsets = [0, 512], sizes = [8, 256], strides = [1, 1]} : vector<8x768xf32> to vector<8x256xf32>
    %120 = vector.extract_strided_slice %110 {offsets = [0, 768], sizes = [8, 256], strides = [1, 1]} : vector<8x1024xf32> to vector<8x256xf32>
    %121 = math.tanh %120 : vector<8x256xf32>
    %122 = arith.mulf %118, %105 : vector<8x256xf32>
    %123 = arith.mulf %117, %121 : vector<8x256xf32>
    %124 = arith.addf %122, %123 : vector<8x256xf32>
    %125 = math.tanh %124 : vector<8x256xf32>
    %126 = arith.mulf %119, %125 : vector<8x256xf32>
    %cst_19 = arith.constant dense<0.000000e+00> : vector<8x1024xf32>
    %127 = tpu.matmul %126, %8, %cst_19 {dimension_numbers = #tpu.dot_dimension_numbers<[1], [0], [0], [1], [0, 0, 1, 1], [], []>} : vector<8x256xf32>, vector<256x1024xf32>, vector<8x1024xf32> -> vector<8x1024xf32>
    %128 = vector.extract_strided_slice %7 {offsets = [48, 0], sizes = [8, 1024], strides = [1, 1]} : vector<64x1024xf32> to vector<8x1024xf32>
    %129 = arith.addf %127, %128 : vector<8x1024xf32>
    %130 = vector.extract_strided_slice %129 {offsets = [0, 0], sizes = [8, 768], strides = [1, 1]} : vector<8x1024xf32> to vector<8x768xf32>
    %131 = arith.negf %130 : vector<8x768xf32>
    %132 = math.exp %131 : vector<8x768xf32>
    %cst_20 = arith.constant 1.000000e+00 : f32
    %133 = vector.broadcast %cst_20 : f32 to vector<8x768xf32>
    %134 = arith.addf %133, %132 : vector<8x768xf32>
    %135 = arith.divf %133, %134 : vector<8x768xf32>
    %136 = vector.extract_strided_slice %135 {offsets = [0, 0], sizes = [8, 256], strides = [1, 1]} : vector<8x768xf32> to vector<8x256xf32>
    %137 = vector.extract_strided_slice %135 {offsets = [0, 256], sizes = [8, 256], strides = [1, 1]} : vector<8x768xf32> to vector<8x256xf32>
    %138 = vector.extract_strided_slice %135 {offsets = [0, 512], sizes = [8, 256], strides = [1, 1]} : vector<8x768xf32> to vector<8x256xf32>
    %139 = vector.extract_strided_slice %129 {offsets = [0, 768], sizes = [8, 256], strides = [1, 1]} : vector<8x1024xf32> to vector<8x256xf32>
    %140 = math.tanh %139 : vector<8x256xf32>
    %141 = arith.mulf %137, %124 : vector<8x256xf32>
    %142 = arith.mulf %136, %140 : vector<8x256xf32>
    %143 = arith.addf %141, %142 : vector<8x256xf32>
    %144 = math.tanh %143 : vector<8x256xf32>
    %145 = arith.mulf %138, %144 : vector<8x256xf32>
    %cst_21 = arith.constant dense<0.000000e+00> : vector<8x1024xf32>
    %146 = tpu.matmul %145, %8, %cst_21 {dimension_numbers = #tpu.dot_dimension_numbers<[1], [0], [0], [1], [0, 0, 1, 1], [], []>} : vector<8x256xf32>, vector<256x1024xf32>, vector<8x1024xf32> -> vector<8x1024xf32>
    %147 = vector.extract_strided_slice %7 {offsets = [56, 0], sizes = [8, 1024], strides = [1, 1]} : vector<64x1024xf32> to vector<8x1024xf32>
    %148 = arith.addf %146, %147 : vector<8x1024xf32>
    %149 = vector.extract_strided_slice %148 {offsets = [0, 0], sizes = [8, 768], strides = [1, 1]} : vector<8x1024xf32> to vector<8x768xf32>
    %150 = arith.negf %149 : vector<8x768xf32>
    %151 = math.exp %150 : vector<8x768xf32>
    %cst_22 = arith.constant 1.000000e+00 : f32
    %152 = vector.broadcast %cst_22 : f32 to vector<8x768xf32>
    %153 = arith.addf %152, %151 : vector<8x768xf32>
    %154 = arith.divf %152, %153 : vector<8x768xf32>
    %155 = vector.extract_strided_slice %154 {offsets = [0, 0], sizes = [8, 256], strides = [1, 1]} : vector<8x768xf32> to vector<8x256xf32>
    %156 = vector.extract_strided_slice %154 {offsets = [0, 256], sizes = [8, 256], strides = [1, 1]} : vector<8x768xf32> to vector<8x256xf32>
    %157 = vector.extract_strided_slice %154 {offsets = [0, 512], sizes = [8, 256], strides = [1, 1]} : vector<8x768xf32> to vector<8x256xf32>
    %158 = vector.extract_strided_slice %148 {offsets = [0, 768], sizes = [8, 256], strides = [1, 1]} : vector<8x1024xf32> to vector<8x256xf32>
    %159 = math.tanh %158 : vector<8x256xf32>
    %160 = arith.mulf %156, %143 : vector<8x256xf32>
    %161 = arith.mulf %155, %159 : vector<8x256xf32>
    %162 = arith.addf %160, %161 : vector<8x256xf32>
    %163 = math.tanh %162 : vector<8x256xf32>
    %164 = arith.mulf %157, %163 : vector<8x256xf32>
    %cst_23 = arith.constant dense<0.000000e+00> : vector<8x1024xf32>
    %165 = tpu.matmul %164, %8, %cst_23 {dimension_numbers = #tpu.dot_dimension_numbers<[1], [0], [0], [1], [0, 0, 1, 1], [], []>} : vector<8x256xf32>, vector<256x1024xf32>, vector<8x1024xf32> -> vector<8x1024xf32>
    %166 = vector.broadcast %0 : vector<1x1024xf32> to vector<8x1024xf32>
    %167 = arith.addf %165, %166 : vector<8x1024xf32>
    %168 = vector.extract_strided_slice %167 {offsets = [0, 0], sizes = [8, 768], strides = [1, 1]} : vector<8x1024xf32> to vector<8x768xf32>
    %169 = arith.negf %168 : vector<8x768xf32>
    %170 = math.exp %169 : vector<8x768xf32>
    %cst_24 = arith.constant 1.000000e+00 : f32
    %171 = vector.broadcast %cst_24 : f32 to vector<8x768xf32>
    %172 = arith.addf %171, %170 : vector<8x768xf32>
    %173 = arith.divf %171, %172 : vector<8x768xf32>
    %174 = vector.extract_strided_slice %173 {offsets = [0, 0], sizes = [8, 256], strides = [1, 1]} : vector<8x768xf32> to vector<8x256xf32>
    %175 = vector.extract_strided_slice %173 {offsets = [0, 256], sizes = [8, 256], strides = [1, 1]} : vector<8x768xf32> to vector<8x256xf32>
    %176 = vector.extract_strided_slice %173 {offsets = [0, 512], sizes = [8, 256], strides = [1, 1]} : vector<8x768xf32> to vector<8x256xf32>
    %177 = vector.extract_strided_slice %167 {offsets = [0, 768], sizes = [8, 256], strides = [1, 1]} : vector<8x1024xf32> to vector<8x256xf32>
    %178 = math.tanh %177 : vector<8x256xf32>
    %179 = arith.mulf %175, %162 : vector<8x256xf32>
    %180 = arith.mulf %174, %178 : vector<8x256xf32>
    %181 = arith.addf %179, %180 : vector<8x256xf32>
    %182 = math.tanh %181 : vector<8x256xf32>
    %183 = arith.mulf %176, %182 : vector<8x256xf32>
    %184 = vector.extract_strided_slice %183 {offsets = [0, 128], sizes = [8, 128], strides = [1, 1]} : vector<8x256xf32> to vector<8x128xf32>
    %c0_25 = arith.constant 0 : index
    %c0_26 = arith.constant 0 : index
    %185 = vector.load %arg4[%c0_25, %c0_26] : memref<128x128xf32, #tpu.memory_space<vmem>>, vector<128x128xf32>
    %cst_27 = arith.constant dense<0.000000e+00> : vector<8x128xf32>
    %186 = tpu.matmul %184, %185, %cst_27 {dimension_numbers = #tpu.dot_dimension_numbers<[1], [0], [0], [1], [0, 0, 1, 1], [], []>} : vector<8x128xf32>, vector<128x128xf32>, vector<8x128xf32> -> vector<8x128xf32>
    %c0_28 = arith.constant 0 : index
    %c0_29 = arith.constant 0 : index
    %187 = vector.load %arg5[%c0_28, %c0_29] : memref<1x128xf32, #tpu.memory_space<vmem>>, vector<1x128xf32>
    %188 = vector.broadcast %187 : vector<1x128xf32> to vector<8x128xf32>
    %189 = arith.addf %186, %188 : vector<8x128xf32>
    %c0_30 = arith.constant 0 : index
    %c0_31 = arith.constant 0 : index
    %190 = vector.load %arg6[%c0_30, %c0_31] : memref<8x128xf32, #tpu.memory_space<vmem>>, vector<8x128xf32>
    tpu.vector_store %arg6[%c0_30, %c0_31], %189 {strides = array<i32>} : memref<8x128xf32, #tpu.memory_space<vmem>>, vector<8x128xf32>,
    return
  }
}

</mosaic_0001>

<bundles_post_ra>
// kernel: tpu_custom_call.1
= control target key start
LH: loop header
LB: loop body
LE: loop exit
PB: predicated region body
PF: predicated region fallthrough
CT: control target
= control target key end

     0   :  { %11 = vsyncpa [#allocation3], 0  ;;  %s7526_s0 = inlined_call_operand.vmem [shape: f32[64,1], index: 0, kind: input, shape index: {}]   ;;  %s7527_s1 = inlined_call_operand.vmem [shape: f32[1,1024], index: 1, kind: input, shape index: {}]   ;;  %s7528_s2 = inlined_call_operand.vmem [shape: f32[1,1024], index: 2, kind: input, shape index: {}]   ;;  %s7529_s3 = inlined_call_operand.hbm [shape: f32[256,1024], index: 3, kind: input, shape index: {}]   ;;  %s7530_s4 = inlined_call_operand.hbm [shape: f32[128,128], index: 4, kind: input, shape index: {}]   ;;  %s7531_s5 = inlined_call_operand.vmem [shape: f32[1,128], index: 5, kind: input, shape index: {}]   ;;  %s7532_s6 = inlined_call_operand.hbm [shape: f32[8,128], index: 6, kind: output, shape index: {}]  }
   0x1   :  { %12 = vsyncpa [#allocation6], 0 }
   0x2   :  { %13 = vsyncpa [#allocation4], 0  ;;  %s5836_s21 = smov [#allocation2]   ;;  %s5764_s25 = scalar_lea.hbm %s7529_s3, 32768 }
   0x3   :  { %s25_s22 = sshll.u32 %s5836_s21, 4  ;;  %p5765_p0 = scmp.ne.s32.totalorder %s7529_s3, %s5764_s25  ;;  %s26_s22 = int_to_ptr.vmem [resolvable:$true] %s25_s22 }
   0x4   :  { %p5768_p1 = scmp.lt.u32.totalorder %s5764_s25, %s7529_s3 }
   0x6   :  { %p5770_p2 = pnand %p5768_p1, %p5765_p0 }
   0x8   :  { %5773 = shalt.err (!%p5770_p2)
}
   0x9   :  { %s5774_s30 = scalar_lea.vmem %s26_s22, 32768  ;;  %p5779_p4 = scmp.lt.s32.totalorder %s26_s22, %s26_s22 }
   0xa   :  { %p5775_p3 = scmp.ne.s32.totalorder %s26_s22, %s5774_s30  ;;  %p5780_p5 = scmp.lt.s32.totalorder %s5774_s30, %s5774_s30 }
   0xc   :  { %p5781_p6 = por %p5780_p5, %p5779_p4 }
   0xe   :  { %p5782_p7 = pnand %p5781_p6, %p5775_p3 }
  0x10   :  { %5785 = shalt.err (!%p5782_p7)
}
  0x11   :  { %s5837_s7 = smov 1024   ;;  %s5838_s8 = smov 64  }
  0x12   :  { %31 = dma.hbm_to_vmem [thread:$0]  %s7529_s3, 32768, %s26_s22, [#allocation3], %s5837_s7, %s5837_s7, %s5838_s8  }
  0x13   :  { %s5839_s11 = smov [#allocation5]   ;;  %s5786_s15 = scalar_lea.hbm %s7530_s4, 2048 }
  0x14   :  { %s37_s12 = sshll.u32 %s5839_s11, 4  ;;  %p5787_p8 = scmp.ne.s32.totalorder %s7530_s4, %s5786_s15  ;;  %s38_s12 = int_to_ptr.vmem [resolvable:$true] %s37_s12 }
  0x15   :  { %p5790_p9 = scmp.lt.u32.totalorder %s5786_s15, %s7530_s4 }
  0x17   :  { %p5792_p10 = pnand %p5790_p9, %p5787_p8 }
  0x19   :  { %5795 = shalt.err (!%p5792_p10)
}
  0x1a   :  { %s5796_s20 = scalar_lea.vmem %s38_s12, 2048  ;;  %p5801_p12 = scmp.lt.s32.totalorder %s38_s12, %s38_s12 }
  0x1b   :  { %p5797_p11 = scmp.ne.s32.totalorder %s38_s12, %s5796_s20  ;;  %p5802_p13 = scmp.lt.s32.totalorder %s5796_s20, %s5796_s20 }
  0x1d   :  { %p5803_p0 = por %p5802_p13, %p5801_p12 }
  0x1f   :  { %p5804_p1 = pnand %p5803_p0, %p5797_p11 }
  0x21   :  { %5807 = shalt.err (!%p5804_p1)
}
  0x22   :  { %s5840_s3 = smov 128   ;;  %s5841_s21 = smov 8  }
  0x23   :  { %43 = dma.hbm_to_vmem [thread:$0]  %s7530_s4, 2048, %s38_s12, [#allocation6], %s5840_s3, %s5840_s3, %s5841_s21  }
  0x24   :  { %5830 = dma.done.wait [#allocation3], 32768  }
  0x25   :  { %5831 = vsyncadd [#allocation3], 4294934528 }
  0x26   :  { %5832 = dma.done.wait [#allocation6], 2048  }
  0x27   :  { %5833 = vsyncadd [#allocation6], 4294965248  ;;  %v5842_v0 = vmov 0   ;;  %v53_v1 = vld [vmem:[%s7526_s0] sm:$0xff]  ;;  %v54_v2 = vld [vmem:[%s7526_s0 + $0x8] sm:$0xff]  ;;  %v103_v38 = vlaneseq  ;;  %vm5845_vm0 = vmmov 0  }
  0x28   :  { %5506 = vset.pattern.permute.xlu0 %v5842_v0  ;;  %5507 = vset.pattern.permute.xlu1 %v5842_v0  ;;  %v305_v3 = vld [vmem:[#allocation2 + $0x8] sm:$0xff]  ;;  %v307_v6 = vld [vmem:[#allocation2 + $0x18] sm:$0xff]  ;;  %v304_v8 = vld [vmem:[#allocation2] sm:$0xff]  ;;  %s5846_s18 = smov [#allocation7]  }
  0x29   :  { %64 = vperm.xlu0 %5506, %v53_v1   ;;  %v313_v4 = vld [vmem:[#allocation2 + $0x48] sm:$0xff]  ;;  %v315_v7 = vld [vmem:[#allocation2 + $0x58] sm:$0xff]  ;;  %v312_v10 = vld [vmem:[#allocation2 + $0x40] sm:$0xff]  ;;  %v5956_v55 = vshrl.u32 %v103_v38, 7  ;;  %s3312_s19 = sshll.u32 %s5846_s18, 4  ;;  %s3313_s19 = int_to_ptr.vmem [resolvable:$true] %s3312_s19 }
  0x2a   :  { %v5912_v5 = vpack.c.bf16 %v313_v4, %v305_v3  ;;  %v5914_v9 = vpack.c.bf16 %v315_v7, %v307_v6  ;;  %v306_v11 = vld [vmem:[#allocation2 + $0x10] sm:$0xff]  ;;  %v57_v13 = vld [vmem:[%s7526_s0 + $0x20] sm:$0xff]  ;;  %v5920_v14 = vpack.c.bf16 %v312_v10, %v304_v8  ;;  %v321_v16 = vld [vmem:[#allocation2 + $0x88] sm:$0xff]  ;;  %s5808_s20 = scalar_lea.vmem %s3313_s19, 128  ;;  %p5813_p3 = scmp.lt.s32.totalorder %s3313_s19, %s3313_s19 }
  0x2b   :  { %v314_v12 = vld [vmem:[#allocation2 + $0x50] sm:$0xff]  ;;  %v329_v17 = vld [vmem:[#allocation2 + $0xc8] sm:$0xff]  ;;  %v323_v18 = vld [vmem:[#allocation2 + $0x98] sm:$0xff]  ;;  %v109_v62 = vsub.s32 1, %v5956_v55  ;;  %v117_v4 = vsub.s32 3, %v5956_v55  ;;  %v125_v8 = vsub.s32 5, %v5956_v55  ;;  %p5809_p2 = scmp.ne.s32.totalorder %s3313_s19, %s5808_s20  ;;  %p5814_p4 = scmp.lt.s32.totalorder %s5808_s20, %s5808_s20 }
  0x2c   :  { %7838 = vst [vmem:[#allocation11_spill] sm:$0xff] %v5912_v5  ;;  %7839 = vst [vmem:[#allocation12_spill] sm:$0xff] %v5914_v9  ;;  %3424 = vmatprep.subr.bf16.mxu0 %v5912_v5  ;;  %v5922_v15 = vpack.c.bf16 %v314_v12, %v306_v11  ;;  %3488 = vmatprep.subr.bf16.mxu1 %v5914_v9  ;;  %v5925_v19 = vpack.c.bf16 %v329_v17, %v321_v16  ;;  %v331_v20 = vld [vmem:[#allocation2 + $0xd8] sm:$0xff]  ;;  %v320_v21 = vld [vmem:[#allocation2 + $0x80] sm:$0xff]  ;;  %v133_v12 = vsub.s32 7, %v5956_v55 }
  0x2d   :  { %7840 = vst [vmem:[#allocation13_spill] sm:$0xff] %v5920_v14  ;;  %69 = vperm.xlu0 %5506, %v54_v2   ;;  %v328_v22 = vld [vmem:[#allocation2 + $0xc0] sm:$0xff]  ;;  %3426 = vmatpush1.bf16.msra.mxu0 %v5920_v14  ;;  %v5929_v23 = vpack.c.bf16 %v331_v20, %v323_v18  ;;  %v322_v25 = vld [vmem:[#allocation2 + $0x90] sm:$0xff]  ;;  %v337_v27 = vld [vmem:[#allocation2 + $0x108] sm:$0xff]  ;;  %p5815_p5 = por %p5814_p4, %p5813_p3 }
  0x2e   :  { %7841 = vst [vmem:[#allocation14_spill] sm:$0xff] %v5922_v15  ;;  %7842 = vst [vmem:[#allocation15_spill] sm:$0xff] %v5925_v19  ;;  %3490 = vmatpush1.bf16.msra.mxu1 %v5922_v15  ;;  %v5931_v24 = vpack.c.bf16 %v328_v22, %v320_v21  ;;  %v330_v26 = vld [vmem:[#allocation2 + $0xd0] sm:$0xff]  ;;  %3428 = vmatprep.subr.bf16.mxu0 %v5925_v19  ;;  %v345_v29 = vld [vmem:[#allocation2 + $0x148] sm:$0xff] }
  0x2f   :  { %7843 = vst [vmem:[#allocation16_spill] sm:$0xff] %v5929_v23  ;;  %v5934_v28 = vpack.c.bf16 %v330_v26, %v322_v25  ;;  %v339_v30 = vld [vmem:[#allocation2 + $0x118] sm:$0xff]  ;;  %v59_v32 = vld [vmem:[%s7526_s0 + $0x30] sm:$0xff]  ;;  %3492 = vmatprep.subr.bf16.mxu1 %v5929_v23  ;;  %v5940_v33 = vpack.c.bf16 %v345_v29, %v337_v27  ;;  %v336_v35 = vld [vmem:[#allocation2 + $0x100] sm:$0xff]  ;;  %p5816_p6 = pnand %p5815_p5, %p5809_p2 }
  0x30   :  { %7844 = vst [vmem:[#allocation17_spill] sm:$0xff] %v5931_v24  ;;  %v347_v31 = vld [vmem:[#allocation2 + $0x158] sm:$0xff]  ;;  %v344_v36 = vld [vmem:[#allocation2 + $0x140] sm:$0xff]  ;;  %v338_v37 = vld [vmem:[#allocation2 + $0x110] sm:$0xff] }
  0x31   :  { %7845 = vst [vmem:[#allocation18_spill] sm:$0xff] %v5934_v28  ;;  %7846 = vst [vmem:[#allocation19_spill] sm:$0xff] %v5940_v33  ;;  %v5942_v34 = vpack.c.bf16 %v347_v31, %v339_v30  ;;  %84 = vperm.xlu0 %5506, %v57_v13   ;;  %v346_v39 = vld [vmem:[#allocation2 + $0x150] sm:$0xff]  ;;  %v353_v40 = vld [vmem:[#allocation2 + $0x188] sm:$0xff]  ;;  %3430 = vmatpush1.bf16.msra.mxu0 %v5931_v24  ;;  %v5946_v42 = vpack.c.bf16 %v344_v36, %v336_v35 }
  0x32   :  { %v361_v41 = vld [vmem:[#allocation2 + $0x1c8] sm:$0xff]  ;;  %3494 = vmatpush1.bf16.msra.mxu1 %v5934_v28  ;;  %v5948_v43 = vpack.c.bf16 %v346_v39, %v338_v37  ;;  %v355_v44 = vld [vmem:[#allocation2 + $0x198] sm:$0xff]  ;;  %v352_v46 = vld [vmem:[#allocation2 + $0x180] sm:$0xff]  ;;  %3432 = vmatprep.subr.bf16.mxu0 %v5940_v33 }
  0x33   :  { %7847 = vst [vmem:[#allocation20_spill] sm:$0xff] %v5942_v34  ;;  %7848 = vst [vmem:[#allocation21_spill] sm:$0xff] %v5946_v42  ;;  %v363_v45 = vld [vmem:[#allocation2 + $0x1d8] sm:$0xff]  ;;  %3496 = vmatprep.subr.bf16.mxu1 %v5942_v34  ;;  %v5952_v47 = vpack.c.bf16 %v361_v41, %v353_v40  ;;  %v360_v49 = vld [vmem:[#allocation2 + $0x1c0] sm:$0xff] }
  0x34   :  { %7849 = vst [vmem:[#allocation22_spill] sm:$0xff] %v5948_v43  ;;  %v5954_v48 = vpack.c.bf16 %v363_v45, %v355_v44  ;;  %v354_v50 = vld [vmem:[#allocation2 + $0x190] sm:$0xff]  ;;  %v369_v52 = vld [vmem:[#allocation2 + $0x208] sm:$0xff]  ;;  %v371_v54 = vld [vmem:[#allocation2 + $0x218] sm:$0xff]  ;;  %v5960_v57 = vpack.c.bf16 %v360_v49, %v352_v46 }
  0x35   :  { %7850 = vst [vmem:[#allocation23_spill] sm:$0xff] %v5952_v47  ;;  %v362_v51 = vld [vmem:[#allocation2 + $0x1d0] sm:$0xff]  ;;  %v377_v53 = vld [vmem:[#allocation2 + $0x248] sm:$0xff]  ;;  %94 = vperm.xlu0 %5506, %v59_v32   ;;  %v379_v56 = vld [vmem:[#allocation2 + $0x258] sm:$0xff]  ;;  %3434 = vmatpush1.bf16.msra.mxu0 %v5946_v42 }
  0x36   :  { %7851 = vst [vmem:[#allocation24_spill] sm:$0xff] %v5954_v48  ;;  %3498 = vmatpush1.bf16.msra.mxu1 %v5948_v43  ;;  %7852 = vst [vmem:[#allocation25_spill] sm:$0xff] %v5960_v57  ;;  %v5962_v58 = vpack.c.bf16 %v362_v51, %v354_v50  ;;  %v368_v59 = vld [vmem:[#allocation2 + $0x200] sm:$0xff]  ;;  %v370_v61 = vld [vmem:[#allocation2 + $0x210] sm:$0xff]  ;;  %3436 = vmatprep.subr.bf16.mxu0 %v5952_v47  ;;  %v5967_v63 = vpack.c.bf16 %v377_v53, %v369_v52 }
  0x37   :  { %v376_v60 = vld [vmem:[#allocation2 + $0x240] sm:$0xff]  ;;  %3500 = vmatprep.subr.bf16.mxu1 %v5954_v48  ;;  %v5969_v0 = vpack.c.bf16 %v379_v56, %v371_v54  ;;  %v378_v1 = vld [vmem:[#allocation2 + $0x250] sm:$0xff]  ;;  %v385_v2 = vld [vmem:[#allocation2 + $0x288] sm:$0xff] }
  0x38   :  { %7853 = vst [vmem:[#allocation26_spill] sm:$0xff] %v5962_v58  ;;  %7854 = vst [vmem:[#allocation27_spill] sm:$0xff] %v5967_v63  ;;  %v393_v3 = vld [vmem:[#allocation2 + $0x2c8] sm:$0xff]  ;;  %v387_v6 = vld [vmem:[#allocation2 + $0x298] sm:$0xff]  ;;  %v5973_v10 = vpack.c.bf16 %v376_v60, %v368_v59  ;;  %v5983_v13 = vpack.c.bf16 %v378_v1, %v370_v61 }
  0x39   :  { %7855 = vst [vmem:[#allocation28_spill] sm:$0xff] %v5969_v0  ;;  %v395_v7 = vld [vmem:[#allocation2 + $0x2d8] sm:$0xff]  ;;  %v5978_v11 = vld [vmem:[%s7527_s1] sm:$0xff]  ;;  %3438 = vmatpush1.bf16.msra.mxu0 %v5960_v57  ;;  %v5990_v17 = vpack.c.bf16 %v393_v3, %v385_v2  ;;  %v386_v25 = vld [vmem:[#allocation2 + $0x290] sm:$0xff] }
  0x3a   :  { %7856 = vst [vmem:[#allocation29_spill] sm:$0xff] %v5973_v10  ;;  %3502 = vmatpush1.bf16.msra.mxu1 %v5962_v58  ;;  %7857 = vst [vmem:[#allocation30_spill] sm:$0xff] %v5983_v13  ;;  %v5988_v16 = vld [vmem:[%s7528_s2] sm:$0xff]  ;;  %v5993_v21 = vrot.slane %v5978_v11, %v109_v62  ;;  %3440 = vmatprep.subr.bf16.mxu0 %v5967_v63  ;;  %v5997_v22 = vpack.c.bf16 %v395_v7, %v387_v6  ;;  %v394_v26 = vld [vmem:[#allocation2 + $0x2d0] sm:$0xff] }
  0x3b   :  { %7858 = vst [vmem:[#allocation31_spill] sm:$0xff] %v5990_v17  ;;  %v384_v18 = vld [vmem:[#allocation2 + $0x280] sm:$0xff]  ;;  %3504 = vmatprep.subr.bf16.mxu1 %v5969_v0  ;;  %v401_v27 = vld [vmem:[#allocation2 + $0x308] sm:$0xff]  ;;  %v6000_v29 = vrot.slane %v5988_v16, %v109_v62  ;;  %v6003_v30 = vrot.slane %v5978_v11, %v117_v4  ;;  %v403_v32 = vld [vmem:[#allocation2 + $0x318] sm:$0xff]  ;;  %v6006_v36 = vrot.slane %v5988_v16, %v117_v4 }
  0x3c   :  { %v392_v20 = vld [vmem:[#allocation2 + $0x2c0] sm:$0xff]  ;;  %7859 = vst [vmem:[#allocation32_spill] sm:$0xff] %v5993_v21  ;;  %7860 = vst [vmem:[#allocation33_spill] sm:$0xff] %v5997_v22  ;;  %v409_v31 = vld [vmem:[#allocation2 + $0x348] sm:$0xff]  ;;  %v6009_v37 = vrot.slane %v5978_v11, %v125_v8  ;;  %v6012_v38 = vrot.slane %v5988_v16, %v125_v8  ;;  %v6015_v39 = vrot.slane %v5978_v11, %v133_v12 }
  0x3d   :  { %7861 = vst [vmem:[#allocation34_spill] sm:$0xff] %v6000_v29  ;;  %7862 = vst [vmem:[#allocation35_spill] sm:$0xff] %v6003_v30  ;;  %v411_v35 = vld [vmem:[#allocation2 + $0x358] sm:$0xff]  ;;  %v6018_v40 = vrot.slane %v5988_v16, %v133_v12  ;;  %3442 = vmatpush1.bf16.msra.mxu0 %v5973_v10  ;;  %v6022_v41 = vpack.c.bf16 %v392_v20, %v384_v18  ;;  %v6024_v44 = vpack.c.bf16 %v394_v26, %v386_v25  ;;  %v400_v45 = vld [vmem:[#allocation2 + $0x300] sm:$0xff] }
  0x3e   :  { %7863 = vst [vmem:[#allocation36_spill] sm:$0xff] %v6006_v36  ;;  %7864 = vst [vmem:[#allocation37_spill] sm:$0xff] %v6009_v37  ;;  %3506 = vmatpush1.bf16.msra.mxu1 %v5983_v13  ;;  %v408_v46 = vld [vmem:[#allocation2 + $0x340] sm:$0xff]  ;;  %3444 = vmatprep.subr.bf16.mxu0 %v5990_v17  ;;  %v6028_v49 = vpack.c.bf16 %v409_v31, %v401_v27  ;;  %v6030_v50 = vpack.c.bf16 %v411_v35, %v403_v32  ;;  %v402_v51 = vld [vmem:[#allocation2 + $0x310] sm:$0xff] }
  0x3f   :  { %7865 = vst [vmem:[#allocation38_spill] sm:$0xff] %v6012_v38  ;;  %7866 = vst [vmem:[#allocation39_spill] sm:$0xff] %v6015_v39  ;;  %3508 = vmatprep.subr.bf16.mxu1 %v5997_v22  ;;  %v410_v52 = vld [vmem:[#allocation2 + $0x350] sm:$0xff]  ;;  %v417_v53 = vld [vmem:[#allocation2 + $0x388] sm:$0xff]  ;;  %v6034_v60 = vpack.c.bf16 %v408_v46, %v400_v45 }
  0x40   :  { %7867 = vst [vmem:[#allocation40_spill] sm:$0xff] %v6018_v40  ;;  %7868 = vst [vmem:[#allocation41_spill] sm:$0xff] %v6022_v41  ;;  %v425_v54 = vld [vmem:[#allocation2 + $0x3c8] sm:$0xff]  ;;  %v419_v56 = vld [vmem:[#allocation2 + $0x398] sm:$0xff]  ;;  %v6036_v61 = vpack.c.bf16 %v410_v52, %v402_v51 }
  0x41   :  { %7869 = vst [vmem:[#allocation42_spill] sm:$0xff] %v6024_v44  ;;  %7870 = vst [vmem:[#allocation43_spill] sm:$0xff] %v6028_v49  ;;  %v427_v59 = vld [vmem:[#allocation2 + $0x3d8] sm:$0xff]  ;;  %3446 = vmatpush1.bf16.msra.mxu0 %v6022_v41  ;;  %v416_v62 = vld [vmem:[#allocation2 + $0x380] sm:$0xff]  ;;  %v6040_v2 = vpack.c.bf16 %v425_v54, %v417_v53 }
  0x42   :  { %7871 = vst [vmem:[#allocation44_spill] sm:$0xff] %v6030_v50  ;;  %3510 = vmatpush1.bf16.msra.mxu1 %v6024_v44  ;;  %7872 = vst [vmem:[#allocation45_spill] sm:$0xff] %v6034_v60  ;;  %v424_v1 = vld [vmem:[#allocation2 + $0x3c0] sm:$0xff]  ;;  %3448 = vmatprep.subr.bf16.mxu0 %v6028_v49  ;;  %v6042_v3 = vpack.c.bf16 %v427_v59, %v419_v56  ;;  %v418_v4 = vld [vmem:[#allocation2 + $0x390] sm:$0xff] }
  0x43   :  { %7873 = vst [vmem:[#allocation46_spill] sm:$0xff] %v6036_v61  ;;  %3512 = vmatprep.subr.bf16.mxu1 %v6030_v50  ;;  %7874 = vst [vmem:[#allocation47_spill] sm:$0xff] %v6040_v2  ;;  %v426_v6 = vld [vmem:[#allocation2 + $0x3d0] sm:$0xff]  ;;  %v433_v7 = vld [vmem:[#allocation2 + $0x408] sm:$0xff]  ;;  %v6046_v20 = vpack.c.bf16 %v424_v1, %v416_v62 }
  0x44   :  { %7875 = vst [vmem:[#allocation48_spill] sm:$0xff] %v6042_v3  ;;  %v441_v8 = vld [vmem:[#allocation2 + $0x448] sm:$0xff]  ;;  %v435_v12 = vld [vmem:[#allocation2 + $0x418] sm:$0xff]  ;;  %v6048_v25 = vpack.c.bf16 %v426_v6, %v418_v4  ;;  %v432_v26 = vld [vmem:[#allocation2 + $0x400] sm:$0xff] }
  0x45   :  { %v443_v18 = vld [vmem:[#allocation2 + $0x458] sm:$0xff]  ;;  %3450 = vmatpush1.bf16.msra.mxu0 %v6034_v60  ;;  %7876 = vst [vmem:[#allocation49_spill] sm:$0xff] %v6046_v20  ;;  %v440_v27 = vld [vmem:[#allocation2 + $0x440] sm:$0xff]  ;;  %v6052_v31 = vpack.c.bf16 %v441_v8, %v433_v7  ;;  %v434_v35 = vld [vmem:[#allocation2 + $0x410] sm:$0xff] }
  0x46   :  { %3514 = vmatpush1.bf16.msra.mxu1 %v6036_v61  ;;  %7877 = vst [vmem:[#allocation50_spill] sm:$0xff] %v6048_v25  ;;  %3452 = vmatprep.subr.bf16.mxu0 %v6040_v2  ;;  %v6054_v32 = vpack.c.bf16 %v443_v18, %v435_v12  ;;  %v442_v45 = vld [vmem:[#allocation2 + $0x450] sm:$0xff]  ;;  %v449_v46 = vld [vmem:[#allocation2 + $0x488] sm:$0xff]  ;;  %v451_v52 = vld [vmem:[#allocation2 + $0x498] sm:$0xff]  ;;  %v6058_v54 = vpack.c.bf16 %v440_v27, %v432_v26  ;;  %v7534_v26 = vmov 0.0  }
  0x47   :  { %3516 = vmatprep.subr.bf16.mxu1 %v6042_v3  ;;  %7878 = vst [vmem:[#allocation51_spill] sm:$0xff] %v6052_v31  ;;  %v457_v51 = vld [vmem:[#allocation2 + $0x4c8] sm:$0xff]  ;;  %v459_v53 = vld [vmem:[#allocation2 + $0x4d8] sm:$0xff]  ;;  %v6060_v56 = vpack.c.bf16 %v442_v45, %v434_v35  ;;  %v448_v59 = vld [vmem:[#allocation2 + $0x480] sm:$0xff]  ;;  %648 = vmatprep.mubr.f32.mxu0 %v7534_v26 }
  0x48   :  { %7879 = vst [vmem:[#allocation52_spill] sm:$0xff] %v6054_v32  ;;  %7880 = vst [vmem:[#allocation53_spill] sm:$0xff] %v6058_v54  ;;  %v456_v62 = vld [vmem:[#allocation2 + $0x4c0] sm:$0xff]  ;;  %v6064_v1 = vpack.c.bf16 %v457_v51, %v449_v46  ;;  %v6066_v4 = vpack.c.bf16 %v459_v53, %v451_v52  ;;  %v450_v6 = vld [vmem:[#allocation2 + $0x490] sm:$0xff]  ;;  %719 = vmatprep.mubr.f32.mxu1 %v7534_v26 }
  0x49   :  { %3454 = vmatpush1.bf16.msra.mxu0 %v6046_v20  ;;  %7881 = vst [vmem:[#allocation54_spill] sm:$0xff] %v6060_v56  ;;  %v458_v7 = vld [vmem:[#allocation2 + $0x4d0] sm:$0xff]  ;;  %v465_v8 = vld [vmem:[#allocation2 + $0x508] sm:$0xff]  ;;  %v467_v18 = vld [vmem:[#allocation2 + $0x518] sm:$0xff]  ;;  %v6072_v27 = vpack.c.bf16 %v456_v62, %v448_v59 }
  0x4a   :  { %3518 = vmatpush1.bf16.msra.mxu1 %v6048_v25  ;;  %3456 = vmatprep.subr.bf16.mxu0 %v6052_v31  ;;  %7882 = vst [vmem:[#allocation55_spill] sm:$0xff] %v6064_v1  ;;  %7883 = vst [vmem:[#allocation56_spill] sm:$0xff] %v6066_v4  ;;  %v473_v12 = vld [vmem:[#allocation2 + $0x548] sm:$0xff]  ;;  %v475_v40 = vld [vmem:[#allocation2 + $0x558] sm:$0xff]  ;;  %v6074_v35 = vpack.c.bf16 %v458_v7, %v450_v6 }
  0x4b   :  { %3520 = vmatprep.subr.bf16.mxu1 %v6054_v32  ;;  %7884 = vst [vmem:[#allocation57_spill] sm:$0xff] %v6072_v27  ;;  %v464_v45 = vld [vmem:[#allocation2 + $0x500] sm:$0xff]  ;;  %v6078_v51 = vpack.c.bf16 %v473_v12, %v465_v8  ;;  %v6080_v52 = vpack.c.bf16 %v475_v40, %v467_v18  ;;  %v466_v53 = vld [vmem:[#allocation2 + $0x510] sm:$0xff]  ;;  %v481_v38 = vld [vmem:[#allocation2 + $0x588] sm:$0xff] }
  0x4c   :  { %7885 = vst [vmem:[#allocation58_spill] sm:$0xff] %v6074_v35  ;;  %v472_v46 = vld [vmem:[#allocation2 + $0x540] sm:$0xff]  ;;  %v474_v26 = vld [vmem:[#allocation2 + $0x550] sm:$0xff]  ;;  %v489_v39 = vld [vmem:[#allocation2 + $0x5c8] sm:$0xff] }
  0x4d   :  { %3458 = vmatpush1.bf16.msra.mxu0 %v6058_v54  ;;  %7886 = vst [vmem:[#allocation59_spill] sm:$0xff] %v6078_v51  ;;  %7887 = vst [vmem:[#allocation60_spill] sm:$0xff] %v6080_v52  ;;  %v483_v37 = vld [vmem:[#allocation2 + $0x598] sm:$0xff]  ;;  %v6084_v59 = vpack.c.bf16 %v472_v46, %v464_v45  ;;  %v6086_v62 = vpack.c.bf16 %v474_v26, %v466_v53  ;;  %v480_v6 = vld [vmem:[#allocation2 + $0x580] sm:$0xff]  ;;  %v6090_v40 = vpack.c.bf16 %v489_v39, %v481_v38 }
  0x4e   :  { %3522 = vmatpush1.bf16.msra.mxu1 %v6060_v56  ;;  %3460 = vmatprep.subr.bf16.mxu0 %v6064_v1  ;;  %v491_v36 = vld [vmem:[#allocation2 + $0x5d8] sm:$0xff]  ;;  %v488_v7 = vld [vmem:[#allocation2 + $0x5c0] sm:$0xff]  ;;  %v482_v12 = vld [vmem:[#allocation2 + $0x590] sm:$0xff] }
  0x4f   :  { %3524 = vmatprep.subr.bf16.mxu1 %v6066_v4  ;;  %7888 = vst [vmem:[#allocation61_spill] sm:$0xff] %v6084_v59  ;;  %7889 = vst [vmem:[#allocation62_spill] sm:$0xff] %v6086_v62  ;;  %v6092_v8 = vpack.c.bf16 %v491_v36, %v483_v37  ;;  %v490_v18 = vld [vmem:[#allocation2 + $0x5d0] sm:$0xff]  ;;  %v497_v29 = vld [vmem:[#allocation2 + $0x608] sm:$0xff]  ;;  %v6096_v26 = vpack.c.bf16 %v488_v7, %v480_v6 }
  0x50   :  { %7890 = vst [vmem:[#allocation63_spill] sm:$0xff] %v6090_v40  ;;  %v505_v30 = vld [vmem:[#allocation2 + $0x648] sm:$0xff]  ;;  %v499_v21 = vld [vmem:[#allocation2 + $0x618] sm:$0xff]  ;;  %v6098_v45 = vpack.c.bf16 %v490_v18, %v482_v12  ;;  %v496_v46 = vld [vmem:[#allocation2 + $0x600] sm:$0xff] }
  0x51   :  { %3462 = vmatpush1.bf16.msra.mxu0 %v6072_v27  ;;  %7891 = vst [vmem:[#allocation64_spill] sm:$0xff] %v6092_v8  ;;  %7892 = vst [vmem:[#allocation65_spill] sm:$0xff] %v6096_v26  ;;  %v504_v53 = vld [vmem:[#allocation2 + $0x640] sm:$0xff]  ;;  %v6102_v36 = vpack.c.bf16 %v505_v30, %v497_v29  ;;  %v498_v38 = vld [vmem:[#allocation2 + $0x610] sm:$0xff] }
  0x52   :  { %3526 = vmatpush1.bf16.msra.mxu1 %v6074_v35  ;;  %3464 = vmatprep.subr.bf16.mxu0 %v6078_v51  ;;  %v507_v35 = vld [vmem:[#allocation2 + $0x658] sm:$0xff]  ;;  %7893 = vst [vmem:[#allocation66_spill] sm:$0xff] %v6098_v45  ;;  %v506_v39 = vld [vmem:[#allocation2 + $0x650] sm:$0xff]  ;;  %v6108_v6 = vpack.c.bf16 %v504_v53, %v496_v46  ;;  %v512_v12 = vld [vmem:[#allocation2 + $0x680] sm:$0xff] }
  0x53   :  { %3528 = vmatprep.subr.bf16.mxu1 %v6080_v52  ;;  %7894 = vst [vmem:[#allocation67_spill] sm:$0xff] %v6102_v36  ;;  %v6104_v37 = vpack.c.bf16 %v507_v35, %v499_v21  ;;  %v513_v52 = vld [vmem:[#allocation2 + $0x688] sm:$0xff]  ;;  %v515_v51 = vld [vmem:[#allocation2 + $0x698] sm:$0xff]  ;;  %v6110_v7 = vpack.c.bf16 %v506_v39, %v498_v38  ;;  %v520_v18 = vld [vmem:[#allocation2 + $0x6c0] sm:$0xff] }
  0x54   :  { %7896 = vst [vmem:[#allocation69_spill] sm:$0xff] %v6108_v6  ;;  %v514_v30 = vld [vmem:[#allocation2 + $0x690] sm:$0xff]  ;;  %v6120_v46 = vpack.c.bf16 %v520_v18, %v512_v12  ;;  %v528_v38 = vld [vmem:[#allocation2 + $0x700] sm:$0xff] }
  0x55   :  { %3466 = vmatpush1.bf16.msra.mxu0 %v6084_v59  ;;  %7895 = vst [vmem:[#allocation68_spill] sm:$0xff] %v6104_v37  ;;  %v521_v59 = vld [vmem:[#allocation2 + $0x6c8] sm:$0xff]  ;;  %7897 = vst [vmem:[#allocation70_spill] sm:$0xff] %v6110_v7  ;;  %v522_v35 = vld [vmem:[#allocation2 + $0x6d0] sm:$0xff] }
  0x56   :  { %3530 = vmatpush1.bf16.msra.mxu1 %v6086_v62  ;;  %3468 = vmatprep.subr.bf16.mxu0 %v6090_v40  ;;  %v523_v62 = vld [vmem:[#allocation2 + $0x6d8] sm:$0xff]  ;;  %v6114_v21 = vpack.c.bf16 %v521_v59, %v513_v52  ;;  %7900 = vst [vmem:[#allocation73_spill] sm:$0xff] %v6120_v46  ;;  %v6122_v53 = vpack.c.bf16 %v522_v35, %v514_v30  ;;  %v536_v39 = vld [vmem:[#allocation2 + $0x740] sm:$0xff]  ;;  %v530_v59 = vld [vmem:[#allocation2 + $0x710] sm:$0xff] }
  0x57   :  { %3532 = vmatprep.subr.bf16.mxu1 %v6092_v8  ;;  %v6116_v29 = vpack.c.bf16 %v523_v62, %v515_v51  ;;  %v529_v8 = vld [vmem:[#allocation2 + $0x708] sm:$0xff]  ;;  %v531_v40 = vld [vmem:[#allocation2 + $0x718] sm:$0xff]  ;;  %v538_v62 = vld [vmem:[#allocation2 + $0x750] sm:$0xff]  ;;  %v6132_v12 = vpack.c.bf16 %v536_v39, %v528_v38 }
  0x58   :  { %7898 = vst [vmem:[#allocation71_spill] sm:$0xff] %v6114_v21  ;;  %7901 = vst [vmem:[#allocation74_spill] sm:$0xff] %v6122_v53  ;;  %v6134_v18 = vpack.c.bf16 %v538_v62, %v530_v59  ;;  %v544_v30 = vld [vmem:[#allocation2 + $0x780] sm:$0xff] }
  0x59   :  { %3470 = vmatpush1.bf16.msra.mxu0 %v6096_v26  ;;  %7899 = vst [vmem:[#allocation72_spill] sm:$0xff] %v6116_v29  ;;  %v537_v26 = vld [vmem:[#allocation2 + $0x748] sm:$0xff]  ;;  %7904 = vst [vmem:[#allocation77_spill] sm:$0xff] %v6132_v12  ;;  %v552_v35 = vld [vmem:[#allocation2 + $0x7c0] sm:$0xff] }
  0x5a   :  { %3534 = vmatpush1.bf16.msra.mxu1 %v6098_v45  ;;  %3472 = vmatprep.subr.bf16.mxu0 %v6102_v36  ;;  %v539_v45 = vld [vmem:[#allocation2 + $0x758] sm:$0xff]  ;;  %v6126_v51 = vpack.c.bf16 %v537_v26, %v529_v8  ;;  %7905 = vst [vmem:[#allocation78_spill] sm:$0xff] %v6134_v18  ;;  %v546_v26 = vld [vmem:[#allocation2 + $0x790] sm:$0xff]  ;;  %v6144_v38 = vpack.c.bf16 %v552_v35, %v544_v30 }
  0x5b   :  { %3536 = vmatprep.subr.bf16.mxu1 %v6104_v37  ;;  %v6128_v52 = vpack.c.bf16 %v539_v45, %v531_v40  ;;  %v545_v37 = vld [vmem:[#allocation2 + $0x788] sm:$0xff]  ;;  %v547_v36 = vld [vmem:[#allocation2 + $0x798] sm:$0xff]  ;;  %v554_v45 = vld [vmem:[#allocation2 + $0x7d0] sm:$0xff] }
  0x5c   :  { %7902 = vst [vmem:[#allocation75_spill] sm:$0xff] %v6126_v51  ;;  %7908 = vst [vmem:[#allocation81_spill] sm:$0xff] %v6144_v38  ;;  %v6146_v39 = vpack.c.bf16 %v554_v45, %v546_v26  ;;  %v129_v45 = vsub.s32 6, %v5956_v55 }
  0x5d   :  { %3474 = vmatpush1.bf16.msra.mxu0 %v6108_v6  ;;  %7903 = vst [vmem:[#allocation76_spill] sm:$0xff] %v6128_v52  ;;  %v553_v6 = vld [vmem:[#allocation2 + $0x7c8] sm:$0xff] }
  0x5e   :  { %3538 = vmatpush1.bf16.msra.mxu1 %v6110_v7  ;;  %3476 = vmatprep.subr.bf16.mxu0 %v6114_v21  ;;  %v555_v7 = vld [vmem:[#allocation2 + $0x7d8] sm:$0xff]  ;;  %v6138_v40 = vpack.c.bf16 %v553_v6, %v545_v37  ;;  %7909 = vst [vmem:[#allocation82_spill] sm:$0xff] %v6146_v39  ;;  %v105_v6 = vsub.s32 0, %v5956_v55 }
  0x5f   :  { %3540 = vmatprep.subr.bf16.mxu1 %v6116_v29  ;;  %v6140_v8 = vpack.c.bf16 %v555_v7, %v547_v36  ;;  %v309_v29 = vld [vmem:[#allocation2 + $0x28] sm:$0xff]  ;;  %v311_v21 = vld [vmem:[#allocation2 + $0x38] sm:$0xff]  ;;  %v113_v7 = vsub.s32 2, %v5956_v55 }
  0x60   :  { %7906 = vst [vmem:[#allocation79_spill] sm:$0xff] %v6138_v40  ;;  %v6161_v59 = vrot.slane %v5978_v11, %v105_v6 }
  0x61   :  { %3478 = vmatpush1.bf16.msra.mxu0 %v6120_v46  ;;  %7907 = vst [vmem:[#allocation80_spill] sm:$0xff] %v6140_v8  ;;  %v317_v46 = vld [vmem:[#allocation2 + $0x68] sm:$0xff] }
  0x62   :  { %3542 = vmatpush1.bf16.msra.mxu1 %v6122_v53  ;;  %3480 = vmatprep.subr.bf16.mxu0 %v6126_v51  ;;  %v319_v53 = vld [vmem:[#allocation2 + $0x78] sm:$0xff]  ;;  %v6150_v36 = vpack.c.bf16 %v317_v46, %v309_v29  ;;  %7912 = vst [vmem:[#allocation85_spill] sm:$0xff] %v6161_v59  ;;  %v6164_v29 = vrot.slane %v5978_v11, %v113_v7 }
  0x63   :  { %3544 = vmatprep.subr.bf16.mxu1 %v6128_v52  ;;  %v6152_v37 = vpack.c.bf16 %v319_v53, %v311_v21  ;;  %v121_v21 = vsub.s32 4, %v5956_v55  ;;  %v6168_v46 = vrot.slane %v5988_v16, %v105_v6  ;;  %v6171_v53 = vrot.slane %v5988_v16, %v113_v7 }
  0x64   :  { %7910 = vst [vmem:[#allocation83_spill] sm:$0xff] %v6150_v36  ;;  %7913 = vst [vmem:[#allocation86_spill] sm:$0xff] %v6164_v29 }
  0x65   :  { %3482 = vmatpush1.bf16.msra.mxu0 %v6132_v12  ;;  %7911 = vst [vmem:[#allocation84_spill] sm:$0xff] %v6152_v37  ;;  %7914 = vst [vmem:[#allocation87_spill] sm:$0xff] %v6168_v46  ;;  %v6176_v26 = vrot.slane %v5978_v11, %v121_v21  ;;  %v6183_v7 = vrot.slane %v5988_v16, %v121_v21  ;;  %v351_v12 = vld [vmem:[#allocation2 + $0x178] sm:$0xff] }
  0x66   :  { %3546 = vmatpush1.bf16.msra.mxu1 %v6134_v18  ;;  %3484 = vmatprep.subr.bf16.mxu0 %v6138_v40  ;;  %7915 = vst [vmem:[#allocation88_spill] sm:$0xff] %v6171_v53  ;;  %v349_v40 = vld [vmem:[#allocation2 + $0x168] sm:$0xff]  ;;  %v343_v18 = vld [vmem:[#allocation2 + $0x138] sm:$0xff] }
  0x67   :  { %3548 = vmatprep.subr.bf16.mxu1 %v6140_v8  ;;  %7916 = vst [vmem:[#allocation89_spill] sm:$0xff] %v6176_v26  ;;  %7917 = vst [vmem:[#allocation90_spill] sm:$0xff] %v6183_v7  ;;  %v341_v8 = vld [vmem:[#allocation2 + $0x128] sm:$0xff] }
  0x69   :  { %3486 = vmatpush1.bf16.msra.mxu0 %v6144_v38 }
  0x6a   :  { %3550 = vmatpush1.bf16.msra.mxu1 %v6146_v39  ;;  %3552 = vmatprep.subr.bf16.mxu0 %v6150_v36 }
  0x6b   :  { %3616 = vmatprep.subr.bf16.mxu1 %v6152_v37 }
  0xa8   :  { %v65_v62 = vpop.permute.xlu0 %64 }
  0xa9   :  { %v143_v30 = vmul.f32 %v6161_v59, %v65_v62  ;;  %v144_v35 = vmul.f32 %v6164_v29, %v65_v62  ;;  %v145_v38 = vmul.f32 %v6176_v26, %v65_v62  ;;  %v6186_v59 = vrot.slane %v5978_v11, %v129_v45 }
  0xab   :  { %v244_v37 = vadd.f32 %v6168_v46, %v143_v30  ;;  %v245_v36 = vadd.f32 %v6171_v53, %v144_v35  ;;  %7918 = vst [vmem:[#allocation91_spill] sm:$0xff] %v6186_v59  ;;  %v246_v29 = vadd.f32 %v6183_v7, %v145_v38  ;;  %v146_v55 = vmul.f32 %v6186_v59, %v65_v62 }
  0xac   :  { %v6191_v30 = vrot.slane %v5988_v16, %v129_v45  ;;  %v316_v45 = vld [vmem:[#allocation2 + $0x60] sm:$0xff] }
  0xad   :  { %v3322_v39 = vmul.f32 -1.442695, %v244_v37  ;;  %v3323_v6 = vmul.f32 -1.442695, %v245_v36  ;;  %v3324_v35 = vmul.f32 -1.442695, %v246_v29 }
  0xae   :  { %7919 = vst [vmem:[#allocation92_spill] sm:$0xff] %v6191_v30  ;;  %v247_v36 = vadd.f32 %v6191_v30, %v146_v55  ;;  %v308_v29 = vld [vmem:[#allocation2 + $0x20] sm:$0xff]  ;;  %v310_v55 = vld [vmem:[#allocation2 + $0x30] sm:$0xff] }
  0xaf   :  { %5508 = vpow2.f32 %v3322_v39  ;;  %v6197_v46 = vpack.c.bf16 %v316_v45, %v308_v29  ;;  %v340_v45 = vld [vmem:[#allocation2 + $0x120] sm:$0xff] }
  0xb0   :  { %5510 = vpow2.f32 %v3323_v6 }
  0xb1   :  { %5512 = vpow2.f32 %v3324_v35  ;;  %v318_v35 = vld [vmem:[#allocation2 + $0x70] sm:$0xff]  ;;  %7921 = vst [vmem:[#allocation94_spill] sm:$0xff] %v6197_v46 }
  0xb2   :  { %5514 = vtanh.f32 %v247_v36  ;;  %v333_v36 = vld [vmem:[#allocation2 + $0xe8] sm:$0xff] }
  0xb9   :  { %v5509_v37 = vpop.eup %5508 }
  0xba   :  { %v5511_v26 = vpop.eup %5510  ;;  %v569_v21 = vadd.f32 1.0, %v5509_v37  ;;  %v327_v37 = vld [vmem:[#allocation2 + $0xb8] sm:$0xff] }
  0xbb   :  { %v570_v53 = vadd.f32 1.0, %v5511_v26  ;;  %v5513_v11 = vpop.eup %5512  ;;  %v325_v26 = vld [vmem:[#allocation2 + $0xa8] sm:$0xff] }
  0xbc   :  { %5516 = vrcp.f32 %v569_v21  ;;  %v5515_v39 = vpop.eup %5514  ;;  %v571_v7 = vadd.f32 1.0, %v5513_v11  ;;  %v6199_v11 = vpack.c.bf16 %v318_v35, %v310_v55  ;;  %v348_v55 = vld [vmem:[#allocation2 + $0x160] sm:$0xff]  ;;  %v6217_v35 = vpack.c.bf16 %v349_v40, %v341_v8 }
  0xbd   :  { %5518 = vrcp.f32 %v570_v53  ;;  %v335_v53 = vld [vmem:[#allocation2 + $0xf8] sm:$0xff] }
  0xbe   :  { %5520 = vrcp.f32 %v571_v7  ;;  %7922 = vst [vmem:[#allocation95_spill] sm:$0xff] %v6199_v11  ;;  %v6203_v7 = vpack.c.bf16 %v333_v36, %v325_v26  ;;  %7927 = vst [vmem:[#allocation100_spill] sm:$0xff] %v6217_v35  ;;  %v6219_v26 = vpack.c.bf16 %v351_v12, %v343_v18  ;;  %v342_v36 = vld [vmem:[#allocation2 + $0x130] sm:$0xff]  ;;  %v356_v12 = vld [vmem:[#allocation2 + $0x1a0] sm:$0xff] }
  0xbf   :  { %v364_v18 = vld [vmem:[#allocation2 + $0x1e0] sm:$0xff] }
  0xc0   :  { %7923 = vst [vmem:[#allocation96_spill] sm:$0xff] %v6203_v7  ;;  %7928 = vst [vmem:[#allocation101_spill] sm:$0xff] %v6219_v26 }
  0xc6   :  { %v5517_v6 = vpop.eup %5516 }
  0xc7   :  { %v5519_v38 = vpop.eup %5518  ;;  %v580_v62 = vmul.f32 %v5517_v6, %v5515_v39  ;;  %v324_v39 = vld [vmem:[#allocation2 + $0xa0] sm:$0xff] }
  0xc8   :  { %v579_v59 = vmul.f32 0.0, %v5519_v38  ;;  %v5521_v21 = vpop.eup %5520  ;;  %v6205_v38 = vpack.c.bf16 %v335_v53, %v327_v37  ;;  %v350_v37 = vld [vmem:[#allocation2 + $0x170] sm:$0xff]  ;;  %v357_v53 = vld [vmem:[#allocation2 + $0x1a8] sm:$0xff] }
  0xc9   :  { %v6227_v40 = vpack.c.bf16 %v350_v37, %v342_v36  ;;  %v372_v36 = vld [vmem:[#allocation2 + $0x220] sm:$0xff] }
  0xca   :  { %v6194_v16 = vadd.f32 %v580_v62, %v579_v59  ;;  %v332_v59 = vld [vmem:[#allocation2 + $0xe0] sm:$0xff]  ;;  %7924 = vst [vmem:[#allocation97_spill] sm:$0xff] %v6205_v38  ;;  %v326_v62 = vld [vmem:[#allocation2 + $0xb0] sm:$0xff] }
  0xcb   :  { %7931 = vst [vmem:[#allocation103_spill] sm:$0xff] %v6227_v40  ;;  %v380_v37 = vld [vmem:[#allocation2 + $0x260] sm:$0xff] }
  0xcc   :  { %7920 = vst [vmem:[#allocation93_spill] sm:$0xff] %v6194_v16  ;;  %5522 = vtanh.f32 %v6194_v16  ;;  %v334_v16 = vld [vmem:[#allocation2 + $0xf0] sm:$0xff] }
  0xcd   :  { %v6213_v29 = vpack.c.bf16 %v334_v16, %v326_v62  ;;  %v6225_v16 = vpack.c.bf16 %v348_v55, %v340_v45  ;;  %v358_v62 = vld [vmem:[#allocation2 + $0x1b0] sm:$0xff]  ;;  %v6237_v45 = vpack.c.bf16 %v364_v18, %v356_v12  ;;  %v388_v18 = vld [vmem:[#allocation2 + $0x2a0] sm:$0xff] }
  0xcf   :  { %7926 = vst [vmem:[#allocation99_spill] sm:$0xff] %v6213_v29  ;;  %7930 = vst [vmem:[#allocation102_spill] sm:$0xff] %v6225_v16 }
  0xd0   :  { %7934 = vst [vmem:[#allocation106_spill] sm:$0xff] %v6237_v45 }
  0xd6   :  { %v5523_v30 = vpop.eup %5522 }
  0xd7   :  { %v6201_v6 = vmul.f32 %v5523_v30, %v5521_v21  ;;  %v6211_v30 = vpack.c.bf16 %v332_v59, %v324_v39  ;;  %v365_v21 = vld [vmem:[#allocation2 + $0x1e8] sm:$0xff]  ;;  %v7929_v39 = vmov 0.0  }
  0xd8   :  { %v6231_v8 = vpack.c.bf16 %v365_v21, %v357_v53  ;;  %v374_v53 = vld [vmem:[#allocation2 + $0x230] sm:$0xff] }
  0xd9   :  { %649 = vmatmul.mubr.f32.vlgmr.msra.gmra.mrb[0].mxu0 %v6201_v6  ;;  %720 = vmatmul.mubr.f32.vlgmr.msra.gmra.mrb[0].mxu1 %v6201_v6  ;;  %7925 = vst [vmem:[#allocation98_spill] sm:$0xff] %v6211_v30  ;;  %v382_v21 = vld [vmem:[#allocation2 + $0x270] sm:$0xff] }
  0xda   :  { %3554 = vmatpush1.bf16.msra.mxu0 %v6197_v46  ;;  %3618 = vmatpush1.bf16.msra.mxu1 %v6199_v11  ;;  %v359_v46 = vld [vmem:[#allocation2 + $0x1b8] sm:$0xff]  ;;  %7932 = vst [vmem:[#allocation104_spill] sm:$0xff] %v6231_v8  ;;  %v6251_v12 = vpack.c.bf16 %v382_v21, %v374_v53  ;;  %v404_v53 = vld [vmem:[#allocation2 + $0x320] sm:$0xff] }
  0xdb   :  { %3556 = vmatprep.subr.bf16.mxu0 %v6203_v7  ;;  %3620 = vmatprep.subr.bf16.mxu1 %v6205_v38  ;;  %v367_v11 = vld [vmem:[#allocation2 + $0x1f8] sm:$0xff]  ;;  %v373_v38 = vld [vmem:[#allocation2 + $0x228] sm:$0xff]  ;;  %v412_v21 = vld [vmem:[#allocation2 + $0x360] sm:$0xff] }
  0xdc   :  { %790 = vmatprep.mubr.f32.mxu0 %v7929_v39  ;;  %861 = vmatprep.mubr.f32.mxu1 %v7929_v39  ;;  %v6233_v59 = vpack.c.bf16 %v367_v11, %v359_v46  ;;  %v366_v39 = vld [vmem:[#allocation2 + $0x1f0] sm:$0xff]  ;;  %v375_v7 = vld [vmem:[#allocation2 + $0x238] sm:$0xff]  ;;  %7939 = vst [vmem:[#allocation111_spill] sm:$0xff] %v6251_v12 }
  0xdd   :  { %v6239_v55 = vpack.c.bf16 %v366_v39, %v358_v62  ;;  %v6249_v39 = vpack.c.bf16 %v380_v37, %v372_v36  ;;  %v396_v62 = vld [vmem:[#allocation2 + $0x2e0] sm:$0xff] }
  0xde   :  { %3558 = vmatpush1.bf16.msra.mxu0 %v6211_v30  ;;  %3622 = vmatpush1.bf16.msra.mxu1 %v6213_v29  ;;  %7933 = vst [vmem:[#allocation105_spill] sm:$0xff] %v6233_v59  ;;  %v381_v30 = vld [vmem:[#allocation2 + $0x268] sm:$0xff]  ;;  %v383_v29 = vld [vmem:[#allocation2 + $0x278] sm:$0xff]  ;;  %v6261_v36 = vpack.c.bf16 %v396_v62, %v388_v18  ;;  %v6273_v18 = vpack.c.bf16 %v412_v21, %v404_v53 }
  0xdf   :  { %3560 = vmatprep.subr.bf16.mxu0 %v6217_v35  ;;  %3624 = vmatprep.subr.bf16.mxu1 %v6219_v26  ;;  %7935 = vst [vmem:[#allocation107_spill] sm:$0xff] %v6239_v55  ;;  %v6243_v46 = vpack.c.bf16 %v381_v30, %v373_v38  ;;  %v6245_v11 = vpack.c.bf16 %v383_v29, %v375_v7  ;;  %v389_v26 = vld [vmem:[#allocation2 + $0x2a8] sm:$0xff]  ;;  %v391_v35 = vld [vmem:[#allocation2 + $0x2b8] sm:$0xff]  ;;  %7938 = vst [vmem:[#allocation110_spill] sm:$0xff] %v6249_v39 }
  0xe0   :  { %v390_v30 = vld [vmem:[#allocation2 + $0x2b0] sm:$0xff]  ;;  %7942 = vst [vmem:[#allocation114_spill] sm:$0xff] %v6261_v36  ;;  %7946 = vst [vmem:[#allocation118_spill] sm:$0xff] %v6273_v18 }
  0xe1   :  { %7936 = vst [vmem:[#allocation108_spill] sm:$0xff] %v6243_v46  ;;  %7937 = vst [vmem:[#allocation109_spill] sm:$0xff] %v6245_v11  ;;  %v398_v29 = vld [vmem:[#allocation2 + $0x2f0] sm:$0xff] }
  0xe2   :  { %3562 = vmatpush1.bf16.msra.mxu0 %v6225_v16  ;;  %3626 = vmatpush1.bf16.msra.mxu1 %v6227_v40  ;;  %v397_v16 = vld [vmem:[#allocation2 + $0x2e8] sm:$0xff]  ;;  %v399_v40 = vld [vmem:[#allocation2 + $0x2f8] sm:$0xff]  ;;  %v6263_v37 = vpack.c.bf16 %v398_v29, %v390_v30  ;;  %v420_v30 = vld [vmem:[#allocation2 + $0x3a0] sm:$0xff] }
  0xe3   :  { %3564 = vmatprep.subr.bf16.mxu0 %v6231_v8  ;;  %3628 = vmatprep.subr.bf16.mxu1 %v6233_v59  ;;  %v6255_v7 = vpack.c.bf16 %v397_v16, %v389_v26  ;;  %v6257_v38 = vpack.c.bf16 %v399_v40, %v391_v35  ;;  %v405_v59 = vld [vmem:[#allocation2 + $0x328] sm:$0xff]  ;;  %v407_v8 = vld [vmem:[#allocation2 + $0x338] sm:$0xff]  ;;  %v406_v16 = vld [vmem:[#allocation2 + $0x330] sm:$0xff] }
  0xe4   :  { %7943 = vst [vmem:[#allocation115_spill] sm:$0xff] %v6263_v37  ;;  %v414_v40 = vld [vmem:[#allocation2 + $0x370] sm:$0xff]  ;;  %v428_v29 = vld [vmem:[#allocation2 + $0x3e0] sm:$0xff] }
  0xe5   :  { %7940 = vst [vmem:[#allocation112_spill] sm:$0xff] %v6255_v7  ;;  %7941 = vst [vmem:[#allocation113_spill] sm:$0xff] %v6257_v38  ;;  %v6275_v62 = vpack.c.bf16 %v414_v40, %v406_v16  ;;  %v6285_v53 = vpack.c.bf16 %v428_v29, %v420_v30  ;;  %v436_v16 = vld [vmem:[#allocation2 + $0x420] sm:$0xff] }
  0xe6   :  { %3566 = vmatpush1.bf16.msra.mxu0 %v6237_v45  ;;  %3630 = vmatpush1.bf16.msra.mxu1 %v6239_v55  ;;  %v413_v45 = vld [vmem:[#allocation2 + $0x368] sm:$0xff]  ;;  %v415_v55 = vld [vmem:[#allocation2 + $0x378] sm:$0xff]  ;;  %v444_v40 = vld [vmem:[#allocation2 + $0x460] sm:$0xff] }
  0xe7   :  { %3568 = vmatprep.subr.bf16.mxu0 %v6243_v46  ;;  %3632 = vmatprep.subr.bf16.mxu1 %v6245_v11  ;;  %v6267_v35 = vpack.c.bf16 %v413_v45, %v405_v59  ;;  %v6269_v26 = vpack.c.bf16 %v415_v55, %v407_v8  ;;  %v421_v11 = vld [vmem:[#allocation2 + $0x3a8] sm:$0xff]  ;;  %v423_v46 = vld [vmem:[#allocation2 + $0x3b8] sm:$0xff]  ;;  %7947 = vst [vmem:[#allocation119_spill] sm:$0xff] %v6275_v62  ;;  %v422_v45 = vld [vmem:[#allocation2 + $0x3b0] sm:$0xff] }
  0xe8   :  { %v430_v55 = vld [vmem:[#allocation2 + $0x3f0] sm:$0xff]  ;;  %7950 = vst [vmem:[#allocation122_spill] sm:$0xff] %v6285_v53  ;;  %v6297_v30 = vpack.c.bf16 %v444_v40, %v436_v16 }
  0xe9   :  { %7944 = vst [vmem:[#allocation116_spill] sm:$0xff] %v6267_v35  ;;  %7945 = vst [vmem:[#allocation117_spill] sm:$0xff] %v6269_v26  ;;  %v6287_v21 = vpack.c.bf16 %v430_v55, %v422_v45  ;;  %v452_v45 = vld [vmem:[#allocation2 + $0x4a0] sm:$0xff] }
  0xea   :  { %3570 = vmatpush1.bf16.msra.mxu0 %v6249_v39  ;;  %3634 = vmatpush1.bf16.msra.mxu1 %v6251_v12  ;;  %v429_v39 = vld [vmem:[#allocation2 + $0x3e8] sm:$0xff]  ;;  %v431_v12 = vld [vmem:[#allocation2 + $0x3f8] sm:$0xff]  ;;  %7954 = vst [vmem:[#allocation126_spill] sm:$0xff] %v6297_v30  ;;  %v460_v55 = vld [vmem:[#allocation2 + $0x4e0] sm:$0xff] }
  0xeb   :  { %3572 = vmatprep.subr.bf16.mxu0 %v6255_v7  ;;  %3636 = vmatprep.subr.bf16.mxu1 %v6257_v38  ;;  %v6279_v8 = vpack.c.bf16 %v429_v39, %v421_v11  ;;  %v6281_v59 = vpack.c.bf16 %v431_v12, %v423_v46  ;;  %v437_v38 = vld [vmem:[#allocation2 + $0x428] sm:$0xff]  ;;  %v439_v7 = vld [vmem:[#allocation2 + $0x438] sm:$0xff]  ;;  %7951 = vst [vmem:[#allocation123_spill] sm:$0xff] %v6287_v21  ;;  %v438_v39 = vld [vmem:[#allocation2 + $0x430] sm:$0xff] }
  0xec   :  { %v446_v12 = vld [vmem:[#allocation2 + $0x470] sm:$0xff]  ;;  %v6309_v16 = vpack.c.bf16 %v460_v55, %v452_v45 }
  0xed   :  { %7948 = vst [vmem:[#allocation120_spill] sm:$0xff] %v6279_v8  ;;  %7949 = vst [vmem:[#allocation121_spill] sm:$0xff] %v6281_v59  ;;  %v6299_v29 = vpack.c.bf16 %v446_v12, %v438_v39  ;;  %v468_v39 = vld [vmem:[#allocation2 + $0x520] sm:$0xff] }
  0xee   :  { %3574 = vmatpush1.bf16.msra.mxu0 %v6261_v36  ;;  %3638 = vmatpush1.bf16.msra.mxu1 %v6263_v37  ;;  %v445_v36 = vld [vmem:[#allocation2 + $0x468] sm:$0xff]  ;;  %v447_v37 = vld [vmem:[#allocation2 + $0x478] sm:$0xff]  ;;  %7958 = vst [vmem:[#allocation130_spill] sm:$0xff] %v6309_v16  ;;  %v476_v12 = vld [vmem:[#allocation2 + $0x560] sm:$0xff] }
  0xef   :  { %3576 = vmatprep.subr.bf16.mxu0 %v6267_v35  ;;  %3640 = vmatprep.subr.bf16.mxu1 %v6269_v26  ;;  %v6291_v46 = vpack.c.bf16 %v445_v36, %v437_v38  ;;  %v6293_v11 = vpack.c.bf16 %v447_v37, %v439_v7  ;;  %v453_v26 = vld [vmem:[#allocation2 + $0x4a8] sm:$0xff]  ;;  %v455_v35 = vld [vmem:[#allocation2 + $0x4b8] sm:$0xff]  ;;  %7955 = vst [vmem:[#allocation127_spill] sm:$0xff] %v6299_v29  ;;  %v454_v36 = vld [vmem:[#allocation2 + $0x4b0] sm:$0xff] }
  0xf0   :  { %v462_v37 = vld [vmem:[#allocation2 + $0x4f0] sm:$0xff]  ;;  %v6321_v45 = vpack.c.bf16 %v476_v12, %v468_v39 }
  0xf1   :  { %7952 = vst [vmem:[#allocation124_spill] sm:$0xff] %v6291_v46  ;;  %7953 = vst [vmem:[#allocation125_spill] sm:$0xff] %v6293_v11  ;;  %v6311_v40 = vpack.c.bf16 %v462_v37, %v454_v36  ;;  %v484_v36 = vld [vmem:[#allocation2 + $0x5a0] sm:$0xff] }
  0xf2   :  { %3578 = vmatpush1.bf16.msra.mxu0 %v6273_v18  ;;  %3642 = vmatpush1.bf16.msra.mxu1 %v6275_v62  ;;  %v461_v18 = vld [vmem:[#allocation2 + $0x4e8] sm:$0xff]  ;;  %v463_v62 = vld [vmem:[#allocation2 + $0x4f8] sm:$0xff]  ;;  %7962 = vst [vmem:[#allocation134_spill] sm:$0xff] %v6321_v45  ;;  %v492_v37 = vld [vmem:[#allocation2 + $0x5e0] sm:$0xff] }
  0xf3   :  { %3580 = vmatprep.subr.bf16.mxu0 %v6279_v8  ;;  %3644 = vmatprep.subr.bf16.mxu1 %v6281_v59  ;;  %v6303_v7 = vpack.c.bf16 %v461_v18, %v453_v26  ;;  %v6305_v38 = vpack.c.bf16 %v463_v62, %v455_v35  ;;  %v469_v59 = vld [vmem:[#allocation2 + $0x528] sm:$0xff]  ;;  %v471_v8 = vld [vmem:[#allocation2 + $0x538] sm:$0xff]  ;;  %7959 = vst [vmem:[#allocation131_spill] sm:$0xff] %v6311_v40  ;;  %v470_v18 = vld [vmem:[#allocation2 + $0x530] sm:$0xff] }
  0xf4   :  { %v478_v62 = vld [vmem:[#allocation2 + $0x570] sm:$0xff]  ;;  %v6333_v39 = vpack.c.bf16 %v492_v37, %v484_v36 }
  0xf5   :  { %7956 = vst [vmem:[#allocation128_spill] sm:$0xff] %v6303_v7  ;;  %7957 = vst [vmem:[#allocation129_spill] sm:$0xff] %v6305_v38  ;;  %v6323_v55 = vpack.c.bf16 %v478_v62, %v470_v18  ;;  %v500_v18 = vld [vmem:[#allocation2 + $0x620] sm:$0xff] }
  0xf6   :  { %3582 = vmatpush1.bf16.msra.mxu0 %v6285_v53  ;;  %3646 = vmatpush1.bf16.msra.mxu1 %v6287_v21  ;;  %v477_v53 = vld [vmem:[#allocation2 + $0x568] sm:$0xff]  ;;  %v479_v21 = vld [vmem:[#allocation2 + $0x578] sm:$0xff]  ;;  %7966 = vst [vmem:[#allocation138_spill] sm:$0xff] %v6333_v39  ;;  %v508_v62 = vld [vmem:[#allocation2 + $0x660] sm:$0xff] }
  0xf7   :  { %3584 = vmatprep.subr.bf16.mxu0 %v6291_v46  ;;  %3648 = vmatprep.subr.bf16.mxu1 %v6293_v11  ;;  %v6315_v35 = vpack.c.bf16 %v477_v53, %v469_v59  ;;  %v6317_v26 = vpack.c.bf16 %v479_v21, %v471_v8  ;;  %v485_v11 = vld [vmem:[#allocation2 + $0x5a8] sm:$0xff]  ;;  %v487_v46 = vld [vmem:[#allocation2 + $0x5b8] sm:$0xff]  ;;  %7963 = vst [vmem:[#allocation135_spill] sm:$0xff] %v6323_v55  ;;  %v486_v53 = vld [vmem:[#allocation2 + $0x5b0] sm:$0xff] }
  0xf8   :  { %v494_v21 = vld [vmem:[#allocation2 + $0x5f0] sm:$0xff]  ;;  %v6345_v36 = vpack.c.bf16 %v508_v62, %v500_v18 }
  0xf9   :  { %7960 = vst [vmem:[#allocation132_spill] sm:$0xff] %v6315_v35  ;;  %7961 = vst [vmem:[#allocation133_spill] sm:$0xff] %v6317_v26  ;;  %v6335_v12 = vpack.c.bf16 %v494_v21, %v486_v53  ;;  %v516_v53 = vld [vmem:[#allocation2 + $0x6a0] sm:$0xff] }
  0xfa   :  { %3586 = vmatpush1.bf16.msra.mxu0 %v6297_v30  ;;  %3650 = vmatpush1.bf16.msra.mxu1 %v6299_v29  ;;  %v493_v30 = vld [vmem:[#allocation2 + $0x5e8] sm:$0xff]  ;;  %v495_v29 = vld [vmem:[#allocation2 + $0x5f8] sm:$0xff]  ;;  %7970 = vst [vmem:[#allocation142_spill] sm:$0xff] %v6345_v36  ;;  %v524_v21 = vld [vmem:[#allocation2 + $0x6e0] sm:$0xff] }
  0xfb   :  { %3588 = vmatprep.subr.bf16.mxu0 %v6303_v7  ;;  %3652 = vmatprep.subr.bf16.mxu1 %v6305_v38  ;;  %v6327_v8 = vpack.c.bf16 %v493_v30, %v485_v11  ;;  %v6329_v59 = vpack.c.bf16 %v495_v29, %v487_v46  ;;  %v501_v38 = vld [vmem:[#allocation2 + $0x628] sm:$0xff]  ;;  %v503_v7 = vld [vmem:[#allocation2 + $0x638] sm:$0xff]  ;;  %7967 = vst [vmem:[#allocation139_spill] sm:$0xff] %v6335_v12  ;;  %v502_v30 = vld [vmem:[#allocation2 + $0x630] sm:$0xff] }
  0xfc   :  { %v510_v29 = vld [vmem:[#allocation2 + $0x670] sm:$0xff]  ;;  %v6357_v18 = vpack.c.bf16 %v524_v21, %v516_v53 }
  0xfd   :  { %7964 = vst [vmem:[#allocation136_spill] sm:$0xff] %v6327_v8  ;;  %7965 = vst [vmem:[#allocation137_spill] sm:$0xff] %v6329_v59  ;;  %v6347_v37 = vpack.c.bf16 %v510_v29, %v502_v30  ;;  %v532_v30 = vld [vmem:[#allocation2 + $0x720] sm:$0xff] }
  0xfe   :  { %3590 = vmatpush1.bf16.msra.mxu0 %v6309_v16  ;;  %3654 = vmatpush1.bf16.msra.mxu1 %v6311_v40  ;;  %v509_v16 = vld [vmem:[#allocation2 + $0x668] sm:$0xff]  ;;  %v511_v40 = vld [vmem:[#allocation2 + $0x678] sm:$0xff]  ;;  %7974 = vst [vmem:[#allocation146_spill] sm:$0xff] %v6357_v18  ;;  %v540_v29 = vld [vmem:[#allocation2 + $0x760] sm:$0xff] }
  0xff   :  { %3592 = vmatprep.subr.bf16.mxu0 %v6315_v35  ;;  %3656 = vmatprep.subr.bf16.mxu1 %v6317_v26  ;;  %v6339_v46 = vpack.c.bf16 %v509_v16, %v501_v38  ;;  %v6341_v11 = vpack.c.bf16 %v511_v40, %v503_v7  ;;  %v517_v26 = vld [vmem:[#allocation2 + $0x6a8] sm:$0xff]  ;;  %v519_v35 = vld [vmem:[#allocation2 + $0x6b8] sm:$0xff]  ;;  %7971 = vst [vmem:[#allocation143_spill] sm:$0xff] %v6347_v37  ;;  %v518_v16 = vld [vmem:[#allocation2 + $0x6b0] sm:$0xff] }
 0x100   :  { %v526_v40 = vld [vmem:[#allocation2 + $0x6f0] sm:$0xff]  ;;  %v6369_v53 = vpack.c.bf16 %v540_v29, %v532_v30 }
 0x101   :  { %7968 = vst [vmem:[#allocation140_spill] sm:$0xff] %v6339_v46  ;;  %7969 = vst [vmem:[#allocation141_spill] sm:$0xff] %v6341_v11  ;;  %v6359_v62 = vpack.c.bf16 %v526_v40, %v518_v16  ;;  %v548_v16 = vld [vmem:[#allocation2 + $0x7a0] sm:$0xff]  ;;  %v558_v40 = vld [vmem:[#allocation2 + $0x7f0] sm:$0xff] }
 0x102   :  { %3594 = vmatpush1.bf16.msra.mxu0 %v6321_v45  ;;  %3658 = vmatpush1.bf16.msra.mxu1 %v6323_v55  ;;  %v525_v45 = vld [vmem:[#allocation2 + $0x6e8] sm:$0xff]  ;;  %v527_v55 = vld [vmem:[#allocation2 + $0x6f8] sm:$0xff]  ;;  %7978 = vst [vmem:[#allocation150_spill] sm:$0xff] %v6369_v53 }
 0x103   :  { %3596 = vmatprep.subr.bf16.mxu0 %v6327_v8  ;;  %3660 = vmatprep.subr.bf16.mxu1 %v6329_v59  ;;  %v6351_v7 = vpack.c.bf16 %v525_v45, %v517_v26  ;;  %v6353_v38 = vpack.c.bf16 %v527_v55, %v519_v35  ;;  %v533_v59 = vld [vmem:[#allocation2 + $0x728] sm:$0xff]  ;;  %v535_v8 = vld [vmem:[#allocation2 + $0x738] sm:$0xff]  ;;  %7975 = vst [vmem:[#allocation147_spill] sm:$0xff] %v6359_v62  ;;  %v534_v45 = vld [vmem:[#allocation2 + $0x730] sm:$0xff] }
 0x104   :  { %v542_v55 = vld [vmem:[#allocation2 + $0x770] sm:$0xff] }
 0x105   :  { %7972 = vst [vmem:[#allocation144_spill] sm:$0xff] %v6351_v7  ;;  %7973 = vst [vmem:[#allocation145_spill] sm:$0xff] %v6353_v38  ;;  %v6371_v21 = vpack.c.bf16 %v542_v55, %v534_v45  ;;  %v7989_v45 = vld [vmem:[#allocation63_spill] sm:$0xff]  ;;  %v7990_v55 = vld [vmem:[#allocation64_spill] sm:$0xff] }
 0x106   :  { %3598 = vmatpush1.bf16.msra.mxu0 %v6333_v39  ;;  %3662 = vmatpush1.bf16.msra.mxu1 %v6335_v12  ;;  %v541_v39 = vld [vmem:[#allocation2 + $0x768] sm:$0xff]  ;;  %v543_v12 = vld [vmem:[#allocation2 + $0x778] sm:$0xff] }
 0x107   :  { %3600 = vmatprep.subr.bf16.mxu0 %v6339_v46  ;;  %3664 = vmatprep.subr.bf16.mxu1 %v6341_v11  ;;  %v6363_v35 = vpack.c.bf16 %v541_v39, %v533_v59  ;;  %v6365_v26 = vpack.c.bf16 %v543_v12, %v535_v8  ;;  %v549_v11 = vld [vmem:[#allocation2 + $0x7a8] sm:$0xff]  ;;  %v551_v46 = vld [vmem:[#allocation2 + $0x7b8] sm:$0xff]  ;;  %7979 = vst [vmem:[#allocation151_spill] sm:$0xff] %v6371_v21  ;;  %v556_v39 = vld [vmem:[#allocation2 + $0x7e0] sm:$0xff] }
 0x108   :  { %v550_v12 = vld [vmem:[#allocation2 + $0x7b0] sm:$0xff]  ;;  %v6381_v30 = vpack.c.bf16 %v556_v39, %v548_v16  ;;  %v7991_v16 = vld [vmem:[#allocation65_spill] sm:$0xff]  ;;  %v7992_v39 = vld [vmem:[#allocation66_spill] sm:$0xff] }
 0x109   :  { %7976 = vst [vmem:[#allocation148_spill] sm:$0xff] %v6363_v35  ;;  %7977 = vst [vmem:[#allocation149_spill] sm:$0xff] %v6365_v26  ;;  %v6383_v29 = vpack.c.bf16 %v558_v40, %v550_v12  ;;  %v7993_v12 = vld [vmem:[#allocation67_spill] sm:$0xff]  ;;  %v7994_v40 = vld [vmem:[#allocation68_spill] sm:$0xff] }
 0x10a   :  { %3602 = vmatpush1.bf16.msra.mxu0 %v6345_v36  ;;  %3666 = vmatpush1.bf16.msra.mxu1 %v6347_v37  ;;  %v557_v36 = vld [vmem:[#allocation2 + $0x7e8] sm:$0xff]  ;;  %v559_v37 = vld [vmem:[#allocation2 + $0x7f8] sm:$0xff]  ;;  %7982 = vst [vmem:[#allocation154_spill] sm:$0xff] %v6381_v30 }
 0x10b   :  { %3604 = vmatprep.subr.bf16.mxu0 %v6351_v7  ;;  %3668 = vmatprep.subr.bf16.mxu1 %v6353_v38  ;;  %v6375_v8 = vpack.c.bf16 %v557_v36, %v549_v11  ;;  %v6377_v59 = vpack.c.bf16 %v559_v37, %v551_v46  ;;  %7983 = vst [vmem:[#allocation155_spill] sm:$0xff] %v6383_v29  ;;  %v7985_v46 = vld [vmem:[#allocation59_spill] sm:$0xff]  ;;  %v7986_v11 = vld [vmem:[#allocation60_spill] sm:$0xff]  ;;  %v7987_v36 = vld [vmem:[#allocation61_spill] sm:$0xff] }
 0x10c   :  { %v7988_v37 = vld [vmem:[#allocation62_spill] sm:$0xff] }
 0x10d   :  { %7980 = vst [vmem:[#allocation152_spill] sm:$0xff] %v6375_v8  ;;  %7981 = vst [vmem:[#allocation153_spill] sm:$0xff] %v6377_v59 }
 0x10e   :  { %3606 = vmatpush1.bf16.msra.mxu0 %v6357_v18  ;;  %3670 = vmatpush1.bf16.msra.mxu1 %v6359_v62 }
 0x10f   :  { %3608 = vmatprep.subr.bf16.mxu0 %v6363_v35  ;;  %3672 = vmatprep.subr.bf16.mxu1 %v6365_v26 }
 0x112   :  { %3610 = vmatpush1.bf16.msra.mxu0 %v6369_v53  ;;  %3674 = vmatpush1.bf16.msra.mxu1 %v6371_v21 }
 0x113   :  { %3612 = vmatprep.subr.bf16.mxu0 %v6375_v8  ;;  %3676 = vmatprep.subr.bf16.mxu1 %v6377_v59 }
 0x116   :  { %3614 = vmatpush1.bf16.msra.mxu0 %v6381_v30  ;;  %3678 = vmatpush1.bf16.msra.mxu1 %v6383_v29 }
 0x117   :  { %3680 = vmatprep.subr.bf16.mxu0 %v5912_v5  ;;  %3744 = vmatprep.subr.bf16.mxu1 %v5914_v9 }
 0x119   :  { %791 = vmatmul.mubr.f32.vlgmr.msra.gmra.mrb[2].mxu0 %v6201_v6  ;;  %862 = vmatmul.mubr.f32.vlgmr.msra.gmra.mrb[2].mxu1 %v6201_v6  ;;  %v7984_v6 = vld [vmem:[#allocation58_spill] sm:$0xff] }
 0x11a   :  { %3682 = vmatpush1.bf16.msra.mxu0 %v5920_v14  ;;  %3746 = vmatpush1.bf16.msra.mxu1 %v5922_v15 }
 0x11b   :  { %3684 = vmatprep.subr.bf16.mxu0 %v5925_v19  ;;  %3748 = vmatprep.subr.bf16.mxu1 %v5929_v23 }
 0x11e   :  { %3686 = vmatpush1.bf16.msra.mxu0 %v5931_v24  ;;  %3750 = vmatpush1.bf16.msra.mxu1 %v5934_v28 }
 0x11f   :  { %3688 = vmatprep.subr.bf16.mxu0 %v5940_v33  ;;  %3752 = vmatprep.subr.bf16.mxu1 %v5942_v34 }
 0x122   :  { %3690 = vmatpush1.bf16.msra.mxu0 %v5946_v42  ;;  %3754 = vmatpush1.bf16.msra.mxu1 %v5948_v43 }
 0x123   :  { %3692 = vmatprep.subr.bf16.mxu0 %v5952_v47  ;;  %3756 = vmatprep.subr.bf16.mxu1 %v5954_v48 }
 0x126   :  { %3694 = vmatpush1.bf16.msra.mxu0 %v5960_v57  ;;  %3758 = vmatpush1.bf16.msra.mxu1 %v5962_v58 }
 0x127   :  { %3696 = vmatprep.subr.bf16.mxu0 %v5967_v63  ;;  %3760 = vmatprep.subr.bf16.mxu1 %v5969_v0 }
 0x12a   :  { %3698 = vmatpush1.bf16.msra.mxu0 %v5973_v10  ;;  %3762 = vmatpush1.bf16.msra.mxu1 %v5983_v13 }
 0x12b   :  { %3700 = vmatprep.subr.bf16.mxu0 %v5990_v17  ;;  %3764 = vmatprep.subr.bf16.mxu1 %v5997_v22 }
 0x12e   :  { %3702 = vmatpush1.bf16.msra.mxu0 %v6022_v41  ;;  %3766 = vmatpush1.bf16.msra.mxu1 %v6024_v44 }
 0x12f   :  { %3704 = vmatprep.subr.bf16.mxu0 %v6028_v49  ;;  %3768 = vmatprep.subr.bf16.mxu1 %v6030_v50 }
 0x132   :  { %3706 = vmatpush1.bf16.msra.mxu0 %v6034_v60  ;;  %3770 = vmatpush1.bf16.msra.mxu1 %v6036_v61 }
 0x133   :  { %3708 = vmatprep.subr.bf16.mxu0 %v6040_v2  ;;  %3772 = vmatprep.subr.bf16.mxu1 %v6042_v3 }
 0x136   :  { %3710 = vmatpush1.bf16.msra.mxu0 %v6046_v20  ;;  %3774 = vmatpush1.bf16.msra.mxu1 %v6048_v25 }
 0x137   :  { %3712 = vmatprep.subr.bf16.mxu0 %v6052_v31  ;;  %3776 = vmatprep.subr.bf16.mxu1 %v6054_v32  ;;  %v56_v32 = vld [vmem:[%s7526_s0 + $0x18] sm:$0xff]  ;;  %v8015_v31 = vld [vmem:[#allocation34_spill] sm:$0xff] }
 0x13a   :  { %3714 = vmatpush1.bf16.msra.mxu0 %v6058_v54  ;;  %3778 = vmatpush1.bf16.msra.mxu1 %v6060_v56 }
 0x13b   :  { %3716 = vmatprep.subr.bf16.mxu0 %v6064_v1  ;;  %3780 = vmatprep.subr.bf16.mxu1 %v6066_v4 }
 0x13e   :  { %3718 = vmatpush1.bf16.msra.mxu0 %v6072_v27  ;;  %3782 = vmatpush1.bf16.msra.mxu1 %v7984_v6  ;;  %v7995_v6 = vld [vmem:[#allocation69_spill] sm:$0xff] }
 0x13f   :  { %3720 = vmatprep.subr.bf16.mxu0 %v7985_v46  ;;  %3784 = vmatprep.subr.bf16.mxu1 %v7986_v11  ;;  %v7996_v46 = vld [vmem:[#allocation70_spill] sm:$0xff]  ;;  %v7997_v11 = vld [vmem:[#allocation71_spill] sm:$0xff] }
 0x142   :  { %3722 = vmatpush1.bf16.msra.mxu0 %v7987_v36  ;;  %3786 = vmatpush1.bf16.msra.mxu1 %v7988_v37  ;;  %v7998_v36 = vld [vmem:[#allocation72_spill] sm:$0xff]  ;;  %v7999_v37 = vld [vmem:[#allocation73_spill] sm:$0xff] }
 0x143   :  { %3724 = vmatprep.subr.bf16.mxu0 %v7989_v45  ;;  %3788 = vmatprep.subr.bf16.mxu1 %v7990_v55  ;;  %v8000_v45 = vld [vmem:[#allocation74_spill] sm:$0xff]  ;;  %v70_v55 = vpop.permute.xlu0 %69 }
 0x146   :  { %3726 = vmatpush1.bf16.msra.mxu0 %v7991_v16  ;;  %3790 = vmatpush1.bf16.msra.mxu1 %v7992_v39  ;;  %v8001_v39 = vld [vmem:[#allocation77_spill] sm:$0xff] }
 0x147   :  { %3728 = vmatprep.subr.bf16.mxu0 %v7993_v12  ;;  %3792 = vmatprep.subr.bf16.mxu1 %v7994_v40  ;;  %v8002_v12 = vld [vmem:[#allocation78_spill] sm:$0xff]  ;;  %v8003_v40 = vld [vmem:[#allocation79_spill] sm:$0xff] }
 0x14a   :  { %3730 = vmatpush1.bf16.msra.mxu0 %v7995_v6  ;;  %3794 = vmatpush1.bf16.msra.mxu1 %v7996_v46  ;;  %v8004_v6 = vld [vmem:[#allocation80_spill] sm:$0xff]  ;;  %v8005_v46 = vld [vmem:[#allocation81_spill] sm:$0xff] }
 0x14b   :  { %3732 = vmatprep.subr.bf16.mxu0 %v7997_v11  ;;  %3796 = vmatprep.subr.bf16.mxu1 %v7998_v36  ;;  %v8006_v11 = vld [vmem:[#allocation82_spill] sm:$0xff]  ;;  %v8007_v36 = vld [vmem:[#allocation83_spill] sm:$0xff] }
 0x14e   :  { %3734 = vmatpush1.bf16.msra.mxu0 %v7999_v37  ;;  %3798 = vmatpush1.bf16.msra.mxu1 %v8000_v45  ;;  %v8008_v37 = vld [vmem:[#allocation84_spill] sm:$0xff] }
 0x14f   :  { %3736 = vmatprep.subr.bf16.mxu0 %v6126_v51  ;;  %3800 = vmatprep.subr.bf16.mxu1 %v6128_v52 }
 0x152   :  { %3738 = vmatpush1.bf16.msra.mxu0 %v8001_v39  ;;  %3802 = vmatpush1.bf16.msra.mxu1 %v8002_v12  ;;  %v8009_v39 = vld [vmem:[#allocation85_spill] sm:$0xff]  ;;  %v8010_v12 = vld [vmem:[#allocation86_spill] sm:$0xff] }
 0x153   :  { %3740 = vmatprep.subr.bf16.mxu0 %v8003_v40  ;;  %3804 = vmatprep.subr.bf16.mxu1 %v8004_v6  ;;  %v147_v27 = vmul.f32 %v8009_v39, %v70_v55  ;;  %v149_v4 = vmul.f32 %v8010_v12, %v70_v55  ;;  %v8011_v40 = vld [vmem:[#allocation32_spill] sm:$0xff]  ;;  %v8012_v6 = vld [vmem:[#allocation35_spill] sm:$0xff] }
 0x154   :  { %v148_v1 = vmul.f32 %v8011_v40, %v70_v55  ;;  %v150_v56 = vmul.f32 %v8012_v6, %v70_v55  ;;  %v8016_v40 = vld [vmem:[#allocation36_spill] sm:$0xff] }
 0x156   :  { %3742 = vmatpush1.bf16.msra.mxu0 %v8005_v46  ;;  %3806 = vmatpush1.bf16.msra.mxu1 %v8006_v11  ;;  %v55_v11 = vld [vmem:[%s7526_s0 + $0x10] sm:$0xff]  ;;  %v249_v12 = vadd.f32 %v8015_v31, %v148_v1  ;;  %v251_v20 = vadd.f32 %v8016_v40, %v150_v56 }
 0x157   :  { %3808 = vmatprep.subr.bf16.mxu0 %v8007_v36  ;;  %3872 = vmatprep.subr.bf16.mxu1 %v8008_v37  ;;  %v8013_v36 = vld [vmem:[#allocation87_spill] sm:$0xff]  ;;  %v8014_v37 = vld [vmem:[#allocation88_spill] sm:$0xff] }
 0x158   :  { %v248_v46 = vadd.f32 %v8013_v36, %v147_v27  ;;  %74 = vperm.xlu1 %5507, %v55_v11   ;;  %v250_v54 = vadd.f32 %v8014_v37, %v149_v4  ;;  %v58_v27 = vld [vmem:[%s7526_s0 + $0x28] sm:$0xff] }
 0x15c   :  { %79 = vperm.xlu1 %5507, %v56_v32  }
 0x160   :  { %89 = vperm.xlu1 %5507, %v58_v27  }
 0x1ac   :  { %v650_v45 = vpop.f32.mrb[0].mxu0  ;;  %v721_v51 = vpop.f32.mrb[0].mxu1 }
 0x1ad   :  { %v652_v16 = vpop.f32.mrb[1].mxu0  ;;  %v723_v52 = vpop.f32.mrb[1].mxu1  ;;  %v651_v39 = vadd.f32 %v650_v45, %v248_v46  ;;  %v722_v25 = vadd.f32 %v721_v51, %v250_v54  ;;  %v60_v46 = vld [vmem:[%s7526_s0 + $0x38] sm:$0xff] }
 0x1ae   :  { %v653_v6 = vadd.f32 %v652_v16, %v249_v12  ;;  %v724_v3 = vadd.f32 %v723_v52, %v251_v20  ;;  %99 = vperm.xlu1 %5507, %v60_v46   ;;  %v8017_v51 = vld [vmem:[#allocation89_spill] sm:$0xff] }
 0x1af   :  { %v3325_v11 = vmul.f32 -1.442695, %v651_v39  ;;  %v3327_v36 = vmul.f32 -1.442695, %v722_v25  ;;  %v151_v52 = vmul.f32 %v8017_v51, %v70_v55  ;;  %v8018_v25 = vld [vmem:[#allocation91_spill] sm:$0xff]  ;;  %v8024_v51 = vld [vmem:[#allocation40_spill] sm:$0xff] }
 0x1b0   :  { %v3326_v4 = vmul.f32 -1.442695, %v653_v6  ;;  %v3328_v37 = vmul.f32 -1.442695, %v724_v3  ;;  %v153_v6 = vmul.f32 %v8018_v25, %v70_v55  ;;  %v8019_v3 = vld [vmem:[#allocation37_spill] sm:$0xff]  ;;  %v8020_v39 = vld [vmem:[#allocation39_spill] sm:$0xff] }
 0x1b1   :  { %5524 = vpow2.f32 %v3325_v11  ;;  %v152_v16 = vmul.f32 %v8019_v3, %v70_v55  ;;  %v154_v12 = vmul.f32 %v8020_v39, %v70_v55 }
 0x1b2   :  { %5526 = vpow2.f32 %v3327_v36  ;;  %v8021_v36 = vld [vmem:[#allocation90_spill] sm:$0xff] }
 0x1b3   :  { %5528 = vpow2.f32 %v3326_v4  ;;  %v252_v4 = vadd.f32 %v8021_v36, %v151_v52  ;;  %v255_v61 = vadd.f32 %v8024_v51, %v154_v12 }
 0x1b4   :  { %5530 = vpow2.f32 %v3328_v37  ;;  %v8022_v37 = vld [vmem:[#allocation92_spill] sm:$0xff] }
 0x1b5   :  { %v254_v46 = vadd.f32 %v8022_v37, %v153_v6 }
 0x1bb   :  { %v5525_v32 = vpop.eup %5524 }
 0x1bc   :  { %v5527_v20 = vpop.eup %5526  ;;  %v886_v1 = vadd.f32 1.0, %v5525_v32  ;;  %v8023_v32 = vld [vmem:[#allocation38_spill] sm:$0xff] }
 0x1bd   :  { %v5529_v54 = vpop.eup %5528  ;;  %v888_v45 = vadd.f32 1.0, %v5527_v20  ;;  %v253_v2 = vadd.f32 %v8023_v32, %v152_v16 }
 0x1be   :  { %v5531_v56 = vpop.eup %5530  ;;  %v887_v27 = vadd.f32 1.0, %v5529_v54  ;;  %5532 = vrcp.f32 %v886_v1 }
 0x1bf   :  { %v889_v11 = vadd.f32 1.0, %v5531_v56  ;;  %5534 = vrcp.f32 %v888_v45 }
 0x1c0   :  { %5536 = vrcp.f32 %v887_v27  ;;  %v8025_v27 = vld [vmem:[#allocation93_spill] sm:$0xff] }
 0x1c1   :  { %5538 = vrcp.f32 %v889_v11 }
 0x1c8   :  { %v5533_v52 = vpop.eup %5532 }
 0x1c9   :  { %v5535_v6 = vpop.eup %5534 }
 0x1ca   :  { %v5537_v45 = vpop.eup %5536 }
 0x1cb   :  { %v5539_v16 = vpop.eup %5538 }
 0x1ec   :  { %v792_v40 = vpop.f32.mrb[2].mxu0  ;;  %v863_v31 = vpop.f32.mrb[2].mxu1 }
 0x1ed   :  { %v793_v20 = vadd.f32 %v792_v40, %v252_v4  ;;  %v864_v25 = vadd.f32 %v863_v31, %v254_v46  ;;  %v794_v3 = vpop.f32.mrb[3].mxu0  ;;  %v865_v60 = vpop.f32.mrb[3].mxu1  ;;  %v906_v40 = vmul.f32 %v5535_v6, %v8025_v27  ;;  %v907_v46 = vmul.f32 0.0, %v5539_v16  ;;  %v8027_v6 = vld [vmem:[#allocation95_spill] sm:$0xff]  ;;  %v8029_v16 = vld [vmem:[#allocation97_spill] sm:$0xff] }
 0x1ee   :  { %v795_v55 = vadd.f32 %v794_v3, %v253_v2  ;;  %v866_v54 = vadd.f32 %v865_v60, %v255_v61  ;;  %v8031_v27 = vld [vmem:[#allocation99_spill] sm:$0xff] }
 0x1ef   :  { %v3329_v56 = vmul.f32 -1.442695, %v793_v20  ;;  %5540 = vtanh.f32 %v864_v25 }
 0x1f0   :  { %v3330_v1 = vmul.f32 -1.442695, %v795_v55  ;;  %5542 = vtanh.f32 %v866_v54 }
 0x1f1   :  { %5544 = vpow2.f32 %v3329_v56 }
 0x1f2   :  { %5546 = vpow2.f32 %v3330_v1 }
 0x1f9   :  { %v5541_v32 = vpop.eup %5540 }
 0x1fa   :  { %v5543_v12 = vpop.eup %5542  ;;  %v908_v31 = vmul.f32 %v5541_v32, %v5533_v52  ;;  %v8026_v52 = vld [vmem:[#allocation94_spill] sm:$0xff] }
 0x1fb   :  { %v5545_v4 = vpop.eup %5544  ;;  %v909_v11 = vmul.f32 %v5543_v12, %v5537_v45  ;;  %v8028_v45 = vld [vmem:[#allocation96_spill] sm:$0xff]  ;;  %v8030_v12 = vld [vmem:[#allocation98_spill] sm:$0xff] }
 0x1fc   :  { %v5547_v2 = vpop.eup %5546  ;;  %v890_v60 = vadd.f32 1.0, %v5545_v4  ;;  %v6486_v61 = vadd.f32 %v908_v31, %v906_v40  ;;  %v8032_v40 = vld [vmem:[#allocation100_spill] sm:$0xff]  ;;  %v8033_v31 = vld [vmem:[#allocation101_spill] sm:$0xff]  ;;  %v8034_v4 = vld [vmem:[#allocation102_spill] sm:$0xff] }
 0x1fd   :  { %v891_v25 = vadd.f32 1.0, %v5547_v2  ;;  %v6488_v3 = vadd.f32 %v909_v11, %v907_v46  ;;  %v8035_v46 = vld [vmem:[#allocation103_spill] sm:$0xff]  ;;  %v8036_v11 = vld [vmem:[#allocation104_spill] sm:$0xff]  ;;  %v8037_v2 = vld [vmem:[#allocation105_spill] sm:$0xff] }
 0x1fe   :  { %5548 = vrcp.f32 %v890_v60  ;;  %v8038_v60 = vld [vmem:[#allocation106_spill] sm:$0xff] }
 0x1ff   :  { %5550 = vtanh.f32 %v6486_v61 }
 0x200   :  { %5552 = vrcp.f32 %v891_v25  ;;  %v8039_v25 = vld [vmem:[#allocation107_spill] sm:$0xff] }
 0x201   :  { %5554 = vtanh.f32 %v6488_v3 }
 0x208   :  { %v5549_v20 = vpop.eup %5548 }
 0x209   :  { %v5551_v55 = vpop.eup %5550 }
 0x20a   :  { %v5553_v54 = vpop.eup %5552  ;;  %v6492_v1 = vmul.f32 %v5551_v55, %v5549_v20  ;;  %v8040_v20 = vld [vmem:[#allocation108_spill] sm:$0xff]  ;;  %v8041_v55 = vld [vmem:[#allocation109_spill] sm:$0xff] }
 0x20b   :  { %v5555_v32 = vpop.eup %5554 }
 0x20c   :  { %v915_v56 = vmul.f32 %v5555_v32, %v5553_v54  ;;  %v8042_v54 = vld [vmem:[#allocation110_spill] sm:$0xff]  ;;  %v8043_v32 = vld [vmem:[#allocation111_spill] sm:$0xff] }
 0x20e   :  { %980 = vmatprep.mubr.f32.mxu0 %v915_v56  ;;  %1051 = vmatprep.mubr.f32.mxu1 %v915_v56 }
 0x20f   :  { %981 = vmatmul.mubr.f32.vlgmr.msra.gmra.mrb[4].mxu0 %v6492_v1  ;;  %1052 = vmatmul.mubr.f32.vlgmr.msra.gmra.mrb[4].mxu1 %v6492_v1 }
 0x210   :  { %3810 = vmatpush1.bf16.msra.mxu0 %v8026_v52  ;;  %3874 = vmatpush1.bf16.msra.mxu1 %v8027_v6 }
 0x211   :  { %1122 = vmatprep.mubr.f32.mxu0 %v915_v56  ;;  %1193 = vmatprep.mubr.f32.mxu1 %v915_v56  ;;  %v8044_v56 = vld [vmem:[#allocation112_spill] sm:$0xff] }
 0x212   :  { %3812 = vmatprep.subr.bf16.mxu0 %v8028_v45  ;;  %3876 = vmatprep.subr.bf16.mxu1 %v8029_v16 }
 0x214   :  { %3814 = vmatpush1.bf16.msra.mxu0 %v8030_v12  ;;  %3878 = vmatpush1.bf16.msra.mxu1 %v8031_v27 }
 0x215   :  { %3816 = vmatprep.subr.bf16.mxu0 %v8032_v40  ;;  %3880 = vmatprep.subr.bf16.mxu1 %v8033_v31 }
 0x218   :  { %3818 = vmatpush1.bf16.msra.mxu0 %v8034_v4  ;;  %3882 = vmatpush1.bf16.msra.mxu1 %v8035_v46  ;;  %v8045_v4 = vld [vmem:[#allocation113_spill] sm:$0xff]  ;;  %v8046_v46 = vld [vmem:[#allocation114_spill] sm:$0xff] }
 0x219   :  { %3820 = vmatprep.subr.bf16.mxu0 %v8036_v11  ;;  %3884 = vmatprep.subr.bf16.mxu1 %v8037_v2  ;;  %v8047_v11 = vld [vmem:[#allocation115_spill] sm:$0xff]  ;;  %v8048_v2 = vld [vmem:[#allocation116_spill] sm:$0xff] }
 0x21c   :  { %3822 = vmatpush1.bf16.msra.mxu0 %v8038_v60  ;;  %3886 = vmatpush1.bf16.msra.mxu1 %v8039_v25  ;;  %v8049_v60 = vld [vmem:[#allocation117_spill] sm:$0xff]  ;;  %v8050_v25 = vld [vmem:[#allocation118_spill] sm:$0xff] }
 0x21d   :  { %3824 = vmatprep.subr.bf16.mxu0 %v8040_v20  ;;  %3888 = vmatprep.subr.bf16.mxu1 %v8041_v55  ;;  %v8051_v20 = vld [vmem:[#allocation119_spill] sm:$0xff]  ;;  %v8052_v55 = vld [vmem:[#allocation120_spill] sm:$0xff] }
 0x220   :  { %3826 = vmatpush1.bf16.msra.mxu0 %v8042_v54  ;;  %3890 = vmatpush1.bf16.msra.mxu1 %v8043_v32  ;;  %v8053_v54 = vld [vmem:[#allocation121_spill] sm:$0xff]  ;;  %v8054_v32 = vld [vmem:[#allocation122_spill] sm:$0xff] }
 0x221   :  { %3828 = vmatprep.subr.bf16.mxu0 %v8044_v56  ;;  %3892 = vmatprep.subr.bf16.mxu1 %v8045_v4  ;;  %v8055_v56 = vld [vmem:[#allocation123_spill] sm:$0xff]  ;;  %v8056_v4 = vld [vmem:[#allocation124_spill] sm:$0xff] }
 0x224   :  { %3830 = vmatpush1.bf16.msra.mxu0 %v8046_v46  ;;  %3894 = vmatpush1.bf16.msra.mxu1 %v8047_v11  ;;  %v8057_v46 = vld [vmem:[#allocation125_spill] sm:$0xff]  ;;  %v8058_v11 = vld [vmem:[#allocation126_spill] sm:$0xff] }
 0x225   :  { %3832 = vmatprep.subr.bf16.mxu0 %v8048_v2  ;;  %3896 = vmatprep.subr.bf16.mxu1 %v8049_v60  ;;  %v8059_v2 = vld [vmem:[#allocation127_spill] sm:$0xff]  ;;  %v8060_v60 = vld [vmem:[#allocation128_spill] sm:$0xff] }
 0x228   :  { %3834 = vmatpush1.bf16.msra.mxu0 %v8050_v25  ;;  %3898 = vmatpush1.bf16.msra.mxu1 %v8051_v20  ;;  %v8061_v25 = vld [vmem:[#allocation129_spill] sm:$0xff]  ;;  %v8062_v20 = vld [vmem:[#allocation130_spill] sm:$0xff] }
 0x229   :  { %3836 = vmatprep.subr.bf16.mxu0 %v8052_v55  ;;  %3900 = vmatprep.subr.bf16.mxu1 %v8053_v54  ;;  %v8063_v55 = vld [vmem:[#allocation131_spill] sm:$0xff]  ;;  %v8064_v54 = vld [vmem:[#allocation132_spill] sm:$0xff] }
 0x22c   :  { %3838 = vmatpush1.bf16.msra.mxu0 %v8054_v32  ;;  %3902 = vmatpush1.bf16.msra.mxu1 %v8055_v56  ;;  %v8065_v32 = vld [vmem:[#allocation133_spill] sm:$0xff]  ;;  %v8066_v56 = vld [vmem:[#allocation134_spill] sm:$0xff] }
 0x22d   :  { %3840 = vmatprep.subr.bf16.mxu0 %v8056_v4  ;;  %3904 = vmatprep.subr.bf16.mxu1 %v8057_v46  ;;  %v8067_v4 = vld [vmem:[#allocation135_spill] sm:$0xff]  ;;  %v8068_v46 = vld [vmem:[#allocation136_spill] sm:$0xff] }
 0x230   :  { %3842 = vmatpush1.bf16.msra.mxu0 %v8058_v11  ;;  %3906 = vmatpush1.bf16.msra.mxu1 %v8059_v2  ;;  %v8069_v11 = vld [vmem:[#allocation137_spill] sm:$0xff]  ;;  %v8070_v2 = vld [vmem:[#allocation138_spill] sm:$0xff] }
 0x231   :  { %3844 = vmatprep.subr.bf16.mxu0 %v8060_v60  ;;  %3908 = vmatprep.subr.bf16.mxu1 %v8061_v25  ;;  %v8071_v60 = vld [vmem:[#allocation139_spill] sm:$0xff]  ;;  %v8072_v25 = vld [vmem:[#allocation140_spill] sm:$0xff] }
 0x234   :  { %3846 = vmatpush1.bf16.msra.mxu0 %v8062_v20  ;;  %3910 = vmatpush1.bf16.msra.mxu1 %v8063_v55  ;;  %v8073_v20 = vld [vmem:[#allocation141_spill] sm:$0xff]  ;;  %v8074_v55 = vld [vmem:[#allocation142_spill] sm:$0xff] }
 0x235   :  { %3848 = vmatprep.subr.bf16.mxu0 %v8064_v54  ;;  %3912 = vmatprep.subr.bf16.mxu1 %v8065_v32  ;;  %v8075_v54 = vld [vmem:[#allocation143_spill] sm:$0xff] }
 0x238   :  { %3850 = vmatpush1.bf16.msra.mxu0 %v8066_v56  ;;  %3914 = vmatpush1.bf16.msra.mxu1 %v8067_v4 }
 0x239   :  { %3852 = vmatprep.subr.bf16.mxu0 %v8068_v46  ;;  %3916 = vmatprep.subr.bf16.mxu1 %v8069_v11 }
 0x23c   :  { %3854 = vmatpush1.bf16.msra.mxu0 %v8070_v2  ;;  %3918 = vmatpush1.bf16.msra.mxu1 %v8071_v60 }
 0x23d   :  { %3856 = vmatprep.subr.bf16.mxu0 %v8072_v25  ;;  %3920 = vmatprep.subr.bf16.mxu1 %v8073_v20 }
 0x240   :  { %3858 = vmatpush1.bf16.msra.mxu0 %v8074_v55  ;;  %3922 = vmatpush1.bf16.msra.mxu1 %v8075_v54 }
 0x241   :  { %3860 = vmatprep.subr.bf16.mxu0 %v6351_v7  ;;  %3924 = vmatprep.subr.bf16.mxu1 %v6353_v38 }
 0x244   :  { %3862 = vmatpush1.bf16.msra.mxu0 %v6357_v18  ;;  %3926 = vmatpush1.bf16.msra.mxu1 %v6359_v62 }
 0x245   :  { %3864 = vmatprep.subr.bf16.mxu0 %v6363_v35  ;;  %3928 = vmatprep.subr.bf16.mxu1 %v6365_v26 }
 0x248   :  { %3866 = vmatpush1.bf16.msra.mxu0 %v6369_v53  ;;  %3930 = vmatpush1.bf16.msra.mxu1 %v6371_v21 }
 0x249   :  { %3868 = vmatprep.subr.bf16.mxu0 %v6375_v8  ;;  %3932 = vmatprep.subr.bf16.mxu1 %v6377_v59 }
 0x24c   :  { %3870 = vmatpush1.bf16.msra.mxu0 %v6381_v30  ;;  %3934 = vmatpush1.bf16.msra.mxu1 %v6383_v29 }
 0x24d   :  { %3936 = vmatprep.subr.bf16.mxu0 %v5912_v5  ;;  %4000 = vmatprep.subr.bf16.mxu1 %v5914_v9 }
 0x24f   :  { %1123 = vmatmul.mubr.f32.vlgmr.msra.gmra.mrb[6].mxu0 %v6492_v1  ;;  %1194 = vmatmul.mubr.f32.vlgmr.msra.gmra.mrb[6].mxu1 %v6492_v1  ;;  %v8076_v1 = vld [vmem:[#allocation45_spill] sm:$0xff] }
 0x250   :  { %3938 = vmatpush1.bf16.msra.mxu0 %v5920_v14  ;;  %4002 = vmatpush1.bf16.msra.mxu1 %v5922_v15 }
 0x251   :  { %3940 = vmatprep.subr.bf16.mxu0 %v5925_v19  ;;  %4004 = vmatprep.subr.bf16.mxu1 %v5929_v23 }
 0x254   :  { %3942 = vmatpush1.bf16.msra.mxu0 %v5931_v24  ;;  %4006 = vmatpush1.bf16.msra.mxu1 %v5934_v28 }
 0x255   :  { %3944 = vmatprep.subr.bf16.mxu0 %v5940_v33  ;;  %4008 = vmatprep.subr.bf16.mxu1 %v5942_v34 }
 0x258   :  { %3946 = vmatpush1.bf16.msra.mxu0 %v5946_v42  ;;  %4010 = vmatpush1.bf16.msra.mxu1 %v5948_v43 }
 0x259   :  { %3948 = vmatprep.subr.bf16.mxu0 %v5952_v47  ;;  %4012 = vmatprep.subr.bf16.mxu1 %v5954_v48 }
 0x25c   :  { %3950 = vmatpush1.bf16.msra.mxu0 %v5960_v57  ;;  %4014 = vmatpush1.bf16.msra.mxu1 %v5962_v58  ;;  %v75_v57 = vpop.permute.xlu1 %74 }
 0x25d   :  { %3952 = vmatprep.subr.bf16.mxu0 %v5967_v63  ;;  %4016 = vmatprep.subr.bf16.mxu1 %v5969_v0  ;;  %v8077_v63 = vld [vmem:[#allocation46_spill] sm:$0xff]  ;;  %v8078_v0 = vld [vmem:[#allocation47_spill] sm:$0xff] }
 0x260   :  { %3954 = vmatpush1.bf16.msra.mxu0 %v5973_v10  ;;  %4018 = vmatpush1.bf16.msra.mxu1 %v5983_v13  ;;  %v8079_v10 = vld [vmem:[#allocation48_spill] sm:$0xff]  ;;  %v8080_v13 = vld [vmem:[#allocation49_spill] sm:$0xff] }
 0x261   :  { %3956 = vmatprep.subr.bf16.mxu0 %v5990_v17  ;;  %4020 = vmatprep.subr.bf16.mxu1 %v5997_v22  ;;  %v8081_v17 = vld [vmem:[#allocation50_spill] sm:$0xff]  ;;  %v8082_v22 = vld [vmem:[#allocation51_spill] sm:$0xff] }
 0x264   :  { %3958 = vmatpush1.bf16.msra.mxu0 %v6022_v41  ;;  %4022 = vmatpush1.bf16.msra.mxu1 %v6024_v44  ;;  %v8083_v41 = vld [vmem:[#allocation52_spill] sm:$0xff]  ;;  %v8084_v44 = vld [vmem:[#allocation53_spill] sm:$0xff] }
 0x265   :  { %3960 = vmatprep.subr.bf16.mxu0 %v6028_v49  ;;  %4024 = vmatprep.subr.bf16.mxu1 %v6030_v50  ;;  %v8085_v49 = vld [vmem:[#allocation54_spill] sm:$0xff]  ;;  %v8086_v50 = vld [vmem:[#allocation55_spill] sm:$0xff] }
 0x268   :  { %3962 = vmatpush1.bf16.msra.mxu0 %v8076_v1  ;;  %4026 = vmatpush1.bf16.msra.mxu1 %v8077_v63  ;;  %v8087_v1 = vld [vmem:[#allocation56_spill] sm:$0xff]  ;;  %v8088_v63 = vld [vmem:[#allocation57_spill] sm:$0xff] }
 0x269   :  { %3964 = vmatprep.subr.bf16.mxu0 %v8078_v0  ;;  %4028 = vmatprep.subr.bf16.mxu1 %v8079_v10  ;;  %v8089_v0 = vld [vmem:[#allocation58_spill] sm:$0xff]  ;;  %v8090_v10 = vld [vmem:[#allocation59_spill] sm:$0xff] }
 0x26c   :  { %3966 = vmatpush1.bf16.msra.mxu0 %v8080_v13  ;;  %4030 = vmatpush1.bf16.msra.mxu1 %v8081_v17  ;;  %v8091_v13 = vld [vmem:[#allocation60_spill] sm:$0xff]  ;;  %v8092_v17 = vld [vmem:[#allocation61_spill] sm:$0xff] }
 0x26d   :  { %3968 = vmatprep.subr.bf16.mxu0 %v8082_v22  ;;  %4032 = vmatprep.subr.bf16.mxu1 %v8083_v41  ;;  %v8093_v22 = vld [vmem:[#allocation62_spill] sm:$0xff]  ;;  %v8094_v41 = vld [vmem:[#allocation63_spill] sm:$0xff] }
 0x270   :  { %3970 = vmatpush1.bf16.msra.mxu0 %v8084_v44  ;;  %4034 = vmatpush1.bf16.msra.mxu1 %v8085_v49  ;;  %v8095_v44 = vld [vmem:[#allocation64_spill] sm:$0xff]  ;;  %v8096_v49 = vld [vmem:[#allocation65_spill] sm:$0xff] }
 0x271   :  { %3972 = vmatprep.subr.bf16.mxu0 %v8086_v50  ;;  %4036 = vmatprep.subr.bf16.mxu1 %v8087_v1  ;;  %v8097_v50 = vld [vmem:[#allocation66_spill] sm:$0xff]  ;;  %v8098_v1 = vld [vmem:[#allocation67_spill] sm:$0xff] }
 0x274   :  { %3974 = vmatpush1.bf16.msra.mxu0 %v8088_v63  ;;  %4038 = vmatpush1.bf16.msra.mxu1 %v8089_v0  ;;  %v8099_v63 = vld [vmem:[#allocation68_spill] sm:$0xff]  ;;  %v8100_v0 = vld [vmem:[#allocation69_spill] sm:$0xff] }
 0x275   :  { %3976 = vmatprep.subr.bf16.mxu0 %v8090_v10  ;;  %4040 = vmatprep.subr.bf16.mxu1 %v8091_v13  ;;  %v8101_v10 = vld [vmem:[#allocation70_spill] sm:$0xff]  ;;  %v8102_v13 = vld [vmem:[#allocation71_spill] sm:$0xff] }
 0x278   :  { %3978 = vmatpush1.bf16.msra.mxu0 %v8092_v17  ;;  %4042 = vmatpush1.bf16.msra.mxu1 %v8093_v22  ;;  %v8103_v17 = vld [vmem:[#allocation72_spill] sm:$0xff]  ;;  %v8104_v22 = vld [vmem:[#allocation73_spill] sm:$0xff] }
 0x279   :  { %3980 = vmatprep.subr.bf16.mxu0 %v8094_v41  ;;  %4044 = vmatprep.subr.bf16.mxu1 %v8095_v44  ;;  %v8105_v41 = vld [vmem:[#allocation74_spill] sm:$0xff]  ;;  %v8106_v44 = vld [vmem:[#allocation75_spill] sm:$0xff] }
 0x27c   :  { %3982 = vmatpush1.bf16.msra.mxu0 %v8096_v49  ;;  %4046 = vmatpush1.bf16.msra.mxu1 %v8097_v50  ;;  %v8107_v49 = vld [vmem:[#allocation76_spill] sm:$0xff]  ;;  %v8108_v50 = vld [vmem:[#allocation77_spill] sm:$0xff] }
 0x27d   :  { %3984 = vmatprep.subr.bf16.mxu0 %v8098_v1  ;;  %4048 = vmatprep.subr.bf16.mxu1 %v8099_v63  ;;  %v8109_v1 = vld [vmem:[#allocation78_spill] sm:$0xff]  ;;  %v8110_v63 = vld [vmem:[#allocation79_spill] sm:$0xff] }
 0x280   :  { %3986 = vmatpush1.bf16.msra.mxu0 %v8100_v0  ;;  %4050 = vmatpush1.bf16.msra.mxu1 %v8101_v10  ;;  %v8111_v0 = vld [vmem:[#allocation80_spill] sm:$0xff]  ;;  %v8112_v10 = vld [vmem:[#allocation81_spill] sm:$0xff] }
 0x281   :  { %3988 = vmatprep.subr.bf16.mxu0 %v8102_v13  ;;  %4052 = vmatprep.subr.bf16.mxu1 %v8103_v17  ;;  %v8113_v13 = vld [vmem:[#allocation82_spill] sm:$0xff]  ;;  %v8114_v17 = vld [vmem:[#allocation83_spill] sm:$0xff] }
 0x284   :  { %3990 = vmatpush1.bf16.msra.mxu0 %v8104_v22  ;;  %4054 = vmatpush1.bf16.msra.mxu1 %v8105_v41  ;;  %v8115_v22 = vld [vmem:[#allocation84_spill] sm:$0xff] }
 0x285   :  { %3992 = vmatprep.subr.bf16.mxu0 %v8106_v44  ;;  %4056 = vmatprep.subr.bf16.mxu1 %v8107_v49 }
 0x288   :  { %3994 = vmatpush1.bf16.msra.mxu0 %v8108_v50  ;;  %4058 = vmatpush1.bf16.msra.mxu1 %v8109_v1  ;;  %v8116_v50 = vld [vmem:[#allocation85_spill] sm:$0xff]  ;;  %v8117_v1 = vld [vmem:[#allocation86_spill] sm:$0xff] }
 0x289   :  { %3996 = vmatprep.subr.bf16.mxu0 %v8110_v63  ;;  %4060 = vmatprep.subr.bf16.mxu1 %v8111_v0  ;;  %v155_v48 = vmul.f32 %v8116_v50, %v75_v57  ;;  %v157_v47 = vmul.f32 %v8117_v1, %v75_v57  ;;  %v8118_v63 = vld [vmem:[#allocation32_spill] sm:$0xff]  ;;  %v8119_v0 = vld [vmem:[#allocation35_spill] sm:$0xff] }
 0x28a   :  { %v156_v43 = vmul.f32 %v8118_v63, %v75_v57  ;;  %v158_v42 = vmul.f32 %v8119_v0, %v75_v57 }
 0x28c   :  { %3998 = vmatpush1.bf16.msra.mxu0 %v8112_v10  ;;  %4062 = vmatpush1.bf16.msra.mxu1 %v8113_v13  ;;  %v8120_v10 = vld [vmem:[#allocation87_spill] sm:$0xff]  ;;  %v8121_v13 = vld [vmem:[#allocation88_spill] sm:$0xff] }
 0x28d   :  { %4064 = vmatprep.subr.bf16.mxu0 %v8114_v17  ;;  %4128 = vmatprep.subr.bf16.mxu1 %v8115_v22  ;;  %v256_v34 = vadd.f32 %v8120_v10, %v155_v48  ;;  %v258_v33 = vadd.f32 %v8121_v13, %v157_v47  ;;  %v8122_v17 = vld [vmem:[#allocation34_spill] sm:$0xff]  ;;  %v8123_v22 = vld [vmem:[#allocation36_spill] sm:$0xff] }
 0x28e   :  { %v257_v28 = vadd.f32 %v8122_v17, %v156_v43  ;;  %v259_v24 = vadd.f32 %v8123_v22, %v158_v42  ;;  %v8124_v43 = vld [vmem:[#allocation89_spill] sm:$0xff]  ;;  %v8125_v42 = vld [vmem:[#allocation91_spill] sm:$0xff] }
 0x28f   :  { %v159_v17 = vmul.f32 %v8124_v43, %v75_v57 }
 0x2e2   :  { %v982_v41 = vpop.f32.mrb[4].mxu0  ;;  %v1053_v44 = vpop.f32.mrb[4].mxu1 }
 0x2e3   :  { %v984_v58 = vpop.f32.mrb[5].mxu0  ;;  %v1055_v49 = vpop.f32.mrb[5].mxu1  ;;  %v983_v23 = vadd.f32 %v982_v41, %v256_v34  ;;  %v1054_v19 = vadd.f32 %v1053_v44, %v258_v33  ;;  %v161_v34 = vmul.f32 %v8125_v42, %v75_v57 }
 0x2e4   :  { %v985_v15 = vadd.f32 %v984_v58, %v257_v28  ;;  %v1056_v14 = vadd.f32 %v1055_v49, %v259_v24  ;;  %v8126_v28 = vld [vmem:[#allocation37_spill] sm:$0xff] }
 0x2e5   :  { %v3331_v9 = vmul.f32 -1.442695, %v983_v23  ;;  %v3333_v50 = vmul.f32 -1.442695, %v1054_v19  ;;  %v160_v24 = vmul.f32 %v8126_v28, %v75_v57  ;;  %v162_v19 = vmul.f32 %v8020_v39, %v75_v57 }
 0x2e6   :  { %v3332_v5 = vmul.f32 -1.442695, %v985_v15  ;;  %v3334_v1 = vmul.f32 -1.442695, %v1056_v14 }
 0x2e7   :  { %5556 = vpow2.f32 %v3331_v9  ;;  %v262_v9 = vadd.f32 %v8022_v37, %v161_v34  ;;  %v263_v44 = vadd.f32 %v8024_v51, %v162_v19 }
 0x2e8   :  { %5558 = vpow2.f32 %v3333_v50 }
 0x2e9   :  { %5560 = vpow2.f32 %v3332_v5  ;;  %v260_v5 = vadd.f32 %v8021_v36, %v159_v17 }
 0x2ea   :  { %5562 = vpow2.f32 %v3334_v1 }
 0x2f1   :  { %v5557_v0 = vpop.eup %5556 }
 0x2f2   :  { %v5559_v48 = vpop.eup %5558  ;;  %v1218_v13 = vadd.f32 1.0, %v5557_v0  ;;  %v8127_v0 = vld [vmem:[#allocation38_spill] sm:$0xff] }
 0x2f3   :  { %v5561_v10 = vpop.eup %5560  ;;  %v1220_v33 = vadd.f32 1.0, %v5559_v48  ;;  %v261_v41 = vadd.f32 %v8127_v0, %v160_v24 }
 0x2f4   :  { %v5563_v47 = vpop.eup %5562  ;;  %v1219_v15 = vadd.f32 1.0, %v5561_v10  ;;  %5564 = vrcp.f32 %v1218_v13 }
 0x2f5   :  { %v1221_v14 = vadd.f32 1.0, %v5563_v47  ;;  %5566 = vrcp.f32 %v1220_v33 }
 0x2f6   :  { %5568 = vrcp.f32 %v1219_v15 }
 0x2f7   :  { %5570 = vrcp.f32 %v1221_v14 }
 0x2fe   :  { %v5565_v47 = vpop.eup %5564 }
 0x2ff   :  { %v5567_v34 = vpop.eup %5566 }
 0x300   :  { %v5569_v33 = vpop.eup %5568  ;;  %v1238_v15 = vmul.f32 %v5567_v34, %v6486_v61  ;;  %v8132_v34 = vld [vmem:[#allocation106_spill] sm:$0xff] }
 0x301   :  { %v5571_v24 = vpop.eup %5570 }
 0x302   :  { %v1239_v14 = vmul.f32 %v5571_v24, %v6488_v3  ;;  %v8134_v24 = vld [vmem:[#allocation108_spill] sm:$0xff] }
 0x322   :  { %v1124_v23 = vpop.f32.mrb[6].mxu0  ;;  %v1195_v58 = vpop.f32.mrb[6].mxu1 }
 0x323   :  { %v1125_v49 = vadd.f32 %v1124_v23, %v260_v5  ;;  %v1196_v50 = vadd.f32 %v1195_v58, %v262_v9  ;;  %v1126_v1 = vpop.f32.mrb[7].mxu0  ;;  %v1197_v48 = vpop.f32.mrb[7].mxu1 }
 0x324   :  { %v1127_v57 = vadd.f32 %v1126_v1, %v261_v41  ;;  %v1198_v10 = vadd.f32 %v1197_v48, %v263_v44 }
 0x325   :  { %v3335_v13 = vmul.f32 -1.442695, %v1125_v49  ;;  %5572 = vtanh.f32 %v1196_v50 }
 0x326   :  { %v3336_v17 = vmul.f32 -1.442695, %v1127_v57  ;;  %5574 = vtanh.f32 %v1198_v10  ;;  %v8128_v10 = vld [vmem:[#allocation102_spill] sm:$0xff] }
 0x327   :  { %5576 = vpow2.f32 %v3335_v13  ;;  %v8129_v13 = vld [vmem:[#allocation103_spill] sm:$0xff] }
 0x328   :  { %5578 = vpow2.f32 %v3336_v17  ;;  %v8130_v17 = vld [vmem:[#allocation104_spill] sm:$0xff] }
 0x32f   :  { %v5573_v0 = vpop.eup %5572 }
 0x330   :  { %v5575_v19 = vpop.eup %5574  ;;  %v1240_v5 = vmul.f32 %v5573_v0, %v5565_v47  ;;  %v8131_v47 = vld [vmem:[#allocation105_spill] sm:$0xff] }
 0x331   :  { %v5577_v9 = vpop.eup %5576  ;;  %v1241_v23 = vmul.f32 %v5575_v19, %v5569_v33  ;;  %v8133_v33 = vld [vmem:[#allocation107_spill] sm:$0xff]  ;;  %v8135_v19 = vld [vmem:[#allocation109_spill] sm:$0xff] }
 0x332   :  { %v5579_v58 = vpop.eup %5578  ;;  %v1222_v41 = vadd.f32 1.0, %v5577_v9  ;;  %v6644_v44 = vadd.f32 %v1240_v5, %v1238_v15  ;;  %v8136_v15 = vld [vmem:[#allocation110_spill] sm:$0xff]  ;;  %v8137_v5 = vld [vmem:[#allocation111_spill] sm:$0xff]  ;;  %v8138_v9 = vld [vmem:[#allocation112_spill] sm:$0xff] }
 0x333   :  { %v1223_v49 = vadd.f32 1.0, %v5579_v58  ;;  %v6646_v50 = vadd.f32 %v1241_v23, %v1239_v14  ;;  %v8139_v14 = vld [vmem:[#allocation113_spill] sm:$0xff]  ;;  %v8140_v23 = vld [vmem:[#allocation114_spill] sm:$0xff]  ;;  %v8141_v58 = vld [vmem:[#allocation115_spill] sm:$0xff] }
 0x334   :  { %5580 = vrcp.f32 %v1222_v41  ;;  %v8142_v41 = vld [vmem:[#allocation116_spill] sm:$0xff] }
 0x335   :  { %5582 = vtanh.f32 %v6644_v44 }
 0x336   :  { %5584 = vrcp.f32 %v1223_v49  ;;  %v8143_v49 = vld [vmem:[#allocation117_spill] sm:$0xff] }
 0x337   :  { %5586 = vtanh.f32 %v6646_v50 }
 0x33e   :  { %v5581_v1 = vpop.eup %5580 }
 0x33f   :  { %v5583_v61 = vpop.eup %5582 }
 0x340   :  { %v5585_v0 = vpop.eup %5584  ;;  %v6650_v3 = vmul.f32 %v5583_v61, %v5581_v1  ;;  %v8144_v1 = vld [vmem:[#allocation118_spill] sm:$0xff]  ;;  %v8145_v61 = vld [vmem:[#allocation119_spill] sm:$0xff] }
 0x341   :  { %v5587_v48 = vpop.eup %5586 }
 0x342   :  { %v1247_v57 = vmul.f32 %v5587_v48, %v5585_v0  ;;  %v8146_v0 = vld [vmem:[#allocation120_spill] sm:$0xff]  ;;  %v8147_v48 = vld [vmem:[#allocation121_spill] sm:$0xff] }
 0x344   :  { %1312 = vmatprep.mubr.f32.mxu0 %v1247_v57  ;;  %1383 = vmatprep.mubr.f32.mxu1 %v1247_v57 }
 0x345   :  { %1313 = vmatmul.mubr.f32.vlgmr.msra.gmra.mrb[8].mxu0 %v6650_v3  ;;  %1384 = vmatmul.mubr.f32.vlgmr.msra.gmra.mrb[8].mxu1 %v6650_v3 }
 0x346   :  { %4066 = vmatpush1.bf16.msra.mxu0 %v8026_v52  ;;  %4130 = vmatpush1.bf16.msra.mxu1 %v8027_v6 }
 0x347   :  { %1454 = vmatprep.mubr.f32.mxu0 %v1247_v57  ;;  %1525 = vmatprep.mubr.f32.mxu1 %v1247_v57  ;;  %v8148_v57 = vld [vmem:[#allocation122_spill] sm:$0xff] }
 0x348   :  { %4068 = vmatprep.subr.bf16.mxu0 %v8028_v45  ;;  %4132 = vmatprep.subr.bf16.mxu1 %v8029_v16 }
 0x34a   :  { %4070 = vmatpush1.bf16.msra.mxu0 %v8030_v12  ;;  %4134 = vmatpush1.bf16.msra.mxu1 %v8031_v27 }
 0x34b   :  { %4072 = vmatprep.subr.bf16.mxu0 %v8032_v40  ;;  %4136 = vmatprep.subr.bf16.mxu1 %v8033_v31 }
 0x34e   :  { %4074 = vmatpush1.bf16.msra.mxu0 %v8128_v10  ;;  %4138 = vmatpush1.bf16.msra.mxu1 %v8129_v13 }
 0x34f   :  { %4076 = vmatprep.subr.bf16.mxu0 %v8130_v17  ;;  %4140 = vmatprep.subr.bf16.mxu1 %v8131_v47 }
 0x352   :  { %4078 = vmatpush1.bf16.msra.mxu0 %v8132_v34  ;;  %4142 = vmatpush1.bf16.msra.mxu1 %v8133_v33 }
 0x353   :  { %4080 = vmatprep.subr.bf16.mxu0 %v8134_v24  ;;  %4144 = vmatprep.subr.bf16.mxu1 %v8135_v19 }
 0x356   :  { %4082 = vmatpush1.bf16.msra.mxu0 %v8136_v15  ;;  %4146 = vmatpush1.bf16.msra.mxu1 %v8137_v5 }
 0x357   :  { %4084 = vmatprep.subr.bf16.mxu0 %v8138_v9  ;;  %4148 = vmatprep.subr.bf16.mxu1 %v8139_v14  ;;  %v8149_v9 = vld [vmem:[#allocation123_spill] sm:$0xff]  ;;  %v8150_v14 = vld [vmem:[#allocation124_spill] sm:$0xff] }
 0x35a   :  { %4086 = vmatpush1.bf16.msra.mxu0 %v8140_v23  ;;  %4150 = vmatpush1.bf16.msra.mxu1 %v8141_v58  ;;  %v8151_v23 = vld [vmem:[#allocation125_spill] sm:$0xff]  ;;  %v8152_v58 = vld [vmem:[#allocation126_spill] sm:$0xff] }
 0x35b   :  { %4088 = vmatprep.subr.bf16.mxu0 %v8142_v41  ;;  %4152 = vmatprep.subr.bf16.mxu1 %v8143_v49  ;;  %v8153_v41 = vld [vmem:[#allocation127_spill] sm:$0xff]  ;;  %v8154_v49 = vld [vmem:[#allocation128_spill] sm:$0xff] }
 0x35e   :  { %4090 = vmatpush1.bf16.msra.mxu0 %v8144_v1  ;;  %4154 = vmatpush1.bf16.msra.mxu1 %v8145_v61  ;;  %v8155_v1 = vld [vmem:[#allocation129_spill] sm:$0xff]  ;;  %v8156_v61 = vld [vmem:[#allocation130_spill] sm:$0xff] }
 0x35f   :  { %4092 = vmatprep.subr.bf16.mxu0 %v8146_v0  ;;  %4156 = vmatprep.subr.bf16.mxu1 %v8147_v48  ;;  %v8157_v0 = vld [vmem:[#allocation131_spill] sm:$0xff]  ;;  %v8158_v48 = vld [vmem:[#allocation132_spill] sm:$0xff] }
 0x362   :  { %4094 = vmatpush1.bf16.msra.mxu0 %v8148_v57  ;;  %4158 = vmatpush1.bf16.msra.mxu1 %v8149_v9 }
 0x363   :  { %4096 = vmatprep.subr.bf16.mxu0 %v8150_v14  ;;  %4160 = vmatprep.subr.bf16.mxu1 %v8151_v23 }
 0x366   :  { %4098 = vmatpush1.bf16.msra.mxu0 %v8152_v58  ;;  %4162 = vmatpush1.bf16.msra.mxu1 %v8153_v41 }
 0x367   :  { %4100 = vmatprep.subr.bf16.mxu0 %v8154_v49  ;;  %4164 = vmatprep.subr.bf16.mxu1 %v8155_v1 }
 0x36a   :  { %4102 = vmatpush1.bf16.msra.mxu0 %v8156_v61  ;;  %4166 = vmatpush1.bf16.msra.mxu1 %v8157_v0 }
 0x36b   :  { %4104 = vmatprep.subr.bf16.mxu0 %v8158_v48  ;;  %4168 = vmatprep.subr.bf16.mxu1 %v8065_v32 }
 0x36e   :  { %4106 = vmatpush1.bf16.msra.mxu0 %v8066_v56  ;;  %4170 = vmatpush1.bf16.msra.mxu1 %v8067_v4 }
 0x36f   :  { %4108 = vmatprep.subr.bf16.mxu0 %v8068_v46  ;;  %4172 = vmatprep.subr.bf16.mxu1 %v8069_v11 }
 0x372   :  { %4110 = vmatpush1.bf16.msra.mxu0 %v8070_v2  ;;  %4174 = vmatpush1.bf16.msra.mxu1 %v8071_v60  ;;  %v8230_v2 = vld [vmem:[#allocation34_spill] sm:$0xff] }
 0x373   :  { %4112 = vmatprep.subr.bf16.mxu0 %v8072_v25  ;;  %4176 = vmatprep.subr.bf16.mxu1 %v8073_v20 }
 0x376   :  { %4114 = vmatpush1.bf16.msra.mxu0 %v8074_v55  ;;  %4178 = vmatpush1.bf16.msra.mxu1 %v8075_v54 }
 0x377   :  { %4116 = vmatprep.subr.bf16.mxu0 %v6351_v7  ;;  %4180 = vmatprep.subr.bf16.mxu1 %v6353_v38  ;;  %v8159_v38 = vld [vmem:[#allocation11_spill] sm:$0xff]  ;;  %v80_v7 = vpop.permute.xlu1 %79 }
 0x37a   :  { %4118 = vmatpush1.bf16.msra.mxu0 %v6357_v18  ;;  %4182 = vmatpush1.bf16.msra.mxu1 %v6359_v62  ;;  %v8160_v18 = vld [vmem:[#allocation12_spill] sm:$0xff] }
 0x37b   :  { %4120 = vmatprep.subr.bf16.mxu0 %v6363_v35  ;;  %4184 = vmatprep.subr.bf16.mxu1 %v6365_v26  ;;  %v8161_v26 = vld [vmem:[#allocation13_spill] sm:$0xff]  ;;  %v8170_v35 = vld [vmem:[#allocation22_spill] sm:$0xff] }
 0x37e   :  { %4122 = vmatpush1.bf16.msra.mxu0 %v6369_v53  ;;  %4186 = vmatpush1.bf16.msra.mxu1 %v6371_v21  ;;  %v8162_v53 = vld [vmem:[#allocation14_spill] sm:$0xff]  ;;  %v8163_v21 = vld [vmem:[#allocation15_spill] sm:$0xff] }
 0x37f   :  { %4124 = vmatprep.subr.bf16.mxu0 %v6375_v8  ;;  %4188 = vmatprep.subr.bf16.mxu1 %v6377_v59  ;;  %v8164_v8 = vld [vmem:[#allocation16_spill] sm:$0xff]  ;;  %v8165_v59 = vld [vmem:[#allocation17_spill] sm:$0xff] }
 0x382   :  { %4126 = vmatpush1.bf16.msra.mxu0 %v6381_v30  ;;  %4190 = vmatpush1.bf16.msra.mxu1 %v6383_v29  ;;  %v8166_v30 = vld [vmem:[#allocation18_spill] sm:$0xff]  ;;  %v8167_v29 = vld [vmem:[#allocation19_spill] sm:$0xff] }
 0x383   :  { %4192 = vmatprep.subr.bf16.mxu0 %v8159_v38  ;;  %4256 = vmatprep.subr.bf16.mxu1 %v8160_v18  ;;  %v8168_v38 = vld [vmem:[#allocation20_spill] sm:$0xff]  ;;  %v8169_v18 = vld [vmem:[#allocation21_spill] sm:$0xff] }
 0x385   :  { %1455 = vmatmul.mubr.f32.vlgmr.msra.gmra.mrb[10].mxu0 %v6650_v3  ;;  %1526 = vmatmul.mubr.f32.vlgmr.msra.gmra.mrb[10].mxu1 %v6650_v3  ;;  %v8171_v3 = vld [vmem:[#allocation23_spill] sm:$0xff] }
 0x386   :  { %4194 = vmatpush1.bf16.msra.mxu0 %v8161_v26  ;;  %4258 = vmatpush1.bf16.msra.mxu1 %v8162_v53  ;;  %v8172_v26 = vld [vmem:[#allocation24_spill] sm:$0xff]  ;;  %v8173_v53 = vld [vmem:[#allocation25_spill] sm:$0xff] }
 0x387   :  { %4196 = vmatprep.subr.bf16.mxu0 %v8163_v21  ;;  %4260 = vmatprep.subr.bf16.mxu1 %v8164_v8  ;;  %v8174_v21 = vld [vmem:[#allocation26_spill] sm:$0xff]  ;;  %v8175_v8 = vld [vmem:[#allocation27_spill] sm:$0xff] }
 0x38a   :  { %4198 = vmatpush1.bf16.msra.mxu0 %v8165_v59  ;;  %4262 = vmatpush1.bf16.msra.mxu1 %v8166_v30  ;;  %v8176_v59 = vld [vmem:[#allocation28_spill] sm:$0xff]  ;;  %v8177_v30 = vld [vmem:[#allocation29_spill] sm:$0xff] }
 0x38b   :  { %4200 = vmatprep.subr.bf16.mxu0 %v8167_v29  ;;  %4264 = vmatprep.subr.bf16.mxu1 %v8168_v38  ;;  %v8178_v29 = vld [vmem:[#allocation30_spill] sm:$0xff]  ;;  %v8179_v38 = vld [vmem:[#allocation31_spill] sm:$0xff] }
 0x38e   :  { %4202 = vmatpush1.bf16.msra.mxu0 %v8169_v18  ;;  %4266 = vmatpush1.bf16.msra.mxu1 %v8170_v35  ;;  %v8180_v18 = vld [vmem:[#allocation33_spill] sm:$0xff] }
 0x38f   :  { %4204 = vmatprep.subr.bf16.mxu0 %v8171_v3  ;;  %4268 = vmatprep.subr.bf16.mxu1 %v8172_v26  ;;  %v8181_v35 = vld [vmem:[#allocation41_spill] sm:$0xff]  ;;  %v8182_v3 = vld [vmem:[#allocation42_spill] sm:$0xff]  ;;  %v8183_v26 = vld [vmem:[#allocation43_spill] sm:$0xff] }
 0x392   :  { %4206 = vmatpush1.bf16.msra.mxu0 %v8173_v53  ;;  %4270 = vmatpush1.bf16.msra.mxu1 %v8174_v21  ;;  %v8184_v53 = vld [vmem:[#allocation44_spill] sm:$0xff]  ;;  %v8185_v21 = vld [vmem:[#allocation45_spill] sm:$0xff] }
 0x393   :  { %4208 = vmatprep.subr.bf16.mxu0 %v8175_v8  ;;  %4272 = vmatprep.subr.bf16.mxu1 %v8176_v59  ;;  %v8186_v8 = vld [vmem:[#allocation46_spill] sm:$0xff]  ;;  %v8187_v59 = vld [vmem:[#allocation47_spill] sm:$0xff] }
 0x396   :  { %4210 = vmatpush1.bf16.msra.mxu0 %v8177_v30  ;;  %4274 = vmatpush1.bf16.msra.mxu1 %v8178_v29  ;;  %v8188_v30 = vld [vmem:[#allocation48_spill] sm:$0xff]  ;;  %v8189_v29 = vld [vmem:[#allocation49_spill] sm:$0xff] }
 0x397   :  { %4212 = vmatprep.subr.bf16.mxu0 %v8179_v38  ;;  %4276 = vmatprep.subr.bf16.mxu1 %v8180_v18  ;;  %v8190_v38 = vld [vmem:[#allocation50_spill] sm:$0xff]  ;;  %v8191_v18 = vld [vmem:[#allocation51_spill] sm:$0xff] }
 0x39a   :  { %4214 = vmatpush1.bf16.msra.mxu0 %v8181_v35  ;;  %4278 = vmatpush1.bf16.msra.mxu1 %v8182_v3  ;;  %v8192_v35 = vld [vmem:[#allocation52_spill] sm:$0xff]  ;;  %v8193_v3 = vld [vmem:[#allocation53_spill] sm:$0xff] }
 0x39b   :  { %4216 = vmatprep.subr.bf16.mxu0 %v8183_v26  ;;  %4280 = vmatprep.subr.bf16.mxu1 %v8184_v53  ;;  %v8194_v26 = vld [vmem:[#allocation54_spill] sm:$0xff]  ;;  %v8195_v53 = vld [vmem:[#allocation55_spill] sm:$0xff] }
 0x39e   :  { %4218 = vmatpush1.bf16.msra.mxu0 %v8185_v21  ;;  %4282 = vmatpush1.bf16.msra.mxu1 %v8186_v8  ;;  %v8196_v21 = vld [vmem:[#allocation56_spill] sm:$0xff]  ;;  %v8197_v8 = vld [vmem:[#allocation57_spill] sm:$0xff] }
 0x39f   :  { %4220 = vmatprep.subr.bf16.mxu0 %v8187_v59  ;;  %4284 = vmatprep.subr.bf16.mxu1 %v8188_v30  ;;  %v8198_v59 = vld [vmem:[#allocation58_spill] sm:$0xff]  ;;  %v8199_v30 = vld [vmem:[#allocation59_spill] sm:$0xff] }
 0x3a2   :  { %4222 = vmatpush1.bf16.msra.mxu0 %v8189_v29  ;;  %4286 = vmatpush1.bf16.msra.mxu1 %v8190_v38  ;;  %v8200_v29 = vld [vmem:[#allocation60_spill] sm:$0xff]  ;;  %v8201_v38 = vld [vmem:[#allocation61_spill] sm:$0xff] }
 0x3a3   :  { %4224 = vmatprep.subr.bf16.mxu0 %v8191_v18  ;;  %4288 = vmatprep.subr.bf16.mxu1 %v8192_v35  ;;  %v8202_v18 = vld [vmem:[#allocation62_spill] sm:$0xff]  ;;  %v8203_v35 = vld [vmem:[#allocation63_spill] sm:$0xff] }
 0x3a6   :  { %4226 = vmatpush1.bf16.msra.mxu0 %v8193_v3  ;;  %4290 = vmatpush1.bf16.msra.mxu1 %v8194_v26  ;;  %v8204_v3 = vld [vmem:[#allocation64_spill] sm:$0xff]  ;;  %v8205_v26 = vld [vmem:[#allocation65_spill] sm:$0xff] }
 0x3a7   :  { %4228 = vmatprep.subr.bf16.mxu0 %v8195_v53  ;;  %4292 = vmatprep.subr.bf16.mxu1 %v8196_v21  ;;  %v8206_v53 = vld [vmem:[#allocation66_spill] sm:$0xff]  ;;  %v8207_v21 = vld [vmem:[#allocation67_spill] sm:$0xff] }
 0x3aa   :  { %4230 = vmatpush1.bf16.msra.mxu0 %v8197_v8  ;;  %4294 = vmatpush1.bf16.msra.mxu1 %v8198_v59  ;;  %v8208_v8 = vld [vmem:[#allocation68_spill] sm:$0xff]  ;;  %v8209_v59 = vld [vmem:[#allocation69_spill] sm:$0xff] }
 0x3ab   :  { %4232 = vmatprep.subr.bf16.mxu0 %v8199_v30  ;;  %4296 = vmatprep.subr.bf16.mxu1 %v8200_v29  ;;  %v8210_v30 = vld [vmem:[#allocation70_spill] sm:$0xff]  ;;  %v8211_v29 = vld [vmem:[#allocation71_spill] sm:$0xff] }
 0x3ae   :  { %4234 = vmatpush1.bf16.msra.mxu0 %v8201_v38  ;;  %4298 = vmatpush1.bf16.msra.mxu1 %v8202_v18  ;;  %v8212_v38 = vld [vmem:[#allocation72_spill] sm:$0xff]  ;;  %v8213_v18 = vld [vmem:[#allocation73_spill] sm:$0xff] }
 0x3af   :  { %4236 = vmatprep.subr.bf16.mxu0 %v8203_v35  ;;  %4300 = vmatprep.subr.bf16.mxu1 %v8204_v3  ;;  %v8214_v35 = vld [vmem:[#allocation74_spill] sm:$0xff]  ;;  %v8215_v3 = vld [vmem:[#allocation75_spill] sm:$0xff] }
 0x3b2   :  { %4238 = vmatpush1.bf16.msra.mxu0 %v8205_v26  ;;  %4302 = vmatpush1.bf16.msra.mxu1 %v8206_v53  ;;  %v8216_v26 = vld [vmem:[#allocation76_spill] sm:$0xff]  ;;  %v8217_v53 = vld [vmem:[#allocation77_spill] sm:$0xff] }
 0x3b3   :  { %4240 = vmatprep.subr.bf16.mxu0 %v8207_v21  ;;  %4304 = vmatprep.subr.bf16.mxu1 %v8208_v8  ;;  %v8218_v21 = vld [vmem:[#allocation78_spill] sm:$0xff]  ;;  %v8219_v8 = vld [vmem:[#allocation79_spill] sm:$0xff] }
 0x3b6   :  { %4242 = vmatpush1.bf16.msra.mxu0 %v8209_v59  ;;  %4306 = vmatpush1.bf16.msra.mxu1 %v8210_v30  ;;  %v8220_v59 = vld [vmem:[#allocation80_spill] sm:$0xff]  ;;  %v8221_v30 = vld [vmem:[#allocation81_spill] sm:$0xff] }
 0x3b7   :  { %4244 = vmatprep.subr.bf16.mxu0 %v8211_v29  ;;  %4308 = vmatprep.subr.bf16.mxu1 %v8212_v38  ;;  %v8222_v29 = vld [vmem:[#allocation82_spill] sm:$0xff]  ;;  %v8223_v38 = vld [vmem:[#allocation83_spill] sm:$0xff] }
 0x3ba   :  { %4246 = vmatpush1.bf16.msra.mxu0 %v8213_v18  ;;  %4310 = vmatpush1.bf16.msra.mxu1 %v8214_v35  ;;  %v8224_v18 = vld [vmem:[#allocation84_spill] sm:$0xff] }
 0x3bb   :  { %4248 = vmatprep.subr.bf16.mxu0 %v8215_v3  ;;  %4312 = vmatprep.subr.bf16.mxu1 %v8216_v26 }
 0x3be   :  { %4250 = vmatpush1.bf16.msra.mxu0 %v8217_v53  ;;  %4314 = vmatpush1.bf16.msra.mxu1 %v8218_v21  ;;  %v8225_v53 = vld [vmem:[#allocation85_spill] sm:$0xff]  ;;  %v8226_v21 = vld [vmem:[#allocation86_spill] sm:$0xff] }
 0x3bf   :  { %4252 = vmatprep.subr.bf16.mxu0 %v8219_v8  ;;  %4316 = vmatprep.subr.bf16.mxu1 %v8220_v59  ;;  %v163_v54 = vmul.f32 %v8225_v53, %v80_v7  ;;  %v165_v55 = vmul.f32 %v8226_v21, %v80_v7  ;;  %v164_v8 = vmul.f32 %v8118_v63, %v80_v7  ;;  %v8227_v59 = vld [vmem:[#allocation35_spill] sm:$0xff] }
 0x3c0   :  { %v166_v20 = vmul.f32 %v8227_v59, %v80_v7 }
 0x3c2   :  { %4254 = vmatpush1.bf16.msra.mxu0 %v8221_v30  ;;  %4318 = vmatpush1.bf16.msra.mxu1 %v8222_v29  ;;  %v8228_v30 = vld [vmem:[#allocation87_spill] sm:$0xff]  ;;  %v8229_v29 = vld [vmem:[#allocation88_spill] sm:$0xff]  ;;  %v267_v46 = vadd.f32 %v8123_v22, %v166_v20 }
 0x3c3   :  { %4320 = vmatprep.subr.bf16.mxu0 %v8223_v38  ;;  %4384 = vmatprep.subr.bf16.mxu1 %v8224_v18  ;;  %v264_v25 = vadd.f32 %v8228_v30, %v163_v54  ;;  %v266_v60 = vadd.f32 %v8229_v29, %v165_v55  ;;  %v265_v18 = vadd.f32 %v8230_v2, %v164_v8 }
 0x3c4   :  { %v167_v8 = vmul.f32 %v8124_v43, %v80_v7 }
 0x418   :  { %v1314_v35 = vpop.f32.mrb[8].mxu0  ;;  %v1385_v3 = vpop.f32.mrb[8].mxu1 }
 0x419   :  { %v1316_v62 = vpop.f32.mrb[9].mxu0  ;;  %v1387_v26 = vpop.f32.mrb[9].mxu1  ;;  %v1315_v38 = vadd.f32 %v1314_v35, %v264_v25  ;;  %v1386_v11 = vadd.f32 %v1385_v3, %v266_v60  ;;  %v169_v60 = vmul.f32 %v8125_v42, %v80_v7 }
 0x41a   :  { %v1317_v4 = vadd.f32 %v1316_v62, %v265_v18  ;;  %v1388_v56 = vadd.f32 %v1387_v26, %v267_v46  ;;  %v168_v18 = vmul.f32 %v8126_v28, %v80_v7 }
 0x41b   :  { %v3337_v32 = vmul.f32 -1.442695, %v1315_v38  ;;  %v3339_v53 = vmul.f32 -1.442695, %v1386_v11  ;;  %v170_v38 = vmul.f32 %v8020_v39, %v80_v7 }
 0x41c   :  { %v3338_v48 = vmul.f32 -1.442695, %v1317_v4  ;;  %v3340_v21 = vmul.f32 -1.442695, %v1388_v56 }
 0x41d   :  { %5588 = vpow2.f32 %v3337_v32  ;;  %v271_v20 = vadd.f32 %v8024_v51, %v170_v38 }
 0x41e   :  { %5590 = vpow2.f32 %v3339_v53  ;;  %v268_v53 = vadd.f32 %v8021_v36, %v167_v8 }
 0x41f   :  { %5592 = vpow2.f32 %v3338_v48 }
 0x420   :  { %5594 = vpow2.f32 %v3340_v21  ;;  %v270_v21 = vadd.f32 %v8022_v37, %v169_v60 }
 0x427   :  { %v5589_v59 = vpop.eup %5588 }
 0x428   :  { %v5591_v54 = vpop.eup %5590  ;;  %v1550_v35 = vadd.f32 1.0, %v5589_v59  ;;  %v8231_v59 = vld [vmem:[#allocation38_spill] sm:$0xff] }
 0x429   :  { %v5593_v30 = vpop.eup %5592  ;;  %v1552_v25 = vadd.f32 1.0, %v5591_v54  ;;  %v269_v11 = vadd.f32 %v8231_v59, %v168_v18 }
 0x42a   :  { %v5595_v55 = vpop.eup %5594  ;;  %v1551_v62 = vadd.f32 1.0, %v5593_v30  ;;  %5596 = vrcp.f32 %v1550_v35 }
 0x42b   :  { %v1553_v26 = vadd.f32 1.0, %v5595_v55  ;;  %5598 = vrcp.f32 %v1552_v25 }
 0x42c   :  { %5600 = vrcp.f32 %v1551_v62 }
 0x42d   :  { %5602 = vrcp.f32 %v1553_v26 }
 0x434   :  { %v5597_v35 = vpop.eup %5596 }
 0x435   :  { %v5599_v8 = vpop.eup %5598 }
 0x436   :  { %v5601_v60 = vpop.eup %5600  ;;  %v1570_v62 = vmul.f32 %v5599_v8, %v6644_v44  ;;  %v8235_v8 = vld [vmem:[#allocation115_spill] sm:$0xff] }
 0x437   :  { %v5603_v25 = vpop.eup %5602 }
 0x438   :  { %v1571_v26 = vmul.f32 %v5603_v25, %v6646_v50  ;;  %v8237_v25 = vld [vmem:[#allocation117_spill] sm:$0xff] }
 0x458   :  { %v1456_v4 = vpop.f32.mrb[10].mxu0  ;;  %v1527_v46 = vpop.f32.mrb[10].mxu1 }
 0x459   :  { %v1457_v32 = vadd.f32 %v1456_v4, %v268_v53  ;;  %v1528_v56 = vadd.f32 %v1527_v46, %v270_v21  ;;  %v1458_v48 = vpop.f32.mrb[11].mxu0  ;;  %v1529_v3 = vpop.f32.mrb[11].mxu1 }
 0x45a   :  { %v1459_v7 = vadd.f32 %v1458_v48, %v269_v11  ;;  %v1530_v30 = vadd.f32 %v1529_v3, %v271_v20 }
 0x45b   :  { %v3341_v54 = vmul.f32 -1.442695, %v1457_v32  ;;  %5604 = vtanh.f32 %v1528_v56 }
 0x45c   :  { %v3342_v55 = vmul.f32 -1.442695, %v1459_v7  ;;  %5606 = vtanh.f32 %v1530_v30 }
 0x45d   :  { %5608 = vpow2.f32 %v3341_v54  ;;  %v8232_v54 = vld [vmem:[#allocation112_spill] sm:$0xff] }
 0x45e   :  { %5610 = vpow2.f32 %v3342_v55  ;;  %v8233_v55 = vld [vmem:[#allocation113_spill] sm:$0xff] }
 0x465   :  { %v5605_v18 = vpop.eup %5604 }
 0x466   :  { %v5607_v38 = vpop.eup %5606  ;;  %v1572_v53 = vmul.f32 %v5605_v18, %v5597_v35  ;;  %v8234_v35 = vld [vmem:[#allocation114_spill] sm:$0xff] }
 0x467   :  { %v5609_v21 = vpop.eup %5608  ;;  %v1573_v4 = vmul.f32 %v5607_v38, %v5601_v60  ;;  %v8236_v60 = vld [vmem:[#allocation116_spill] sm:$0xff]  ;;  %v8238_v18 = vld [vmem:[#allocation118_spill] sm:$0xff]  ;;  %v8239_v38 = vld [vmem:[#allocation119_spill] sm:$0xff] }
 0x468   :  { %v5611_v46 = vpop.eup %5610  ;;  %v1554_v11 = vadd.f32 1.0, %v5609_v21  ;;  %v6802_v20 = vadd.f32 %v1572_v53, %v1570_v62  ;;  %v8240_v62 = vld [vmem:[#allocation120_spill] sm:$0xff]  ;;  %v8241_v53 = vld [vmem:[#allocation121_spill] sm:$0xff] }
 0x469   :  { %v1555_v32 = vadd.f32 1.0, %v5611_v46  ;;  %v6804_v56 = vadd.f32 %v1573_v4, %v1571_v26  ;;  %v8242_v21 = vld [vmem:[#allocation132_spill] sm:$0xff]  ;;  %v8243_v26 = vld [vmem:[#allocation133_spill] sm:$0xff]  ;;  %v8244_v4 = vld [vmem:[#allocation134_spill] sm:$0xff] }
 0x46a   :  { %5612 = vrcp.f32 %v1554_v11  ;;  %v8245_v46 = vld [vmem:[#allocation135_spill] sm:$0xff]  ;;  %v8246_v11 = vld [vmem:[#allocation136_spill] sm:$0xff] }
 0x46b   :  { %5614 = vtanh.f32 %v6802_v20 }
 0x46c   :  { %5616 = vrcp.f32 %v1555_v32  ;;  %v8247_v32 = vld [vmem:[#allocation137_spill] sm:$0xff] }
 0x46d   :  { %5618 = vtanh.f32 %v6804_v56 }
 0x474   :  { %v5613_v48 = vpop.eup %5612 }
 0x475   :  { %v5615_v44 = vpop.eup %5614 }
 0x476   :  { %v5617_v3 = vpop.eup %5616  ;;  %v6808_v50 = vmul.f32 %v5615_v44, %v5613_v48  ;;  %v8248_v48 = vld [vmem:[#allocation138_spill] sm:$0xff]  ;;  %v8249_v44 = vld [vmem:[#allocation139_spill] sm:$0xff] }
 0x477   :  { %v5619_v7 = vpop.eup %5618 }
 0x478   :  { %v1579_v30 = vmul.f32 %v5619_v7, %v5617_v3  ;;  %v8250_v3 = vld [vmem:[#allocation140_spill] sm:$0xff]  ;;  %v8251_v7 = vld [vmem:[#allocation141_spill] sm:$0xff] }
 0x47a   :  { %1644 = vmatprep.mubr.f32.mxu0 %v1579_v30  ;;  %1715 = vmatprep.mubr.f32.mxu1 %v1579_v30 }
 0x47b   :  { %1645 = vmatmul.mubr.f32.vlgmr.msra.gmra.mrb[12].mxu0 %v6808_v50  ;;  %1716 = vmatmul.mubr.f32.vlgmr.msra.gmra.mrb[12].mxu1 %v6808_v50 }
 0x47c   :  { %4322 = vmatpush1.bf16.msra.mxu0 %v8026_v52  ;;  %4386 = vmatpush1.bf16.msra.mxu1 %v8027_v6 }
 0x47d   :  { %1786 = vmatprep.mubr.f32.mxu0 %v1579_v30  ;;  %1857 = vmatprep.mubr.f32.mxu1 %v1579_v30  ;;  %v8252_v30 = vld [vmem:[#allocation142_spill] sm:$0xff] }
 0x47e   :  { %4324 = vmatprep.subr.bf16.mxu0 %v8028_v45  ;;  %4388 = vmatprep.subr.bf16.mxu1 %v8029_v16 }
 0x480   :  { %4326 = vmatpush1.bf16.msra.mxu0 %v8030_v12  ;;  %4390 = vmatpush1.bf16.msra.mxu1 %v8031_v27 }
 0x481   :  { %4328 = vmatprep.subr.bf16.mxu0 %v8032_v40  ;;  %4392 = vmatprep.subr.bf16.mxu1 %v8033_v31 }
 0x484   :  { %4330 = vmatpush1.bf16.msra.mxu0 %v8128_v10  ;;  %4394 = vmatpush1.bf16.msra.mxu1 %v8129_v13 }
 0x485   :  { %4332 = vmatprep.subr.bf16.mxu0 %v8130_v17  ;;  %4396 = vmatprep.subr.bf16.mxu1 %v8131_v47 }
 0x488   :  { %4334 = vmatpush1.bf16.msra.mxu0 %v8132_v34  ;;  %4398 = vmatpush1.bf16.msra.mxu1 %v8133_v33 }
 0x489   :  { %4336 = vmatprep.subr.bf16.mxu0 %v8134_v24  ;;  %4400 = vmatprep.subr.bf16.mxu1 %v8135_v19 }
 0x48c   :  { %4338 = vmatpush1.bf16.msra.mxu0 %v8136_v15  ;;  %4402 = vmatpush1.bf16.msra.mxu1 %v8137_v5 }
 0x48d   :  { %4340 = vmatprep.subr.bf16.mxu0 %v8232_v54  ;;  %4404 = vmatprep.subr.bf16.mxu1 %v8233_v55 }
 0x490   :  { %4342 = vmatpush1.bf16.msra.mxu0 %v8234_v35  ;;  %4406 = vmatpush1.bf16.msra.mxu1 %v8235_v8 }
 0x491   :  { %4344 = vmatprep.subr.bf16.mxu0 %v8236_v60  ;;  %4408 = vmatprep.subr.bf16.mxu1 %v8237_v25 }
 0x494   :  { %4346 = vmatpush1.bf16.msra.mxu0 %v8238_v18  ;;  %4410 = vmatpush1.bf16.msra.mxu1 %v8239_v38 }
 0x495   :  { %4348 = vmatprep.subr.bf16.mxu0 %v8240_v62  ;;  %4412 = vmatprep.subr.bf16.mxu1 %v8241_v53 }
 0x498   :  { %4350 = vmatpush1.bf16.msra.mxu0 %v8148_v57  ;;  %4414 = vmatpush1.bf16.msra.mxu1 %v8149_v9 }
 0x499   :  { %4352 = vmatprep.subr.bf16.mxu0 %v8150_v14  ;;  %4416 = vmatprep.subr.bf16.mxu1 %v8151_v23 }
 0x49c   :  { %4354 = vmatpush1.bf16.msra.mxu0 %v8152_v58  ;;  %4418 = vmatpush1.bf16.msra.mxu1 %v8153_v41 }
 0x49d   :  { %4356 = vmatprep.subr.bf16.mxu0 %v8154_v49  ;;  %4420 = vmatprep.subr.bf16.mxu1 %v8155_v1 }
 0x4a0   :  { %4358 = vmatpush1.bf16.msra.mxu0 %v8156_v61  ;;  %4422 = vmatpush1.bf16.msra.mxu1 %v8157_v0  ;;  %v85_v0 = vpop.permute.xlu0 %84 }
 0x4a1   :  { %4360 = vmatprep.subr.bf16.mxu0 %v8242_v21  ;;  %4424 = vmatprep.subr.bf16.mxu1 %v8243_v26  ;;  %v8253_v21 = vld [vmem:[#allocation143_spill] sm:$0xff]  ;;  %v8254_v26 = vld [vmem:[#allocation144_spill] sm:$0xff] }
 0x4a4   :  { %4362 = vmatpush1.bf16.msra.mxu0 %v8244_v4  ;;  %4426 = vmatpush1.bf16.msra.mxu1 %v8245_v46  ;;  %v8255_v4 = vld [vmem:[#allocation145_spill] sm:$0xff]  ;;  %v8256_v46 = vld [vmem:[#allocation146_spill] sm:$0xff] }
 0x4a5   :  { %4364 = vmatprep.subr.bf16.mxu0 %v8246_v11  ;;  %4428 = vmatprep.subr.bf16.mxu1 %v8247_v32  ;;  %v8257_v11 = vld [vmem:[#allocation147_spill] sm:$0xff]  ;;  %v8258_v32 = vld [vmem:[#allocation148_spill] sm:$0xff] }
 0x4a8   :  { %4366 = vmatpush1.bf16.msra.mxu0 %v8248_v48  ;;  %4430 = vmatpush1.bf16.msra.mxu1 %v8249_v44  ;;  %v8259_v48 = vld [vmem:[#allocation149_spill] sm:$0xff]  ;;  %v8260_v44 = vld [vmem:[#allocation150_spill] sm:$0xff] }
 0x4a9   :  { %4368 = vmatprep.subr.bf16.mxu0 %v8250_v3  ;;  %4432 = vmatprep.subr.bf16.mxu1 %v8251_v7  ;;  %v8261_v3 = vld [vmem:[#allocation151_spill] sm:$0xff]  ;;  %v8262_v7 = vld [vmem:[#allocation152_spill] sm:$0xff] }
 0x4ac   :  { %4370 = vmatpush1.bf16.msra.mxu0 %v8252_v30  ;;  %4434 = vmatpush1.bf16.msra.mxu1 %v8253_v21  ;;  %v8263_v30 = vld [vmem:[#allocation153_spill] sm:$0xff]  ;;  %v8264_v21 = vld [vmem:[#allocation154_spill] sm:$0xff] }
 0x4ad   :  { %4372 = vmatprep.subr.bf16.mxu0 %v8254_v26  ;;  %4436 = vmatprep.subr.bf16.mxu1 %v8255_v4  ;;  %v8265_v26 = vld [vmem:[#allocation155_spill] sm:$0xff] }
 0x4ae   :  { %v8266_v4 = vld [vmem:[#allocation11_spill] sm:$0xff] }
 0x4b0   :  { %4374 = vmatpush1.bf16.msra.mxu0 %v8256_v46  ;;  %4438 = vmatpush1.bf16.msra.mxu1 %v8257_v11  ;;  %v8267_v46 = vld [vmem:[#allocation12_spill] sm:$0xff] }
 0x4b1   :  { %4376 = vmatprep.subr.bf16.mxu0 %v8258_v32  ;;  %4440 = vmatprep.subr.bf16.mxu1 %v8259_v48  ;;  %v8268_v48 = vld [vmem:[#allocation13_spill] sm:$0xff]  ;;  %v8277_v32 = vld [vmem:[#allocation22_spill] sm:$0xff] }
 0x4b4   :  { %4378 = vmatpush1.bf16.msra.mxu0 %v8260_v44  ;;  %4442 = vmatpush1.bf16.msra.mxu1 %v8261_v3  ;;  %v8269_v44 = vld [vmem:[#allocation14_spill] sm:$0xff]  ;;  %v8270_v3 = vld [vmem:[#allocation15_spill] sm:$0xff] }
 0x4b5   :  { %4380 = vmatprep.subr.bf16.mxu0 %v8262_v7  ;;  %4444 = vmatprep.subr.bf16.mxu1 %v8263_v30  ;;  %v8271_v7 = vld [vmem:[#allocation16_spill] sm:$0xff]  ;;  %v8272_v30 = vld [vmem:[#allocation17_spill] sm:$0xff] }
 0x4b8   :  { %4382 = vmatpush1.bf16.msra.mxu0 %v8264_v21  ;;  %4446 = vmatpush1.bf16.msra.mxu1 %v8265_v26  ;;  %v8273_v21 = vld [vmem:[#allocation18_spill] sm:$0xff]  ;;  %v8274_v26 = vld [vmem:[#allocation19_spill] sm:$0xff] }
 0x4b9   :  { %4448 = vmatprep.subr.bf16.mxu0 %v8266_v4  ;;  %4512 = vmatprep.subr.bf16.mxu1 %v8267_v46  ;;  %v8275_v4 = vld [vmem:[#allocation20_spill] sm:$0xff]  ;;  %v8276_v46 = vld [vmem:[#allocation21_spill] sm:$0xff] }
 0x4bb   :  { %1787 = vmatmul.mubr.f32.vlgmr.msra.gmra.mrb[14].mxu0 %v6808_v50  ;;  %1858 = vmatmul.mubr.f32.vlgmr.msra.gmra.mrb[14].mxu1 %v6808_v50  ;;  %v8278_v50 = vld [vmem:[#allocation23_spill] sm:$0xff] }
 0x4bc   :  { %4450 = vmatpush1.bf16.msra.mxu0 %v8268_v48  ;;  %4514 = vmatpush1.bf16.msra.mxu1 %v8269_v44  ;;  %v8279_v48 = vld [vmem:[#allocation24_spill] sm:$0xff]  ;;  %v8280_v44 = vld [vmem:[#allocation25_spill] sm:$0xff] }
 0x4bd   :  { %4452 = vmatprep.subr.bf16.mxu0 %v8270_v3  ;;  %4516 = vmatprep.subr.bf16.mxu1 %v8271_v7  ;;  %v8281_v3 = vld [vmem:[#allocation26_spill] sm:$0xff]  ;;  %v8282_v7 = vld [vmem:[#allocation27_spill] sm:$0xff] }
 0x4c0   :  { %4454 = vmatpush1.bf16.msra.mxu0 %v8272_v30  ;;  %4518 = vmatpush1.bf16.msra.mxu1 %v8273_v21  ;;  %v8283_v30 = vld [vmem:[#allocation28_spill] sm:$0xff]  ;;  %v8284_v21 = vld [vmem:[#allocation29_spill] sm:$0xff] }
 0x4c1   :  { %4456 = vmatprep.subr.bf16.mxu0 %v8274_v26  ;;  %4520 = vmatprep.subr.bf16.mxu1 %v8275_v4  ;;  %v8285_v26 = vld [vmem:[#allocation30_spill] sm:$0xff]  ;;  %v8286_v4 = vld [vmem:[#allocation31_spill] sm:$0xff] }
 0x4c4   :  { %4458 = vmatpush1.bf16.msra.mxu0 %v8276_v46  ;;  %4522 = vmatpush1.bf16.msra.mxu1 %v8277_v32  ;;  %v8287_v46 = vld [vmem:[#allocation33_spill] sm:$0xff] }
 0x4c5   :  { %4460 = vmatprep.subr.bf16.mxu0 %v8278_v50  ;;  %4524 = vmatprep.subr.bf16.mxu1 %v8279_v48  ;;  %v8288_v32 = vld [vmem:[#allocation41_spill] sm:$0xff]  ;;  %v8289_v50 = vld [vmem:[#allocation42_spill] sm:$0xff]  ;;  %v8290_v48 = vld [vmem:[#allocation43_spill] sm:$0xff] }
 0x4c8   :  { %4462 = vmatpush1.bf16.msra.mxu0 %v8280_v44  ;;  %4526 = vmatpush1.bf16.msra.mxu1 %v8281_v3  ;;  %v8291_v44 = vld [vmem:[#allocation44_spill] sm:$0xff]  ;;  %v8292_v3 = vld [vmem:[#allocation45_spill] sm:$0xff] }
 0x4c9   :  { %4464 = vmatprep.subr.bf16.mxu0 %v8282_v7  ;;  %4528 = vmatprep.subr.bf16.mxu1 %v8283_v30  ;;  %v8293_v7 = vld [vmem:[#allocation46_spill] sm:$0xff]  ;;  %v8294_v30 = vld [vmem:[#allocation47_spill] sm:$0xff] }
 0x4cc   :  { %4466 = vmatpush1.bf16.msra.mxu0 %v8284_v21  ;;  %4530 = vmatpush1.bf16.msra.mxu1 %v8285_v26  ;;  %v8295_v21 = vld [vmem:[#allocation48_spill] sm:$0xff]  ;;  %v8296_v26 = vld [vmem:[#allocation49_spill] sm:$0xff] }
 0x4cd   :  { %4468 = vmatprep.subr.bf16.mxu0 %v8286_v4  ;;  %4532 = vmatprep.subr.bf16.mxu1 %v8287_v46  ;;  %v8297_v4 = vld [vmem:[#allocation50_spill] sm:$0xff]  ;;  %v8298_v46 = vld [vmem:[#allocation51_spill] sm:$0xff] }
 0x4d0   :  { %4470 = vmatpush1.bf16.msra.mxu0 %v8288_v32  ;;  %4534 = vmatpush1.bf16.msra.mxu1 %v8289_v50  ;;  %v8299_v32 = vld [vmem:[#allocation52_spill] sm:$0xff]  ;;  %v8300_v50 = vld [vmem:[#allocation53_spill] sm:$0xff] }
 0x4d1   :  { %4472 = vmatprep.subr.bf16.mxu0 %v8290_v48  ;;  %4536 = vmatprep.subr.bf16.mxu1 %v8291_v44  ;;  %v8301_v48 = vld [vmem:[#allocation54_spill] sm:$0xff]  ;;  %v8302_v44 = vld [vmem:[#allocation55_spill] sm:$0xff] }
 0x4d4   :  { %4474 = vmatpush1.bf16.msra.mxu0 %v8292_v3  ;;  %4538 = vmatpush1.bf16.msra.mxu1 %v8293_v7  ;;  %v8303_v3 = vld [vmem:[#allocation56_spill] sm:$0xff]  ;;  %v8304_v7 = vld [vmem:[#allocation57_spill] sm:$0xff] }
 0x4d5   :  { %4476 = vmatprep.subr.bf16.mxu0 %v8294_v30  ;;  %4540 = vmatprep.subr.bf16.mxu1 %v8295_v21  ;;  %v8305_v30 = vld [vmem:[#allocation58_spill] sm:$0xff]  ;;  %v8306_v21 = vld [vmem:[#allocation59_spill] sm:$0xff] }
 0x4d8   :  { %4478 = vmatpush1.bf16.msra.mxu0 %v8296_v26  ;;  %4542 = vmatpush1.bf16.msra.mxu1 %v8297_v4  ;;  %v8307_v26 = vld [vmem:[#allocation60_spill] sm:$0xff]  ;;  %v8308_v4 = vld [vmem:[#allocation61_spill] sm:$0xff] }
 0x4d9   :  { %4480 = vmatprep.subr.bf16.mxu0 %v8298_v46  ;;  %4544 = vmatprep.subr.bf16.mxu1 %v8299_v32  ;;  %v8309_v46 = vld [vmem:[#allocation62_spill] sm:$0xff]  ;;  %v8310_v32 = vld [vmem:[#allocation63_spill] sm:$0xff] }
 0x4dc   :  { %4482 = vmatpush1.bf16.msra.mxu0 %v8300_v50  ;;  %4546 = vmatpush1.bf16.msra.mxu1 %v8301_v48  ;;  %v8311_v50 = vld [vmem:[#allocation64_spill] sm:$0xff]  ;;  %v8312_v48 = vld [vmem:[#allocation65_spill] sm:$0xff] }
 0x4dd   :  { %4484 = vmatprep.subr.bf16.mxu0 %v8302_v44  ;;  %4548 = vmatprep.subr.bf16.mxu1 %v8303_v3  ;;  %v8313_v44 = vld [vmem:[#allocation66_spill] sm:$0xff]  ;;  %v8314_v3 = vld [vmem:[#allocation67_spill] sm:$0xff] }
 0x4e0   :  { %4486 = vmatpush1.bf16.msra.mxu0 %v8304_v7  ;;  %4550 = vmatpush1.bf16.msra.mxu1 %v8305_v30  ;;  %v8315_v7 = vld [vmem:[#allocation68_spill] sm:$0xff]  ;;  %v8316_v30 = vld [vmem:[#allocation69_spill] sm:$0xff] }
 0x4e1   :  { %4488 = vmatprep.subr.bf16.mxu0 %v8306_v21  ;;  %4552 = vmatprep.subr.bf16.mxu1 %v8307_v26  ;;  %v8317_v21 = vld [vmem:[#allocation70_spill] sm:$0xff]  ;;  %v8318_v26 = vld [vmem:[#allocation71_spill] sm:$0xff] }
 0x4e4   :  { %4490 = vmatpush1.bf16.msra.mxu0 %v8308_v4  ;;  %4554 = vmatpush1.bf16.msra.mxu1 %v8309_v46  ;;  %v8319_v4 = vld [vmem:[#allocation72_spill] sm:$0xff]  ;;  %v8320_v46 = vld [vmem:[#allocation73_spill] sm:$0xff] }
 0x4e5   :  { %4492 = vmatprep.subr.bf16.mxu0 %v8310_v32  ;;  %4556 = vmatprep.subr.bf16.mxu1 %v8311_v50  ;;  %v8321_v32 = vld [vmem:[#allocation74_spill] sm:$0xff]  ;;  %v8322_v50 = vld [vmem:[#allocation75_spill] sm:$0xff] }
 0x4e8   :  { %4494 = vmatpush1.bf16.msra.mxu0 %v8312_v48  ;;  %4558 = vmatpush1.bf16.msra.mxu1 %v8313_v44  ;;  %v8323_v48 = vld [vmem:[#allocation76_spill] sm:$0xff]  ;;  %v8324_v44 = vld [vmem:[#allocation77_spill] sm:$0xff] }
 0x4e9   :  { %4496 = vmatprep.subr.bf16.mxu0 %v8314_v3  ;;  %4560 = vmatprep.subr.bf16.mxu1 %v8315_v7  ;;  %v8325_v3 = vld [vmem:[#allocation78_spill] sm:$0xff]  ;;  %v8326_v7 = vld [vmem:[#allocation79_spill] sm:$0xff] }
 0x4ec   :  { %4498 = vmatpush1.bf16.msra.mxu0 %v8316_v30  ;;  %4562 = vmatpush1.bf16.msra.mxu1 %v8317_v21  ;;  %v8327_v30 = vld [vmem:[#allocation80_spill] sm:$0xff]  ;;  %v8328_v21 = vld [vmem:[#allocation81_spill] sm:$0xff] }
 0x4ed   :  { %4500 = vmatprep.subr.bf16.mxu0 %v8318_v26  ;;  %4564 = vmatprep.subr.bf16.mxu1 %v8319_v4  ;;  %v8329_v26 = vld [vmem:[#allocation82_spill] sm:$0xff]  ;;  %v8330_v4 = vld [vmem:[#allocation83_spill] sm:$0xff] }
 0x4f0   :  { %4502 = vmatpush1.bf16.msra.mxu0 %v8320_v46  ;;  %4566 = vmatpush1.bf16.msra.mxu1 %v8321_v32  ;;  %v8331_v46 = vld [vmem:[#allocation84_spill] sm:$0xff] }
 0x4f1   :  { %4504 = vmatprep.subr.bf16.mxu0 %v8322_v50  ;;  %4568 = vmatprep.subr.bf16.mxu1 %v8323_v48 }
 0x4f4   :  { %4506 = vmatpush1.bf16.msra.mxu0 %v8324_v44  ;;  %4570 = vmatpush1.bf16.msra.mxu1 %v8325_v3  ;;  %v8332_v44 = vld [vmem:[#allocation85_spill] sm:$0xff]  ;;  %v8333_v3 = vld [vmem:[#allocation86_spill] sm:$0xff] }
 0x4f5   :  { %4508 = vmatprep.subr.bf16.mxu0 %v8326_v7  ;;  %4572 = vmatprep.subr.bf16.mxu1 %v8327_v30  ;;  %v171_v61 = vmul.f32 %v8332_v44, %v85_v0  ;;  %v173_v1 = vmul.f32 %v8333_v3, %v85_v0  ;;  %v172_v7 = vmul.f32 %v8118_v63, %v85_v0  ;;  %v8334_v30 = vld [vmem:[#allocation35_spill] sm:$0xff] }
 0x4f6   :  { %v174_v49 = vmul.f32 %v8334_v30, %v85_v0 }
 0x4f8   :  { %4510 = vmatpush1.bf16.msra.mxu0 %v8328_v21  ;;  %4574 = vmatpush1.bf16.msra.mxu1 %v8329_v26  ;;  %v8335_v21 = vld [vmem:[#allocation87_spill] sm:$0xff]  ;;  %v274_v26 = vadd.f32 %v8229_v29, %v173_v1  ;;  %v275_v23 = vadd.f32 %v8123_v22, %v174_v49 }
 0x4f9   :  { %4576 = vmatprep.subr.bf16.mxu0 %v8330_v4  ;;  %4640 = vmatprep.subr.bf16.mxu1 %v8331_v46  ;;  %v272_v41 = vadd.f32 %v8335_v21, %v171_v61  ;;  %v273_v46 = vadd.f32 %v8230_v2, %v172_v7 }
 0x54e   :  { %v1646_v32 = vpop.f32.mrb[12].mxu0  ;;  %v1717_v50 = vpop.f32.mrb[12].mxu1 }
 0x54f   :  { %v1648_v11 = vpop.f32.mrb[13].mxu0  ;;  %v1719_v48 = vpop.f32.mrb[13].mxu1  ;;  %v1647_v4 = vadd.f32 %v1646_v32, %v272_v41  ;;  %v1718_v58 = vadd.f32 %v1717_v50, %v274_v26  ;;  %v175_v32 = vmul.f32 %v8124_v43, %v85_v0  ;;  %v177_v26 = vmul.f32 %v8125_v42, %v85_v0 }
 0x550   :  { %v1649_v14 = vadd.f32 %v1648_v11, %v273_v46  ;;  %v1720_v9 = vadd.f32 %v1719_v48, %v275_v23  ;;  %v176_v23 = vmul.f32 %v8126_v28, %v85_v0 }
 0x551   :  { %v3343_v57 = vmul.f32 -1.442695, %v1647_v4  ;;  %v3345_v44 = vmul.f32 -1.442695, %v1718_v58  ;;  %v178_v58 = vmul.f32 %v8020_v39, %v85_v0 }
 0x552   :  { %v3344_v53 = vmul.f32 -1.442695, %v1649_v14  ;;  %v3346_v3 = vmul.f32 -1.442695, %v1720_v9  ;;  %v277_v11 = vadd.f32 %v8231_v59, %v176_v23 }
 0x553   :  { %5620 = vpow2.f32 %v3343_v57  ;;  %v276_v57 = vadd.f32 %v8021_v36, %v175_v32  ;;  %v279_v48 = vadd.f32 %v8024_v51, %v178_v58 }
 0x554   :  { %5622 = vpow2.f32 %v3345_v44 }
 0x555   :  { %5624 = vpow2.f32 %v3344_v53  ;;  %v278_v53 = vadd.f32 %v8022_v37, %v177_v26 }
 0x556   :  { %5626 = vpow2.f32 %v3346_v3 }
 0x55d   :  { %v5621_v30 = vpop.eup %5620 }
 0x55e   :  { %v5623_v61 = vpop.eup %5622  ;;  %v1882_v41 = vadd.f32 1.0, %v5621_v30 }
 0x55f   :  { %v5625_v21 = vpop.eup %5624  ;;  %v1884_v49 = vadd.f32 1.0, %v5623_v61 }
 0x560   :  { %v5627_v1 = vpop.eup %5626  ;;  %v1883_v14 = vadd.f32 1.0, %v5625_v21  ;;  %5628 = vrcp.f32 %v1882_v41 }
 0x561   :  { %v1885_v9 = vadd.f32 1.0, %v5627_v1  ;;  %5630 = vrcp.f32 %v1884_v49 }
 0x562   :  { %5632 = vrcp.f32 %v1883_v14 }
 0x563   :  { %5634 = vrcp.f32 %v1885_v9 }
 0x56a   :  { %v5629_v1 = vpop.eup %5628 }
 0x56b   :  { %v5631_v41 = vpop.eup %5630 }
 0x56c   :  { %v5633_v32 = vpop.eup %5632  ;;  %v1902_v58 = vmul.f32 %v5631_v41, %v6802_v20  ;;  %v8340_v41 = vld [vmem:[#allocation125_spill] sm:$0xff] }
 0x56d   :  { %v5635_v26 = vpop.eup %5634 }
 0x56e   :  { %v1903_v9 = vmul.f32 %v5635_v26, %v6804_v56  ;;  %v8342_v26 = vld [vmem:[#allocation127_spill] sm:$0xff] }
 0x58e   :  { %v1788_v4 = vpop.f32.mrb[14].mxu0  ;;  %v1859_v46 = vpop.f32.mrb[14].mxu1 }
 0x58f   :  { %v1789_v44 = vadd.f32 %v1788_v4, %v276_v57  ;;  %v1860_v3 = vadd.f32 %v1859_v46, %v278_v53  ;;  %v1790_v7 = vpop.f32.mrb[15].mxu0  ;;  %v1861_v30 = vpop.f32.mrb[15].mxu1 }
 0x590   :  { %v1791_v0 = vadd.f32 %v1790_v7, %v277_v11  ;;  %v1862_v21 = vadd.f32 %v1861_v30, %v279_v48 }
 0x591   :  { %v3347_v50 = vmul.f32 -1.442695, %v1789_v44  ;;  %5636 = vtanh.f32 %v1860_v3 }
 0x592   :  { %v3348_v61 = vmul.f32 -1.442695, %v1791_v0  ;;  %5638 = vtanh.f32 %v1862_v21  ;;  %v8336_v21 = vld [vmem:[#allocation121_spill] sm:$0xff] }
 0x593   :  { %5640 = vpow2.f32 %v3347_v50  ;;  %v8337_v50 = vld [vmem:[#allocation122_spill] sm:$0xff] }
 0x594   :  { %5642 = vpow2.f32 %v3348_v61  ;;  %v8338_v61 = vld [vmem:[#allocation123_spill] sm:$0xff] }
 0x59b   :  { %v5637_v49 = vpop.eup %5636 }
 0x59c   :  { %v5639_v23 = vpop.eup %5638  ;;  %v1904_v14 = vmul.f32 %v5637_v49, %v5629_v1  ;;  %v8339_v1 = vld [vmem:[#allocation124_spill] sm:$0xff] }
 0x59d   :  { %v5641_v57 = vpop.eup %5640  ;;  %v1905_v53 = vmul.f32 %v5639_v23, %v5633_v32  ;;  %v8341_v32 = vld [vmem:[#allocation126_spill] sm:$0xff]  ;;  %v8343_v49 = vld [vmem:[#allocation128_spill] sm:$0xff]  ;;  %v8344_v23 = vld [vmem:[#allocation129_spill] sm:$0xff] }
 0x59e   :  { %v5643_v4 = vpop.eup %5642  ;;  %v1886_v46 = vadd.f32 1.0, %v5641_v57  ;;  %v6960_v11 = vadd.f32 %v1904_v14, %v1902_v58  ;;  %v8345_v58 = vld [vmem:[#allocation130_spill] sm:$0xff]  ;;  %v8346_v14 = vld [vmem:[#allocation131_spill] sm:$0xff]  ;;  %v8347_v57 = vld [vmem:[#allocation132_spill] sm:$0xff] }
 0x59f   :  { %v1887_v48 = vadd.f32 1.0, %v5643_v4  ;;  %v6962_v44 = vadd.f32 %v1905_v53, %v1903_v9  ;;  %v8348_v9 = vld [vmem:[#allocation133_spill] sm:$0xff]  ;;  %v8349_v53 = vld [vmem:[#allocation134_spill] sm:$0xff]  ;;  %v8350_v4 = vld [vmem:[#allocation135_spill] sm:$0xff] }
 0x5a0   :  { %5644 = vrcp.f32 %v1886_v46  ;;  %v8351_v46 = vld [vmem:[#allocation136_spill] sm:$0xff] }
 0x5a1   :  { %5646 = vtanh.f32 %v6960_v11 }
 0x5a2   :  { %5648 = vrcp.f32 %v1887_v48  ;;  %v8352_v48 = vld [vmem:[#allocation137_spill] sm:$0xff] }
 0x5a3   :  { %5650 = vtanh.f32 %v6962_v44 }
 0x5aa   :  { %v5645_v3 = vpop.eup %5644 }
 0x5ab   :  { %v5647_v20 = vpop.eup %5646 }
 0x5ac   :  { %v5649_v7 = vpop.eup %5648  ;;  %v6966_v56 = vmul.f32 %v5647_v20, %v5645_v3  ;;  %v8353_v3 = vld [vmem:[#allocation138_spill] sm:$0xff]  ;;  %v8354_v20 = vld [vmem:[#allocation139_spill] sm:$0xff] }
 0x5ad   :  { %v5651_v30 = vpop.eup %5650 }
 0x5ae   :  { %v1911_v0 = vmul.f32 %v5651_v30, %v5649_v7  ;;  %v8355_v7 = vld [vmem:[#allocation140_spill] sm:$0xff]  ;;  %v8356_v30 = vld [vmem:[#allocation141_spill] sm:$0xff] }
 0x5b0   :  { %1976 = vmatprep.mubr.f32.mxu0 %v1911_v0  ;;  %2047 = vmatprep.mubr.f32.mxu1 %v1911_v0 }
 0x5b1   :  { %1977 = vmatmul.mubr.f32.vlgmr.msra.gmra.mrb[16].mxu0 %v6966_v56  ;;  %2048 = vmatmul.mubr.f32.vlgmr.msra.gmra.mrb[16].mxu1 %v6966_v56 }
 0x5b2   :  { %4578 = vmatpush1.bf16.msra.mxu0 %v8026_v52  ;;  %4642 = vmatpush1.bf16.msra.mxu1 %v8027_v6 }
 0x5b3   :  { %2118 = vmatprep.mubr.f32.mxu0 %v1911_v0  ;;  %2189 = vmatprep.mubr.f32.mxu1 %v1911_v0  ;;  %v8357_v0 = vld [vmem:[#allocation142_spill] sm:$0xff] }
 0x5b4   :  { %4580 = vmatprep.subr.bf16.mxu0 %v8028_v45  ;;  %4644 = vmatprep.subr.bf16.mxu1 %v8029_v16 }
 0x5b6   :  { %4582 = vmatpush1.bf16.msra.mxu0 %v8030_v12  ;;  %4646 = vmatpush1.bf16.msra.mxu1 %v8031_v27 }
 0x5b7   :  { %4584 = vmatprep.subr.bf16.mxu0 %v8032_v40  ;;  %4648 = vmatprep.subr.bf16.mxu1 %v8033_v31 }
 0x5ba   :  { %4586 = vmatpush1.bf16.msra.mxu0 %v8128_v10  ;;  %4650 = vmatpush1.bf16.msra.mxu1 %v8129_v13 }
 0x5bb   :  { %4588 = vmatprep.subr.bf16.mxu0 %v8130_v17  ;;  %4652 = vmatprep.subr.bf16.mxu1 %v8131_v47 }
 0x5be   :  { %4590 = vmatpush1.bf16.msra.mxu0 %v8132_v34  ;;  %4654 = vmatpush1.bf16.msra.mxu1 %v8133_v33 }
 0x5bf   :  { %4592 = vmatprep.subr.bf16.mxu0 %v8134_v24  ;;  %4656 = vmatprep.subr.bf16.mxu1 %v8135_v19 }
 0x5c2   :  { %4594 = vmatpush1.bf16.msra.mxu0 %v8136_v15  ;;  %4658 = vmatpush1.bf16.msra.mxu1 %v8137_v5 }
 0x5c3   :  { %4596 = vmatprep.subr.bf16.mxu0 %v8232_v54  ;;  %4660 = vmatprep.subr.bf16.mxu1 %v8233_v55 }
 0x5c6   :  { %4598 = vmatpush1.bf16.msra.mxu0 %v8234_v35  ;;  %4662 = vmatpush1.bf16.msra.mxu1 %v8235_v8 }
 0x5c7   :  { %4600 = vmatprep.subr.bf16.mxu0 %v8236_v60  ;;  %4664 = vmatprep.subr.bf16.mxu1 %v8237_v25 }
 0x5ca   :  { %4602 = vmatpush1.bf16.msra.mxu0 %v8238_v18  ;;  %4666 = vmatpush1.bf16.msra.mxu1 %v8239_v38 }
 0x5cb   :  { %4604 = vmatprep.subr.bf16.mxu0 %v8240_v62  ;;  %4668 = vmatprep.subr.bf16.mxu1 %v8336_v21 }
 0x5ce   :  { %4606 = vmatpush1.bf16.msra.mxu0 %v8337_v50  ;;  %4670 = vmatpush1.bf16.msra.mxu1 %v8338_v61 }
 0x5cf   :  { %4608 = vmatprep.subr.bf16.mxu0 %v8339_v1  ;;  %4672 = vmatprep.subr.bf16.mxu1 %v8340_v41 }
 0x5d2   :  { %4610 = vmatpush1.bf16.msra.mxu0 %v8341_v32  ;;  %4674 = vmatpush1.bf16.msra.mxu1 %v8342_v26 }
 0x5d3   :  { %4612 = vmatprep.subr.bf16.mxu0 %v8343_v49  ;;  %4676 = vmatprep.subr.bf16.mxu1 %v8344_v23 }
 0x5d6   :  { %4614 = vmatpush1.bf16.msra.mxu0 %v8345_v58  ;;  %4678 = vmatpush1.bf16.msra.mxu1 %v8346_v14  ;;  %v90_v14 = vpop.permute.xlu1 %89 }
 0x5d7   :  { %4616 = vmatprep.subr.bf16.mxu0 %v8347_v57  ;;  %4680 = vmatprep.subr.bf16.mxu1 %v8348_v9  ;;  %v8358_v57 = vld [vmem:[#allocation143_spill] sm:$0xff]  ;;  %v8359_v9 = vld [vmem:[#allocation144_spill] sm:$0xff] }
 0x5da   :  { %4618 = vmatpush1.bf16.msra.mxu0 %v8349_v53  ;;  %4682 = vmatpush1.bf16.msra.mxu1 %v8350_v4  ;;  %v8360_v53 = vld [vmem:[#allocation145_spill] sm:$0xff]  ;;  %v8361_v4 = vld [vmem:[#allocation146_spill] sm:$0xff] }
 0x5db   :  { %4620 = vmatprep.subr.bf16.mxu0 %v8351_v46  ;;  %4684 = vmatprep.subr.bf16.mxu1 %v8352_v48  ;;  %v8362_v46 = vld [vmem:[#allocation147_spill] sm:$0xff]  ;;  %v8363_v48 = vld [vmem:[#allocation148_spill] sm:$0xff] }
 0x5de   :  { %4622 = vmatpush1.bf16.msra.mxu0 %v8353_v3  ;;  %4686 = vmatpush1.bf16.msra.mxu1 %v8354_v20  ;;  %v8364_v3 = vld [vmem:[#allocation149_spill] sm:$0xff]  ;;  %v8365_v20 = vld [vmem:[#allocation150_spill] sm:$0xff] }
 0x5df   :  { %4624 = vmatprep.subr.bf16.mxu0 %v8355_v7  ;;  %4688 = vmatprep.subr.bf16.mxu1 %v8356_v30  ;;  %v8366_v7 = vld [vmem:[#allocation151_spill] sm:$0xff]  ;;  %v8367_v30 = vld [vmem:[#allocation152_spill] sm:$0xff] }
 0x5e2   :  { %4626 = vmatpush1.bf16.msra.mxu0 %v8357_v0  ;;  %4690 = vmatpush1.bf16.msra.mxu1 %v8358_v57  ;;  %v8368_v0 = vld [vmem:[#allocation153_spill] sm:$0xff]  ;;  %v8369_v57 = vld [vmem:[#allocation154_spill] sm:$0xff] }
 0x5e3   :  { %4628 = vmatprep.subr.bf16.mxu0 %v8359_v9  ;;  %4692 = vmatprep.subr.bf16.mxu1 %v8360_v53  ;;  %v8370_v9 = vld [vmem:[#allocation155_spill] sm:$0xff] }
 0x5e4   :  { %v8371_v53 = vld [vmem:[#allocation11_spill] sm:$0xff] }
 0x5e6   :  { %4630 = vmatpush1.bf16.msra.mxu0 %v8361_v4  ;;  %4694 = vmatpush1.bf16.msra.mxu1 %v8362_v46  ;;  %v8372_v4 = vld [vmem:[#allocation12_spill] sm:$0xff] }
 0x5e7   :  { %4632 = vmatprep.subr.bf16.mxu0 %v8363_v48  ;;  %4696 = vmatprep.subr.bf16.mxu1 %v8364_v3  ;;  %v8373_v3 = vld [vmem:[#allocation13_spill] sm:$0xff]  ;;  %v8382_v48 = vld [vmem:[#allocation22_spill] sm:$0xff] }
 0x5ea   :  { %4634 = vmatpush1.bf16.msra.mxu0 %v8365_v20  ;;  %4698 = vmatpush1.bf16.msra.mxu1 %v8366_v7  ;;  %v8374_v20 = vld [vmem:[#allocation14_spill] sm:$0xff]  ;;  %v8375_v7 = vld [vmem:[#allocation15_spill] sm:$0xff] }
 0x5eb   :  { %4636 = vmatprep.subr.bf16.mxu0 %v8367_v30  ;;  %4700 = vmatprep.subr.bf16.mxu1 %v8368_v0  ;;  %v8376_v30 = vld [vmem:[#allocation16_spill] sm:$0xff]  ;;  %v8377_v0 = vld [vmem:[#allocation17_spill] sm:$0xff] }
 0x5ee   :  { %4638 = vmatpush1.bf16.msra.mxu0 %v8369_v57  ;;  %4702 = vmatpush1.bf16.msra.mxu1 %v8370_v9  ;;  %v8378_v57 = vld [vmem:[#allocation18_spill] sm:$0xff]  ;;  %v8379_v9 = vld [vmem:[#allocation19_spill] sm:$0xff] }
 0x5ef   :  { %4704 = vmatprep.subr.bf16.mxu0 %v8371_v53  ;;  %4768 = vmatprep.subr.bf16.mxu1 %v8372_v4  ;;  %v8380_v53 = vld [vmem:[#allocation20_spill] sm:$0xff]  ;;  %v8381_v4 = vld [vmem:[#allocation21_spill] sm:$0xff] }
 0x5f1   :  { %2119 = vmatmul.mubr.f32.vlgmr.msra.gmra.mrb[18].mxu0 %v6966_v56  ;;  %2190 = vmatmul.mubr.f32.vlgmr.msra.gmra.mrb[18].mxu1 %v6966_v56  ;;  %v8383_v56 = vld [vmem:[#allocation23_spill] sm:$0xff] }
 0x5f2   :  { %4706 = vmatpush1.bf16.msra.mxu0 %v8373_v3  ;;  %4770 = vmatpush1.bf16.msra.mxu1 %v8374_v20  ;;  %v8384_v3 = vld [vmem:[#allocation24_spill] sm:$0xff]  ;;  %v8385_v20 = vld [vmem:[#allocation25_spill] sm:$0xff] }
 0x5f3   :  { %4708 = vmatprep.subr.bf16.mxu0 %v8375_v7  ;;  %4772 = vmatprep.subr.bf16.mxu1 %v8376_v30  ;;  %v8386_v7 = vld [vmem:[#allocation26_spill] sm:$0xff]  ;;  %v8387_v30 = vld [vmem:[#allocation27_spill] sm:$0xff] }
 0x5f6   :  { %4710 = vmatpush1.bf16.msra.mxu0 %v8377_v0  ;;  %4774 = vmatpush1.bf16.msra.mxu1 %v8378_v57  ;;  %v8388_v0 = vld [vmem:[#allocation28_spill] sm:$0xff]  ;;  %v8389_v57 = vld [vmem:[#allocation29_spill] sm:$0xff] }
 0x5f7   :  { %4712 = vmatprep.subr.bf16.mxu0 %v8379_v9  ;;  %4776 = vmatprep.subr.bf16.mxu1 %v8380_v53  ;;  %v8390_v9 = vld [vmem:[#allocation30_spill] sm:$0xff]  ;;  %v8391_v53 = vld [vmem:[#allocation31_spill] sm:$0xff] }
 0x5fa   :  { %4714 = vmatpush1.bf16.msra.mxu0 %v8381_v4  ;;  %4778 = vmatpush1.bf16.msra.mxu1 %v8382_v48  ;;  %v8392_v4 = vld [vmem:[#allocation33_spill] sm:$0xff] }
 0x5fb   :  { %4716 = vmatprep.subr.bf16.mxu0 %v8383_v56  ;;  %4780 = vmatprep.subr.bf16.mxu1 %v8384_v3  ;;  %v8393_v48 = vld [vmem:[#allocation41_spill] sm:$0xff]  ;;  %v8394_v56 = vld [vmem:[#allocation42_spill] sm:$0xff]  ;;  %v8395_v3 = vld [vmem:[#allocation43_spill] sm:$0xff] }
 0x5fe   :  { %4718 = vmatpush1.bf16.msra.mxu0 %v8385_v20  ;;  %4782 = vmatpush1.bf16.msra.mxu1 %v8386_v7  ;;  %v8396_v20 = vld [vmem:[#allocation44_spill] sm:$0xff]  ;;  %v8397_v7 = vld [vmem:[#allocation45_spill] sm:$0xff] }
 0x5ff   :  { %4720 = vmatprep.subr.bf16.mxu0 %v8387_v30  ;;  %4784 = vmatprep.subr.bf16.mxu1 %v8388_v0  ;;  %v8398_v30 = vld [vmem:[#allocation46_spill] sm:$0xff]  ;;  %v8399_v0 = vld [vmem:[#allocation47_spill] sm:$0xff] }
 0x602   :  { %4722 = vmatpush1.bf16.msra.mxu0 %v8389_v57  ;;  %4786 = vmatpush1.bf16.msra.mxu1 %v8390_v9  ;;  %v8400_v57 = vld [vmem:[#allocation48_spill] sm:$0xff]  ;;  %v8401_v9 = vld [vmem:[#allocation49_spill] sm:$0xff] }
 0x603   :  { %4724 = vmatprep.subr.bf16.mxu0 %v8391_v53  ;;  %4788 = vmatprep.subr.bf16.mxu1 %v8392_v4  ;;  %v8402_v53 = vld [vmem:[#allocation50_spill] sm:$0xff]  ;;  %v8403_v4 = vld [vmem:[#allocation51_spill] sm:$0xff] }
 0x606   :  { %4726 = vmatpush1.bf16.msra.mxu0 %v8393_v48  ;;  %4790 = vmatpush1.bf16.msra.mxu1 %v8394_v56  ;;  %v8404_v48 = vld [vmem:[#allocation52_spill] sm:$0xff]  ;;  %v8405_v56 = vld [vmem:[#allocation53_spill] sm:$0xff] }
 0x607   :  { %4728 = vmatprep.subr.bf16.mxu0 %v8395_v3  ;;  %4792 = vmatprep.subr.bf16.mxu1 %v8396_v20  ;;  %v8406_v3 = vld [vmem:[#allocation54_spill] sm:$0xff]  ;;  %v8407_v20 = vld [vmem:[#allocation55_spill] sm:$0xff] }
 0x60a   :  { %4730 = vmatpush1.bf16.msra.mxu0 %v8397_v7  ;;  %4794 = vmatpush1.bf16.msra.mxu1 %v8398_v30  ;;  %v8408_v7 = vld [vmem:[#allocation56_spill] sm:$0xff]  ;;  %v8409_v30 = vld [vmem:[#allocation57_spill] sm:$0xff] }
 0x60b   :  { %4732 = vmatprep.subr.bf16.mxu0 %v8399_v0  ;;  %4796 = vmatprep.subr.bf16.mxu1 %v8400_v57  ;;  %v8410_v0 = vld [vmem:[#allocation58_spill] sm:$0xff]  ;;  %v8411_v57 = vld [vmem:[#allocation59_spill] sm:$0xff] }
 0x60e   :  { %4734 = vmatpush1.bf16.msra.mxu0 %v8401_v9  ;;  %4798 = vmatpush1.bf16.msra.mxu1 %v8402_v53  ;;  %v8412_v9 = vld [vmem:[#allocation60_spill] sm:$0xff]  ;;  %v8413_v53 = vld [vmem:[#allocation61_spill] sm:$0xff] }
 0x60f   :  { %4736 = vmatprep.subr.bf16.mxu0 %v8403_v4  ;;  %4800 = vmatprep.subr.bf16.mxu1 %v8404_v48  ;;  %v8414_v4 = vld [vmem:[#allocation62_spill] sm:$0xff]  ;;  %v8415_v48 = vld [vmem:[#allocation63_spill] sm:$0xff] }
 0x612   :  { %4738 = vmatpush1.bf16.msra.mxu0 %v8405_v56  ;;  %4802 = vmatpush1.bf16.msra.mxu1 %v8406_v3  ;;  %v8416_v56 = vld [vmem:[#allocation64_spill] sm:$0xff]  ;;  %v8417_v3 = vld [vmem:[#allocation65_spill] sm:$0xff] }
 0x613   :  { %4740 = vmatprep.subr.bf16.mxu0 %v8407_v20  ;;  %4804 = vmatprep.subr.bf16.mxu1 %v8408_v7  ;;  %v8418_v20 = vld [vmem:[#allocation66_spill] sm:$0xff]  ;;  %v8419_v7 = vld [vmem:[#allocation67_spill] sm:$0xff] }
 0x616   :  { %4742 = vmatpush1.bf16.msra.mxu0 %v8409_v30  ;;  %4806 = vmatpush1.bf16.msra.mxu1 %v8410_v0  ;;  %v8420_v30 = vld [vmem:[#allocation68_spill] sm:$0xff]  ;;  %v8421_v0 = vld [vmem:[#allocation69_spill] sm:$0xff] }
 0x617   :  { %4744 = vmatprep.subr.bf16.mxu0 %v8411_v57  ;;  %4808 = vmatprep.subr.bf16.mxu1 %v8412_v9  ;;  %v8422_v57 = vld [vmem:[#allocation70_spill] sm:$0xff]  ;;  %v8423_v9 = vld [vmem:[#allocation71_spill] sm:$0xff] }
 0x61a   :  { %4746 = vmatpush1.bf16.msra.mxu0 %v8413_v53  ;;  %4810 = vmatpush1.bf16.msra.mxu1 %v8414_v4  ;;  %v8424_v53 = vld [vmem:[#allocation72_spill] sm:$0xff]  ;;  %v8425_v4 = vld [vmem:[#allocation73_spill] sm:$0xff] }
 0x61b   :  { %4748 = vmatprep.subr.bf16.mxu0 %v8415_v48  ;;  %4812 = vmatprep.subr.bf16.mxu1 %v8416_v56  ;;  %v8426_v48 = vld [vmem:[#allocation74_spill] sm:$0xff]  ;;  %v8427_v56 = vld [vmem:[#allocation75_spill] sm:$0xff] }
 0x61e   :  { %4750 = vmatpush1.bf16.msra.mxu0 %v8417_v3  ;;  %4814 = vmatpush1.bf16.msra.mxu1 %v8418_v20  ;;  %v8428_v3 = vld [vmem:[#allocation76_spill] sm:$0xff]  ;;  %v8429_v20 = vld [vmem:[#allocation77_spill] sm:$0xff] }
 0x61f   :  { %4752 = vmatprep.subr.bf16.mxu0 %v8419_v7  ;;  %4816 = vmatprep.subr.bf16.mxu1 %v8420_v30  ;;  %v8430_v7 = vld [vmem:[#allocation78_spill] sm:$0xff]  ;;  %v8431_v30 = vld [vmem:[#allocation79_spill] sm:$0xff] }
 0x622   :  { %4754 = vmatpush1.bf16.msra.mxu0 %v8421_v0  ;;  %4818 = vmatpush1.bf16.msra.mxu1 %v8422_v57  ;;  %v8432_v0 = vld [vmem:[#allocation80_spill] sm:$0xff]  ;;  %v8433_v57 = vld [vmem:[#allocation81_spill] sm:$0xff] }
 0x623   :  { %4756 = vmatprep.subr.bf16.mxu0 %v8423_v9  ;;  %4820 = vmatprep.subr.bf16.mxu1 %v8424_v53  ;;  %v8434_v9 = vld [vmem:[#allocation82_spill] sm:$0xff]  ;;  %v8435_v53 = vld [vmem:[#allocation83_spill] sm:$0xff] }
 0x626   :  { %4758 = vmatpush1.bf16.msra.mxu0 %v8425_v4  ;;  %4822 = vmatpush1.bf16.msra.mxu1 %v8426_v48  ;;  %v8436_v4 = vld [vmem:[#allocation84_spill] sm:$0xff] }
 0x627   :  { %4760 = vmatprep.subr.bf16.mxu0 %v8427_v56  ;;  %4824 = vmatprep.subr.bf16.mxu1 %v8428_v3 }
 0x62a   :  { %4762 = vmatpush1.bf16.msra.mxu0 %v8429_v20  ;;  %4826 = vmatpush1.bf16.msra.mxu1 %v8430_v7  ;;  %v8437_v20 = vld [vmem:[#allocation85_spill] sm:$0xff]  ;;  %v8438_v7 = vld [vmem:[#allocation86_spill] sm:$0xff] }
 0x62b   :  { %4764 = vmatprep.subr.bf16.mxu0 %v8431_v30  ;;  %4828 = vmatprep.subr.bf16.mxu1 %v8432_v0  ;;  %v179_v58 = vmul.f32 %v8437_v20, %v90_v14  ;;  %v181_v23 = vmul.f32 %v8438_v7, %v90_v14  ;;  %v180_v30 = vmul.f32 %v8118_v63, %v90_v14  ;;  %v8439_v0 = vld [vmem:[#allocation35_spill] sm:$0xff] }
 0x62c   :  { %v182_v49 = vmul.f32 %v8439_v0, %v90_v14 }
 0x62e   :  { %4766 = vmatpush1.bf16.msra.mxu0 %v8433_v57  ;;  %4830 = vmatpush1.bf16.msra.mxu1 %v8434_v9  ;;  %v8440_v57 = vld [vmem:[#allocation87_spill] sm:$0xff]  ;;  %v282_v9 = vadd.f32 %v8229_v29, %v181_v23  ;;  %v283_v41 = vadd.f32 %v8123_v22, %v182_v49 }
 0x62f   :  { %4832 = vmatprep.subr.bf16.mxu0 %v8435_v53  ;;  %4896 = vmatprep.subr.bf16.mxu1 %v8436_v4  ;;  %v280_v26 = vadd.f32 %v8440_v57, %v179_v58  ;;  %v281_v4 = vadd.f32 %v8230_v2, %v180_v30 }
 0x684   :  { %v1978_v48 = vpop.f32.mrb[16].mxu0  ;;  %v2049_v56 = vpop.f32.mrb[16].mxu1 }
 0x685   :  { %v1980_v46 = vpop.f32.mrb[17].mxu0  ;;  %v2051_v3 = vpop.f32.mrb[17].mxu1  ;;  %v1979_v53 = vadd.f32 %v1978_v48, %v280_v26  ;;  %v2050_v32 = vadd.f32 %v2049_v56, %v282_v9  ;;  %v183_v48 = vmul.f32 %v8124_v43, %v90_v14  ;;  %v185_v9 = vmul.f32 %v8125_v42, %v90_v14 }
 0x686   :  { %v1981_v1 = vadd.f32 %v1980_v46, %v281_v4  ;;  %v2052_v61 = vadd.f32 %v2051_v3, %v283_v41  ;;  %v184_v41 = vmul.f32 %v8126_v28, %v90_v14 }
 0x687   :  { %v3349_v50 = vmul.f32 -1.442695, %v1979_v53  ;;  %v3351_v20 = vmul.f32 -1.442695, %v2050_v32  ;;  %v186_v32 = vmul.f32 %v8020_v39, %v90_v14 }
 0x688   :  { %v3350_v21 = vmul.f32 -1.442695, %v1981_v1  ;;  %v3352_v7 = vmul.f32 -1.442695, %v2052_v61  ;;  %v285_v46 = vadd.f32 %v8231_v59, %v184_v41 }
 0x689   :  { %5652 = vpow2.f32 %v3349_v50  ;;  %v286_v50 = vadd.f32 %v8022_v37, %v185_v9  ;;  %v287_v3 = vadd.f32 %v8024_v51, %v186_v32 }
 0x68a   :  { %5654 = vpow2.f32 %v3351_v20 }
 0x68b   :  { %5656 = vpow2.f32 %v3350_v21  ;;  %v284_v21 = vadd.f32 %v8021_v36, %v183_v48 }
 0x68c   :  { %5658 = vpow2.f32 %v3352_v7 }
 0x693   :  { %v5653_v0 = vpop.eup %5652 }
 0x694   :  { %v5655_v58 = vpop.eup %5654  ;;  %v2214_v26 = vadd.f32 1.0, %v5653_v0 }
 0x695   :  { %v5657_v57 = vpop.eup %5656  ;;  %v2216_v49 = vadd.f32 1.0, %v5655_v58 }
 0x696   :  { %v5659_v23 = vpop.eup %5658  ;;  %v2215_v1 = vadd.f32 1.0, %v5657_v57  ;;  %5660 = vrcp.f32 %v2214_v26 }
 0x697   :  { %v2217_v61 = vadd.f32 1.0, %v5659_v23  ;;  %5662 = vrcp.f32 %v2216_v49 }
 0x698   :  { %5664 = vrcp.f32 %v2215_v1 }
 0x699   :  { %5666 = vrcp.f32 %v2217_v61 }
 0x6a0   :  { %v5661_v23 = vpop.eup %5660 }
 0x6a1   :  { %v5663_v26 = vpop.eup %5662 }
 0x6a2   :  { %v5665_v48 = vpop.eup %5664  ;;  %v2234_v32 = vmul.f32 %v5663_v26, %v6960_v11  ;;  %v8445_v26 = vld [vmem:[#allocation125_spill] sm:$0xff] }
 0x6a3   :  { %v5667_v9 = vpop.eup %5666 }
 0x6a4   :  { %v2235_v61 = vmul.f32 %v5667_v9, %v6962_v44  ;;  %v8447_v9 = vld [vmem:[#allocation127_spill] sm:$0xff] }
 0x6c4   :  { %v2120_v53 = vpop.f32.mrb[18].mxu0  ;;  %v2191_v4 = vpop.f32.mrb[18].mxu1 }
 0x6c5   :  { %v2121_v20 = vadd.f32 %v2120_v53, %v284_v21  ;;  %v2192_v7 = vadd.f32 %v2191_v4, %v286_v50  ;;  %v2122_v30 = vpop.f32.mrb[19].mxu0  ;;  %v2193_v0 = vpop.f32.mrb[19].mxu1 }
 0x6c6   :  { %v2123_v14 = vadd.f32 %v2122_v30, %v285_v46  ;;  %v2194_v57 = vadd.f32 %v2193_v0, %v287_v3 }
 0x6c7   :  { %v3353_v56 = vmul.f32 -1.442695, %v2121_v20  ;;  %5668 = vtanh.f32 %v2192_v7 }
 0x6c8   :  { %v3354_v58 = vmul.f32 -1.442695, %v2123_v14  ;;  %5670 = vtanh.f32 %v2194_v57  ;;  %v8441_v57 = vld [vmem:[#allocation121_spill] sm:$0xff] }
 0x6c9   :  { %5672 = vpow2.f32 %v3353_v56  ;;  %v8442_v56 = vld [vmem:[#allocation122_spill] sm:$0xff] }
 0x6ca   :  { %5674 = vpow2.f32 %v3354_v58  ;;  %v8443_v58 = vld [vmem:[#allocation123_spill] sm:$0xff] }
 0x6d1   :  { %v5669_v49 = vpop.eup %5668 }
 0x6d2   :  { %v5671_v41 = vpop.eup %5670  ;;  %v2236_v1 = vmul.f32 %v5669_v49, %v5661_v23  ;;  %v8444_v23 = vld [vmem:[#allocation124_spill] sm:$0xff] }
 0x6d3   :  { %v5673_v21 = vpop.eup %5672  ;;  %v2237_v50 = vmul.f32 %v5671_v41, %v5665_v48  ;;  %v8446_v48 = vld [vmem:[#allocation126_spill] sm:$0xff]  ;;  %v8448_v49 = vld [vmem:[#allocation128_spill] sm:$0xff]  ;;  %v8449_v41 = vld [vmem:[#allocation129_spill] sm:$0xff] }
 0x6d4   :  { %v5675_v53 = vpop.eup %5674  ;;  %v2218_v4 = vadd.f32 1.0, %v5673_v21  ;;  %v7118_v46 = vadd.f32 %v2236_v1, %v2234_v32  ;;  %v8450_v32 = vld [vmem:[#allocation130_spill] sm:$0xff]  ;;  %v8451_v1 = vld [vmem:[#allocation131_spill] sm:$0xff]  ;;  %v8452_v21 = vld [vmem:[#allocation132_spill] sm:$0xff] }
 0x6d5   :  { %v2219_v3 = vadd.f32 1.0, %v5675_v53  ;;  %v7120_v20 = vadd.f32 %v2237_v50, %v2235_v61  ;;  %v8453_v61 = vld [vmem:[#allocation133_spill] sm:$0xff]  ;;  %v8454_v50 = vld [vmem:[#allocation134_spill] sm:$0xff]  ;;  %v8455_v53 = vld [vmem:[#allocation135_spill] sm:$0xff] }
 0x6d6   :  { %5676 = vrcp.f32 %v2218_v4  ;;  %v8456_v4 = vld [vmem:[#allocation136_spill] sm:$0xff] }
 0x6d7   :  { %5678 = vtanh.f32 %v7118_v46 }
 0x6d8   :  { %5680 = vrcp.f32 %v2219_v3  ;;  %v8457_v3 = vld [vmem:[#allocation137_spill] sm:$0xff] }
 0x6d9   :  { %5682 = vtanh.f32 %v7120_v20 }
 0x6e0   :  { %v5677_v7 = vpop.eup %5676 }
 0x6e1   :  { %v5679_v11 = vpop.eup %5678 }
 0x6e2   :  { %v5681_v30 = vpop.eup %5680  ;;  %v7124_v44 = vmul.f32 %v5679_v11, %v5677_v7  ;;  %v8458_v7 = vld [vmem:[#allocation138_spill] sm:$0xff]  ;;  %v8459_v11 = vld [vmem:[#allocation139_spill] sm:$0xff] }
 0x6e3   :  { %v5683_v0 = vpop.eup %5682 }
 0x6e4   :  { %v2243_v14 = vmul.f32 %v5683_v0, %v5681_v30  ;;  %v8460_v30 = vld [vmem:[#allocation140_spill] sm:$0xff]  ;;  %v8461_v0 = vld [vmem:[#allocation141_spill] sm:$0xff] }
 0x6e6   :  { %2308 = vmatprep.mubr.f32.mxu0 %v2243_v14  ;;  %2379 = vmatprep.mubr.f32.mxu1 %v2243_v14 }
 0x6e7   :  { %2309 = vmatmul.mubr.f32.vlgmr.msra.gmra.mrb[20].mxu0 %v7124_v44  ;;  %2380 = vmatmul.mubr.f32.vlgmr.msra.gmra.mrb[20].mxu1 %v7124_v44 }
 0x6e8   :  { %4834 = vmatpush1.bf16.msra.mxu0 %v8026_v52  ;;  %4898 = vmatpush1.bf16.msra.mxu1 %v8027_v6 }
 0x6e9   :  { %2450 = vmatprep.mubr.f32.mxu0 %v2243_v14  ;;  %2521 = vmatprep.mubr.f32.mxu1 %v2243_v14  ;;  %v8462_v14 = vld [vmem:[#allocation142_spill] sm:$0xff] }
 0x6ea   :  { %4836 = vmatprep.subr.bf16.mxu0 %v8028_v45  ;;  %4900 = vmatprep.subr.bf16.mxu1 %v8029_v16 }
 0x6ec   :  { %4838 = vmatpush1.bf16.msra.mxu0 %v8030_v12  ;;  %4902 = vmatpush1.bf16.msra.mxu1 %v8031_v27 }
 0x6ed   :  { %4840 = vmatprep.subr.bf16.mxu0 %v8032_v40  ;;  %4904 = vmatprep.subr.bf16.mxu1 %v8033_v31 }
 0x6f0   :  { %4842 = vmatpush1.bf16.msra.mxu0 %v8128_v10  ;;  %4906 = vmatpush1.bf16.msra.mxu1 %v8129_v13 }
 0x6f1   :  { %4844 = vmatprep.subr.bf16.mxu0 %v8130_v17  ;;  %4908 = vmatprep.subr.bf16.mxu1 %v8131_v47 }
 0x6f4   :  { %4846 = vmatpush1.bf16.msra.mxu0 %v8132_v34  ;;  %4910 = vmatpush1.bf16.msra.mxu1 %v8133_v33 }
 0x6f5   :  { %4848 = vmatprep.subr.bf16.mxu0 %v8134_v24  ;;  %4912 = vmatprep.subr.bf16.mxu1 %v8135_v19 }
 0x6f8   :  { %4850 = vmatpush1.bf16.msra.mxu0 %v8136_v15  ;;  %4914 = vmatpush1.bf16.msra.mxu1 %v8137_v5 }
 0x6f9   :  { %4852 = vmatprep.subr.bf16.mxu0 %v8232_v54  ;;  %4916 = vmatprep.subr.bf16.mxu1 %v8233_v55 }
 0x6fc   :  { %4854 = vmatpush1.bf16.msra.mxu0 %v8234_v35  ;;  %4918 = vmatpush1.bf16.msra.mxu1 %v8235_v8 }
 0x6fd   :  { %4856 = vmatprep.subr.bf16.mxu0 %v8236_v60  ;;  %4920 = vmatprep.subr.bf16.mxu1 %v8237_v25 }
 0x700   :  { %4858 = vmatpush1.bf16.msra.mxu0 %v8238_v18  ;;  %4922 = vmatpush1.bf16.msra.mxu1 %v8239_v38 }
 0x701   :  { %4860 = vmatprep.subr.bf16.mxu0 %v8240_v62  ;;  %4924 = vmatprep.subr.bf16.mxu1 %v8441_v57 }
 0x704   :  { %4862 = vmatpush1.bf16.msra.mxu0 %v8442_v56  ;;  %4926 = vmatpush1.bf16.msra.mxu1 %v8443_v58 }
 0x705   :  { %4864 = vmatprep.subr.bf16.mxu0 %v8444_v23  ;;  %4928 = vmatprep.subr.bf16.mxu1 %v8445_v26 }
 0x708   :  { %4866 = vmatpush1.bf16.msra.mxu0 %v8446_v48  ;;  %4930 = vmatpush1.bf16.msra.mxu1 %v8447_v9 }
 0x709   :  { %4868 = vmatprep.subr.bf16.mxu0 %v8448_v49  ;;  %4932 = vmatprep.subr.bf16.mxu1 %v8449_v41 }
 0x70c   :  { %4870 = vmatpush1.bf16.msra.mxu0 %v8450_v32  ;;  %4934 = vmatpush1.bf16.msra.mxu1 %v8451_v1  ;;  %v95_v1 = vpop.permute.xlu0 %94 }
 0x70d   :  { %4872 = vmatprep.subr.bf16.mxu0 %v8452_v21  ;;  %4936 = vmatprep.subr.bf16.mxu1 %v8453_v61  ;;  %v8463_v21 = vld [vmem:[#allocation143_spill] sm:$0xff]  ;;  %v8464_v61 = vld [vmem:[#allocation144_spill] sm:$0xff] }
 0x710   :  { %4874 = vmatpush1.bf16.msra.mxu0 %v8454_v50  ;;  %4938 = vmatpush1.bf16.msra.mxu1 %v8455_v53  ;;  %v8465_v50 = vld [vmem:[#allocation145_spill] sm:$0xff]  ;;  %v8466_v53 = vld [vmem:[#allocation146_spill] sm:$0xff] }
 0x711   :  { %4876 = vmatprep.subr.bf16.mxu0 %v8456_v4  ;;  %4940 = vmatprep.subr.bf16.mxu1 %v8457_v3  ;;  %v8467_v4 = vld [vmem:[#allocation147_spill] sm:$0xff]  ;;  %v8468_v3 = vld [vmem:[#allocation148_spill] sm:$0xff] }
 0x714   :  { %4878 = vmatpush1.bf16.msra.mxu0 %v8458_v7  ;;  %4942 = vmatpush1.bf16.msra.mxu1 %v8459_v11  ;;  %v8469_v7 = vld [vmem:[#allocation149_spill] sm:$0xff]  ;;  %v8470_v11 = vld [vmem:[#allocation150_spill] sm:$0xff] }
 0x715   :  { %4880 = vmatprep.subr.bf16.mxu0 %v8460_v30  ;;  %4944 = vmatprep.subr.bf16.mxu1 %v8461_v0  ;;  %v8471_v30 = vld [vmem:[#allocation151_spill] sm:$0xff]  ;;  %v8472_v0 = vld [vmem:[#allocation152_spill] sm:$0xff] }
 0x718   :  { %4882 = vmatpush1.bf16.msra.mxu0 %v8462_v14  ;;  %4946 = vmatpush1.bf16.msra.mxu1 %v8463_v21  ;;  %v8473_v14 = vld [vmem:[#allocation153_spill] sm:$0xff]  ;;  %v8474_v21 = vld [vmem:[#allocation154_spill] sm:$0xff] }
 0x719   :  { %4884 = vmatprep.subr.bf16.mxu0 %v8464_v61  ;;  %4948 = vmatprep.subr.bf16.mxu1 %v8465_v50  ;;  %v8475_v61 = vld [vmem:[#allocation155_spill] sm:$0xff] }
 0x71a   :  { %v8476_v50 = vld [vmem:[#allocation11_spill] sm:$0xff] }
 0x71c   :  { %4886 = vmatpush1.bf16.msra.mxu0 %v8466_v53  ;;  %4950 = vmatpush1.bf16.msra.mxu1 %v8467_v4  ;;  %v8477_v53 = vld [vmem:[#allocation12_spill] sm:$0xff] }
 0x71d   :  { %4888 = vmatprep.subr.bf16.mxu0 %v8468_v3  ;;  %4952 = vmatprep.subr.bf16.mxu1 %v8469_v7  ;;  %v8478_v7 = vld [vmem:[#allocation13_spill] sm:$0xff]  ;;  %v8487_v3 = vld [vmem:[#allocation22_spill] sm:$0xff] }
 0x720   :  { %4890 = vmatpush1.bf16.msra.mxu0 %v8470_v11  ;;  %4954 = vmatpush1.bf16.msra.mxu1 %v8471_v30  ;;  %v8479_v11 = vld [vmem:[#allocation14_spill] sm:$0xff]  ;;  %v8480_v30 = vld [vmem:[#allocation15_spill] sm:$0xff] }
 0x721   :  { %4892 = vmatprep.subr.bf16.mxu0 %v8472_v0  ;;  %4956 = vmatprep.subr.bf16.mxu1 %v8473_v14  ;;  %v8481_v0 = vld [vmem:[#allocation16_spill] sm:$0xff]  ;;  %v8482_v14 = vld [vmem:[#allocation17_spill] sm:$0xff] }
 0x724   :  { %4894 = vmatpush1.bf16.msra.mxu0 %v8474_v21  ;;  %4958 = vmatpush1.bf16.msra.mxu1 %v8475_v61  ;;  %v8483_v21 = vld [vmem:[#allocation18_spill] sm:$0xff]  ;;  %v8484_v61 = vld [vmem:[#allocation19_spill] sm:$0xff] }
 0x725   :  { %4960 = vmatprep.subr.bf16.mxu0 %v8476_v50  ;;  %5024 = vmatprep.subr.bf16.mxu1 %v8477_v53  ;;  %v8485_v50 = vld [vmem:[#allocation20_spill] sm:$0xff]  ;;  %v8486_v53 = vld [vmem:[#allocation21_spill] sm:$0xff] }
 0x727   :  { %2451 = vmatmul.mubr.f32.vlgmr.msra.gmra.mrb[22].mxu0 %v7124_v44  ;;  %2522 = vmatmul.mubr.f32.vlgmr.msra.gmra.mrb[22].mxu1 %v7124_v44  ;;  %v8488_v44 = vld [vmem:[#allocation23_spill] sm:$0xff] }
 0x728   :  { %4962 = vmatpush1.bf16.msra.mxu0 %v8478_v7  ;;  %5026 = vmatpush1.bf16.msra.mxu1 %v8479_v11  ;;  %v8489_v7 = vld [vmem:[#allocation24_spill] sm:$0xff]  ;;  %v8490_v11 = vld [vmem:[#allocation25_spill] sm:$0xff] }
 0x729   :  { %4964 = vmatprep.subr.bf16.mxu0 %v8480_v30  ;;  %5028 = vmatprep.subr.bf16.mxu1 %v8481_v0  ;;  %v8491_v30 = vld [vmem:[#allocation26_spill] sm:$0xff]  ;;  %v8492_v0 = vld [vmem:[#allocation27_spill] sm:$0xff] }
 0x72c   :  { %4966 = vmatpush1.bf16.msra.mxu0 %v8482_v14  ;;  %5030 = vmatpush1.bf16.msra.mxu1 %v8483_v21  ;;  %v8493_v14 = vld [vmem:[#allocation28_spill] sm:$0xff]  ;;  %v8494_v21 = vld [vmem:[#allocation29_spill] sm:$0xff] }
 0x72d   :  { %4968 = vmatprep.subr.bf16.mxu0 %v8484_v61  ;;  %5032 = vmatprep.subr.bf16.mxu1 %v8485_v50  ;;  %v8495_v61 = vld [vmem:[#allocation30_spill] sm:$0xff]  ;;  %v8496_v50 = vld [vmem:[#allocation31_spill] sm:$0xff] }
 0x730   :  { %4970 = vmatpush1.bf16.msra.mxu0 %v8486_v53  ;;  %5034 = vmatpush1.bf16.msra.mxu1 %v8487_v3  ;;  %v8497_v53 = vld [vmem:[#allocation33_spill] sm:$0xff] }
 0x731   :  { %4972 = vmatprep.subr.bf16.mxu0 %v8488_v44  ;;  %5036 = vmatprep.subr.bf16.mxu1 %v8489_v7  ;;  %v8498_v3 = vld [vmem:[#allocation41_spill] sm:$0xff]  ;;  %v8499_v44 = vld [vmem:[#allocation42_spill] sm:$0xff]  ;;  %v8500_v7 = vld [vmem:[#allocation43_spill] sm:$0xff] }
 0x734   :  { %4974 = vmatpush1.bf16.msra.mxu0 %v8490_v11  ;;  %5038 = vmatpush1.bf16.msra.mxu1 %v8491_v30  ;;  %v8501_v11 = vld [vmem:[#allocation44_spill] sm:$0xff]  ;;  %v8502_v30 = vld [vmem:[#allocation45_spill] sm:$0xff] }
 0x735   :  { %4976 = vmatprep.subr.bf16.mxu0 %v8492_v0  ;;  %5040 = vmatprep.subr.bf16.mxu1 %v8493_v14  ;;  %v8503_v0 = vld [vmem:[#allocation46_spill] sm:$0xff]  ;;  %v8504_v14 = vld [vmem:[#allocation47_spill] sm:$0xff] }
 0x738   :  { %4978 = vmatpush1.bf16.msra.mxu0 %v8494_v21  ;;  %5042 = vmatpush1.bf16.msra.mxu1 %v8495_v61  ;;  %v8505_v21 = vld [vmem:[#allocation48_spill] sm:$0xff]  ;;  %v8506_v61 = vld [vmem:[#allocation49_spill] sm:$0xff] }
 0x739   :  { %4980 = vmatprep.subr.bf16.mxu0 %v8496_v50  ;;  %5044 = vmatprep.subr.bf16.mxu1 %v8497_v53  ;;  %v8507_v50 = vld [vmem:[#allocation50_spill] sm:$0xff]  ;;  %v8508_v53 = vld [vmem:[#allocation51_spill] sm:$0xff] }
 0x73c   :  { %4982 = vmatpush1.bf16.msra.mxu0 %v8498_v3  ;;  %5046 = vmatpush1.bf16.msra.mxu1 %v8499_v44  ;;  %v8509_v3 = vld [vmem:[#allocation52_spill] sm:$0xff]  ;;  %v8510_v44 = vld [vmem:[#allocation53_spill] sm:$0xff] }
 0x73d   :  { %4984 = vmatprep.subr.bf16.mxu0 %v8500_v7  ;;  %5048 = vmatprep.subr.bf16.mxu1 %v8501_v11  ;;  %v8511_v7 = vld [vmem:[#allocation54_spill] sm:$0xff]  ;;  %v8512_v11 = vld [vmem:[#allocation55_spill] sm:$0xff] }
 0x740   :  { %4986 = vmatpush1.bf16.msra.mxu0 %v8502_v30  ;;  %5050 = vmatpush1.bf16.msra.mxu1 %v8503_v0  ;;  %v8513_v30 = vld [vmem:[#allocation56_spill] sm:$0xff]  ;;  %v8514_v0 = vld [vmem:[#allocation57_spill] sm:$0xff] }
 0x741   :  { %4988 = vmatprep.subr.bf16.mxu0 %v8504_v14  ;;  %5052 = vmatprep.subr.bf16.mxu1 %v8505_v21  ;;  %v8515_v14 = vld [vmem:[#allocation58_spill] sm:$0xff]  ;;  %v8516_v21 = vld [vmem:[#allocation59_spill] sm:$0xff] }
 0x744   :  { %4990 = vmatpush1.bf16.msra.mxu0 %v8506_v61  ;;  %5054 = vmatpush1.bf16.msra.mxu1 %v8507_v50  ;;  %v8517_v61 = vld [vmem:[#allocation60_spill] sm:$0xff]  ;;  %v8518_v50 = vld [vmem:[#allocation61_spill] sm:$0xff] }
 0x745   :  { %4992 = vmatprep.subr.bf16.mxu0 %v8508_v53  ;;  %5056 = vmatprep.subr.bf16.mxu1 %v8509_v3  ;;  %v8519_v53 = vld [vmem:[#allocation62_spill] sm:$0xff]  ;;  %v8520_v3 = vld [vmem:[#allocation63_spill] sm:$0xff] }
 0x748   :  { %4994 = vmatpush1.bf16.msra.mxu0 %v8510_v44  ;;  %5058 = vmatpush1.bf16.msra.mxu1 %v8511_v7  ;;  %v8521_v44 = vld [vmem:[#allocation64_spill] sm:$0xff]  ;;  %v8522_v7 = vld [vmem:[#allocation65_spill] sm:$0xff] }
 0x749   :  { %4996 = vmatprep.subr.bf16.mxu0 %v8512_v11  ;;  %5060 = vmatprep.subr.bf16.mxu1 %v8513_v30  ;;  %v8523_v11 = vld [vmem:[#allocation66_spill] sm:$0xff]  ;;  %v8524_v30 = vld [vmem:[#allocation67_spill] sm:$0xff] }
 0x74c   :  { %4998 = vmatpush1.bf16.msra.mxu0 %v8514_v0  ;;  %5062 = vmatpush1.bf16.msra.mxu1 %v8515_v14  ;;  %v8525_v0 = vld [vmem:[#allocation68_spill] sm:$0xff]  ;;  %v8526_v14 = vld [vmem:[#allocation69_spill] sm:$0xff] }
 0x74d   :  { %5000 = vmatprep.subr.bf16.mxu0 %v8516_v21  ;;  %5064 = vmatprep.subr.bf16.mxu1 %v8517_v61  ;;  %v8527_v21 = vld [vmem:[#allocation70_spill] sm:$0xff]  ;;  %v8528_v61 = vld [vmem:[#allocation71_spill] sm:$0xff] }
 0x750   :  { %5002 = vmatpush1.bf16.msra.mxu0 %v8518_v50  ;;  %5066 = vmatpush1.bf16.msra.mxu1 %v8519_v53  ;;  %v8529_v50 = vld [vmem:[#allocation72_spill] sm:$0xff]  ;;  %v8530_v53 = vld [vmem:[#allocation73_spill] sm:$0xff] }
 0x751   :  { %5004 = vmatprep.subr.bf16.mxu0 %v8520_v3  ;;  %5068 = vmatprep.subr.bf16.mxu1 %v8521_v44  ;;  %v8531_v3 = vld [vmem:[#allocation74_spill] sm:$0xff]  ;;  %v8532_v44 = vld [vmem:[#allocation75_spill] sm:$0xff] }
 0x754   :  { %5006 = vmatpush1.bf16.msra.mxu0 %v8522_v7  ;;  %5070 = vmatpush1.bf16.msra.mxu1 %v8523_v11  ;;  %v8533_v7 = vld [vmem:[#allocation76_spill] sm:$0xff]  ;;  %v8534_v11 = vld [vmem:[#allocation77_spill] sm:$0xff] }
 0x755   :  { %5008 = vmatprep.subr.bf16.mxu0 %v8524_v30  ;;  %5072 = vmatprep.subr.bf16.mxu1 %v8525_v0  ;;  %v8535_v30 = vld [vmem:[#allocation78_spill] sm:$0xff]  ;;  %v8536_v0 = vld [vmem:[#allocation79_spill] sm:$0xff] }
 0x758   :  { %5010 = vmatpush1.bf16.msra.mxu0 %v8526_v14  ;;  %5074 = vmatpush1.bf16.msra.mxu1 %v8527_v21  ;;  %v8537_v14 = vld [vmem:[#allocation80_spill] sm:$0xff]  ;;  %v8538_v21 = vld [vmem:[#allocation81_spill] sm:$0xff] }
 0x759   :  { %5012 = vmatprep.subr.bf16.mxu0 %v8528_v61  ;;  %5076 = vmatprep.subr.bf16.mxu1 %v8529_v50  ;;  %v8539_v61 = vld [vmem:[#allocation82_spill] sm:$0xff]  ;;  %v8540_v50 = vld [vmem:[#allocation83_spill] sm:$0xff] }
 0x75c   :  { %5014 = vmatpush1.bf16.msra.mxu0 %v8530_v53  ;;  %5078 = vmatpush1.bf16.msra.mxu1 %v8531_v3  ;;  %v8541_v53 = vld [vmem:[#allocation84_spill] sm:$0xff] }
 0x75d   :  { %5016 = vmatprep.subr.bf16.mxu0 %v8532_v44  ;;  %5080 = vmatprep.subr.bf16.mxu1 %v8533_v7 }
 0x760   :  { %5018 = vmatpush1.bf16.msra.mxu0 %v8534_v11  ;;  %5082 = vmatpush1.bf16.msra.mxu1 %v8535_v30  ;;  %v8542_v11 = vld [vmem:[#allocation85_spill] sm:$0xff]  ;;  %v8543_v30 = vld [vmem:[#allocation86_spill] sm:$0xff] }
 0x761   :  { %5020 = vmatprep.subr.bf16.mxu0 %v8536_v0  ;;  %5084 = vmatprep.subr.bf16.mxu1 %v8537_v14  ;;  %v187_v32 = vmul.f32 %v8542_v11, %v95_v1  ;;  %v189_v41 = vmul.f32 %v8543_v30, %v95_v1  ;;  %v188_v0 = vmul.f32 %v8118_v63, %v95_v1  ;;  %v8544_v14 = vld [vmem:[#allocation35_spill] sm:$0xff] }
 0x762   :  { %v190_v49 = vmul.f32 %v8544_v14, %v95_v1 }
 0x764   :  { %5022 = vmatpush1.bf16.msra.mxu0 %v8538_v21  ;;  %5086 = vmatpush1.bf16.msra.mxu1 %v8539_v61  ;;  %v8545_v21 = vld [vmem:[#allocation87_spill] sm:$0xff]  ;;  %v290_v61 = vadd.f32 %v8229_v29, %v189_v41  ;;  %v291_v26 = vadd.f32 %v8123_v22, %v190_v49 }
 0x765   :  { %5088 = vmatprep.subr.bf16.mxu0 %v8540_v50  ;;  %5152 = vmatprep.subr.bf16.mxu1 %v8541_v53  ;;  %v288_v9 = vadd.f32 %v8545_v21, %v187_v32  ;;  %v289_v53 = vadd.f32 %v8230_v2, %v188_v0 }
 0x7ba   :  { %v2310_v3 = vpop.f32.mrb[20].mxu0  ;;  %v2381_v44 = vpop.f32.mrb[20].mxu1 }
 0x7bb   :  { %v2312_v4 = vpop.f32.mrb[21].mxu0  ;;  %v2383_v7 = vpop.f32.mrb[21].mxu1  ;;  %v2311_v50 = vadd.f32 %v2310_v3, %v288_v9  ;;  %v2382_v48 = vadd.f32 %v2381_v44, %v290_v61  ;;  %v191_v3 = vmul.f32 %v8124_v43, %v95_v1  ;;  %v193_v61 = vmul.f32 %v8125_v42, %v95_v1 }
 0x7bc   :  { %v2313_v23 = vadd.f32 %v2312_v4, %v289_v53  ;;  %v2384_v58 = vadd.f32 %v2383_v7, %v291_v26  ;;  %v192_v26 = vmul.f32 %v8126_v28, %v95_v1 }
 0x7bd   :  { %v3355_v56 = vmul.f32 -1.442695, %v2311_v50  ;;  %v3357_v11 = vmul.f32 -1.442695, %v2382_v48  ;;  %v194_v48 = vmul.f32 %v8020_v39, %v95_v1 }
 0x7be   :  { %v3356_v57 = vmul.f32 -1.442695, %v2313_v23  ;;  %v3358_v30 = vmul.f32 -1.442695, %v2384_v58  ;;  %v293_v4 = vadd.f32 %v8231_v59, %v192_v26 }
 0x7bf   :  { %5684 = vpow2.f32 %v3355_v56  ;;  %v294_v56 = vadd.f32 %v8022_v37, %v193_v61  ;;  %v295_v7 = vadd.f32 %v8024_v51, %v194_v48 }
 0x7c0   :  { %5686 = vpow2.f32 %v3357_v11 }
 0x7c1   :  { %5688 = vpow2.f32 %v3356_v57  ;;  %v292_v57 = vadd.f32 %v8021_v36, %v191_v3 }
 0x7c2   :  { %5690 = vpow2.f32 %v3358_v30 }
 0x7c9   :  { %v5685_v14 = vpop.eup %5684 }
 0x7ca   :  { %v5687_v32 = vpop.eup %5686  ;;  %v2546_v9 = vadd.f32 1.0, %v5685_v14 }
 0x7cb   :  { %v5689_v21 = vpop.eup %5688  ;;  %v2548_v49 = vadd.f32 1.0, %v5687_v32 }
 0x7cc   :  { %v5691_v41 = vpop.eup %5690  ;;  %v2547_v23 = vadd.f32 1.0, %v5689_v21  ;;  %5692 = vrcp.f32 %v2546_v9 }
 0x7cd   :  { %v2549_v58 = vadd.f32 1.0, %v5691_v41  ;;  %5694 = vrcp.f32 %v2548_v49 }
 0x7ce   :  { %5696 = vrcp.f32 %v2547_v23 }
 0x7cf   :  { %5698 = vrcp.f32 %v2549_v58 }
 0x7d6   :  { %v5693_v41 = vpop.eup %5692 }
 0x7d7   :  { %v5695_v9 = vpop.eup %5694 }
 0x7d8   :  { %v5697_v3 = vpop.eup %5696  ;;  %v2566_v48 = vmul.f32 %v5695_v9, %v7118_v46  ;;  %v8550_v9 = vld [vmem:[#allocation125_spill] sm:$0xff] }
 0x7d9   :  { %v5699_v61 = vpop.eup %5698 }
 0x7da   :  { %v2567_v58 = vmul.f32 %v5699_v61, %v7120_v20  ;;  %v8552_v61 = vld [vmem:[#allocation127_spill] sm:$0xff] }
 0x7fa   :  { %v2452_v50 = vpop.f32.mrb[22].mxu0  ;;  %v2523_v53 = vpop.f32.mrb[22].mxu1 }
 0x7fb   :  { %v2453_v11 = vadd.f32 %v2452_v50, %v292_v57  ;;  %v2524_v30 = vadd.f32 %v2523_v53, %v294_v56  ;;  %v2454_v0 = vpop.f32.mrb[23].mxu0  ;;  %v2525_v14 = vpop.f32.mrb[23].mxu1 }
 0x7fc   :  { %v2455_v1 = vadd.f32 %v2454_v0, %v293_v4  ;;  %v2526_v21 = vadd.f32 %v2525_v14, %v295_v7 }
 0x7fd   :  { %v3359_v44 = vmul.f32 -1.442695, %v2453_v11  ;;  %5700 = vtanh.f32 %v2524_v30 }
 0x7fe   :  { %v3360_v32 = vmul.f32 -1.442695, %v2455_v1  ;;  %5702 = vtanh.f32 %v2526_v21  ;;  %v8546_v21 = vld [vmem:[#allocation121_spill] sm:$0xff] }
 0x7ff   :  { %5704 = vpow2.f32 %v3359_v44  ;;  %v8547_v44 = vld [vmem:[#allocation122_spill] sm:$0xff] }
 0x800   :  { %5706 = vpow2.f32 %v3360_v32  ;;  %v8548_v32 = vld [vmem:[#allocation123_spill] sm:$0xff] }
 0x807   :  { %v5701_v49 = vpop.eup %5700 }
 0x808   :  { %v5703_v26 = vpop.eup %5702  ;;  %v2568_v23 = vmul.f32 %v5701_v49, %v5693_v41  ;;  %v8549_v41 = vld [vmem:[#allocation124_spill] sm:$0xff] }
 0x809   :  { %v5705_v57 = vpop.eup %5704  ;;  %v2569_v56 = vmul.f32 %v5703_v26, %v5697_v3  ;;  %v8551_v3 = vld [vmem:[#allocation126_spill] sm:$0xff]  ;;  %v8553_v49 = vld [vmem:[#allocation128_spill] sm:$0xff]  ;;  %v8554_v26 = vld [vmem:[#allocation129_spill] sm:$0xff] }
 0x80a   :  { %v5707_v50 = vpop.eup %5706  ;;  %v2550_v53 = vadd.f32 1.0, %v5705_v57  ;;  %v7276_v4 = vadd.f32 %v2568_v23, %v2566_v48  ;;  %v8555_v48 = vld [vmem:[#allocation130_spill] sm:$0xff]  ;;  %v8556_v23 = vld [vmem:[#allocation131_spill] sm:$0xff]  ;;  %v8557_v57 = vld [vmem:[#allocation132_spill] sm:$0xff] }
 0x80b   :  { %v2551_v7 = vadd.f32 1.0, %v5707_v50  ;;  %v7278_v11 = vadd.f32 %v2569_v56, %v2567_v58  ;;  %v8558_v58 = vld [vmem:[#allocation133_spill] sm:$0xff]  ;;  %v8559_v56 = vld [vmem:[#allocation134_spill] sm:$0xff]  ;;  %v8560_v50 = vld [vmem:[#allocation135_spill] sm:$0xff] }
 0x80c   :  { %5708 = vrcp.f32 %v2550_v53  ;;  %v8561_v53 = vld [vmem:[#allocation136_spill] sm:$0xff] }
 0x80d   :  { %5710 = vtanh.f32 %v7276_v4 }
 0x80e   :  { %5712 = vrcp.f32 %v2551_v7  ;;  %v8562_v7 = vld [vmem:[#allocation137_spill] sm:$0xff] }
 0x80f   :  { %5714 = vtanh.f32 %v7278_v11 }
 0x816   :  { %v5709_v30 = vpop.eup %5708 }
 0x817   :  { %v5711_v46 = vpop.eup %5710 }
 0x818   :  { %v5713_v0 = vpop.eup %5712  ;;  %v7282_v20 = vmul.f32 %v5711_v46, %v5709_v30  ;;  %v8563_v30 = vld [vmem:[#allocation138_spill] sm:$0xff]  ;;  %v8564_v46 = vld [vmem:[#allocation139_spill] sm:$0xff] }
 0x819   :  { %v5715_v14 = vpop.eup %5714 }
 0x81a   :  { %v2575_v1 = vmul.f32 %v5715_v14, %v5713_v0  ;;  %v8565_v0 = vld [vmem:[#allocation140_spill] sm:$0xff]  ;;  %v8566_v14 = vld [vmem:[#allocation141_spill] sm:$0xff] }
 0x81c   :  { %2640 = vmatprep.mubr.f32.mxu0 %v2575_v1  ;;  %2711 = vmatprep.mubr.f32.mxu1 %v2575_v1 }
 0x81d   :  { %2641 = vmatmul.mubr.f32.vlgmr.msra.gmra.mrb[24].mxu0 %v7282_v20  ;;  %2712 = vmatmul.mubr.f32.vlgmr.msra.gmra.mrb[24].mxu1 %v7282_v20 }
 0x81e   :  { %5090 = vmatpush1.bf16.msra.mxu0 %v8026_v52  ;;  %5154 = vmatpush1.bf16.msra.mxu1 %v8027_v6 }
 0x81f   :  { %2782 = vmatprep.mubr.f32.mxu0 %v2575_v1  ;;  %2853 = vmatprep.mubr.f32.mxu1 %v2575_v1  ;;  %v8567_v1 = vld [vmem:[#allocation142_spill] sm:$0xff] }
 0x820   :  { %5092 = vmatprep.subr.bf16.mxu0 %v8028_v45  ;;  %5156 = vmatprep.subr.bf16.mxu1 %v8029_v16 }
 0x822   :  { %5094 = vmatpush1.bf16.msra.mxu0 %v8030_v12  ;;  %5158 = vmatpush1.bf16.msra.mxu1 %v8031_v27 }
 0x823   :  { %5096 = vmatprep.subr.bf16.mxu0 %v8032_v40  ;;  %5160 = vmatprep.subr.bf16.mxu1 %v8033_v31 }
 0x826   :  { %5098 = vmatpush1.bf16.msra.mxu0 %v8128_v10  ;;  %5162 = vmatpush1.bf16.msra.mxu1 %v8129_v13 }
 0x827   :  { %5100 = vmatprep.subr.bf16.mxu0 %v8130_v17  ;;  %5164 = vmatprep.subr.bf16.mxu1 %v8131_v47 }
 0x82a   :  { %5102 = vmatpush1.bf16.msra.mxu0 %v8132_v34  ;;  %5166 = vmatpush1.bf16.msra.mxu1 %v8133_v33 }
 0x82b   :  { %5104 = vmatprep.subr.bf16.mxu0 %v8134_v24  ;;  %5168 = vmatprep.subr.bf16.mxu1 %v8135_v19 }
 0x82e   :  { %5106 = vmatpush1.bf16.msra.mxu0 %v8136_v15  ;;  %5170 = vmatpush1.bf16.msra.mxu1 %v8137_v5 }
 0x82f   :  { %5108 = vmatprep.subr.bf16.mxu0 %v8232_v54  ;;  %5172 = vmatprep.subr.bf16.mxu1 %v8233_v55 }
 0x832   :  { %5110 = vmatpush1.bf16.msra.mxu0 %v8234_v35  ;;  %5174 = vmatpush1.bf16.msra.mxu1 %v8235_v8 }
 0x833   :  { %5112 = vmatprep.subr.bf16.mxu0 %v8236_v60  ;;  %5176 = vmatprep.subr.bf16.mxu1 %v8237_v25 }
 0x836   :  { %5114 = vmatpush1.bf16.msra.mxu0 %v8238_v18  ;;  %5178 = vmatpush1.bf16.msra.mxu1 %v8239_v38 }
 0x837   :  { %5116 = vmatprep.subr.bf16.mxu0 %v8240_v62  ;;  %5180 = vmatprep.subr.bf16.mxu1 %v8546_v21 }
 0x83a   :  { %5118 = vmatpush1.bf16.msra.mxu0 %v8547_v44  ;;  %5182 = vmatpush1.bf16.msra.mxu1 %v8548_v32 }
 0x83b   :  { %5120 = vmatprep.subr.bf16.mxu0 %v8549_v41  ;;  %5184 = vmatprep.subr.bf16.mxu1 %v8550_v9 }
 0x83e   :  { %5122 = vmatpush1.bf16.msra.mxu0 %v8551_v3  ;;  %5186 = vmatpush1.bf16.msra.mxu1 %v8552_v61 }
 0x83f   :  { %5124 = vmatprep.subr.bf16.mxu0 %v8553_v49  ;;  %5188 = vmatprep.subr.bf16.mxu1 %v8554_v26 }
 0x842   :  { %5126 = vmatpush1.bf16.msra.mxu0 %v8555_v48  ;;  %5190 = vmatpush1.bf16.msra.mxu1 %v8556_v23  ;;  %v100_v23 = vpop.permute.xlu1 %99 }
 0x843   :  { %5128 = vmatprep.subr.bf16.mxu0 %v8557_v57  ;;  %5192 = vmatprep.subr.bf16.mxu1 %v8558_v58  ;;  %v8568_v57 = vld [vmem:[#allocation143_spill] sm:$0xff]  ;;  %v8569_v58 = vld [vmem:[#allocation144_spill] sm:$0xff] }
 0x846   :  { %5130 = vmatpush1.bf16.msra.mxu0 %v8559_v56  ;;  %5194 = vmatpush1.bf16.msra.mxu1 %v8560_v50  ;;  %v8570_v56 = vld [vmem:[#allocation145_spill] sm:$0xff]  ;;  %v8571_v50 = vld [vmem:[#allocation146_spill] sm:$0xff] }
 0x847   :  { %5132 = vmatprep.subr.bf16.mxu0 %v8561_v53  ;;  %5196 = vmatprep.subr.bf16.mxu1 %v8562_v7  ;;  %v8572_v53 = vld [vmem:[#allocation147_spill] sm:$0xff]  ;;  %v8573_v7 = vld [vmem:[#allocation148_spill] sm:$0xff] }
 0x84a   :  { %5134 = vmatpush1.bf16.msra.mxu0 %v8563_v30  ;;  %5198 = vmatpush1.bf16.msra.mxu1 %v8564_v46  ;;  %v8574_v30 = vld [vmem:[#allocation149_spill] sm:$0xff]  ;;  %v8575_v46 = vld [vmem:[#allocation150_spill] sm:$0xff] }
 0x84b   :  { %5136 = vmatprep.subr.bf16.mxu0 %v8565_v0  ;;  %5200 = vmatprep.subr.bf16.mxu1 %v8566_v14  ;;  %v8576_v0 = vld [vmem:[#allocation151_spill] sm:$0xff]  ;;  %v8577_v14 = vld [vmem:[#allocation152_spill] sm:$0xff] }
 0x84e   :  { %5138 = vmatpush1.bf16.msra.mxu0 %v8567_v1  ;;  %5202 = vmatpush1.bf16.msra.mxu1 %v8568_v57  ;;  %v8578_v1 = vld [vmem:[#allocation153_spill] sm:$0xff]  ;;  %v8579_v57 = vld [vmem:[#allocation154_spill] sm:$0xff] }
 0x84f   :  { %5140 = vmatprep.subr.bf16.mxu0 %v8569_v58  ;;  %5204 = vmatprep.subr.bf16.mxu1 %v8570_v56  ;;  %v8580_v58 = vld [vmem:[#allocation155_spill] sm:$0xff] }
 0x850   :  { %v8581_v56 = vld [vmem:[#allocation11_spill] sm:$0xff] }
 0x852   :  { %5142 = vmatpush1.bf16.msra.mxu0 %v8571_v50  ;;  %5206 = vmatpush1.bf16.msra.mxu1 %v8572_v53  ;;  %v8582_v50 = vld [vmem:[#allocation12_spill] sm:$0xff] }
 0x853   :  { %5144 = vmatprep.subr.bf16.mxu0 %v8573_v7  ;;  %5208 = vmatprep.subr.bf16.mxu1 %v8574_v30  ;;  %v8583_v30 = vld [vmem:[#allocation13_spill] sm:$0xff]  ;;  %v8592_v7 = vld [vmem:[#allocation22_spill] sm:$0xff] }
 0x856   :  { %5146 = vmatpush1.bf16.msra.mxu0 %v8575_v46  ;;  %5210 = vmatpush1.bf16.msra.mxu1 %v8576_v0  ;;  %v8584_v46 = vld [vmem:[#allocation14_spill] sm:$0xff]  ;;  %v8585_v0 = vld [vmem:[#allocation15_spill] sm:$0xff] }
 0x857   :  { %5148 = vmatprep.subr.bf16.mxu0 %v8577_v14  ;;  %5212 = vmatprep.subr.bf16.mxu1 %v8578_v1  ;;  %v8586_v14 = vld [vmem:[#allocation16_spill] sm:$0xff]  ;;  %v8587_v1 = vld [vmem:[#allocation17_spill] sm:$0xff] }
 0x85a   :  { %5150 = vmatpush1.bf16.msra.mxu0 %v8579_v57  ;;  %5214 = vmatpush1.bf16.msra.mxu1 %v8580_v58  ;;  %v8588_v57 = vld [vmem:[#allocation18_spill] sm:$0xff]  ;;  %v8589_v58 = vld [vmem:[#allocation19_spill] sm:$0xff] }
 0x85b   :  { %5216 = vmatprep.subr.bf16.mxu0 %v8581_v56  ;;  %5280 = vmatprep.subr.bf16.mxu1 %v8582_v50  ;;  %v8590_v56 = vld [vmem:[#allocation20_spill] sm:$0xff]  ;;  %v8591_v50 = vld [vmem:[#allocation21_spill] sm:$0xff] }
 0x85d   :  { %2783 = vmatmul.mubr.f32.vlgmr.msra.gmra.mrb[26].mxu0 %v7282_v20  ;;  %2854 = vmatmul.mubr.f32.vlgmr.msra.gmra.mrb[26].mxu1 %v7282_v20  ;;  %v8593_v20 = vld [vmem:[#allocation23_spill] sm:$0xff] }
 0x85e   :  { %5218 = vmatpush1.bf16.msra.mxu0 %v8583_v30  ;;  %5282 = vmatpush1.bf16.msra.mxu1 %v8584_v46  ;;  %v8594_v30 = vld [vmem:[#allocation24_spill] sm:$0xff]  ;;  %v8595_v46 = vld [vmem:[#allocation25_spill] sm:$0xff] }
 0x85f   :  { %5220 = vmatprep.subr.bf16.mxu0 %v8585_v0  ;;  %5284 = vmatprep.subr.bf16.mxu1 %v8586_v14  ;;  %v8596_v0 = vld [vmem:[#allocation26_spill] sm:$0xff]  ;;  %v8597_v14 = vld [vmem:[#allocation27_spill] sm:$0xff] }
 0x862   :  { %5222 = vmatpush1.bf16.msra.mxu0 %v8587_v1  ;;  %5286 = vmatpush1.bf16.msra.mxu1 %v8588_v57  ;;  %v8598_v1 = vld [vmem:[#allocation28_spill] sm:$0xff]  ;;  %v8599_v57 = vld [vmem:[#allocation29_spill] sm:$0xff] }
 0x863   :  { %5224 = vmatprep.subr.bf16.mxu0 %v8589_v58  ;;  %5288 = vmatprep.subr.bf16.mxu1 %v8590_v56  ;;  %v8600_v58 = vld [vmem:[#allocation30_spill] sm:$0xff]  ;;  %v8601_v56 = vld [vmem:[#allocation31_spill] sm:$0xff] }
 0x866   :  { %5226 = vmatpush1.bf16.msra.mxu0 %v8591_v50  ;;  %5290 = vmatpush1.bf16.msra.mxu1 %v8592_v7  ;;  %v8602_v50 = vld [vmem:[#allocation33_spill] sm:$0xff] }
 0x867   :  { %5228 = vmatprep.subr.bf16.mxu0 %v8593_v20  ;;  %5292 = vmatprep.subr.bf16.mxu1 %v8594_v30  ;;  %v8603_v7 = vld [vmem:[#allocation41_spill] sm:$0xff]  ;;  %v8604_v20 = vld [vmem:[#allocation42_spill] sm:$0xff]  ;;  %v8605_v30 = vld [vmem:[#allocation43_spill] sm:$0xff] }
 0x86a   :  { %5230 = vmatpush1.bf16.msra.mxu0 %v8595_v46  ;;  %5294 = vmatpush1.bf16.msra.mxu1 %v8596_v0  ;;  %v8606_v46 = vld [vmem:[#allocation44_spill] sm:$0xff]  ;;  %v8607_v0 = vld [vmem:[#allocation45_spill] sm:$0xff] }
 0x86b   :  { %5232 = vmatprep.subr.bf16.mxu0 %v8597_v14  ;;  %5296 = vmatprep.subr.bf16.mxu1 %v8598_v1  ;;  %v8608_v14 = vld [vmem:[#allocation46_spill] sm:$0xff]  ;;  %v8609_v1 = vld [vmem:[#allocation47_spill] sm:$0xff] }
 0x86e   :  { %5234 = vmatpush1.bf16.msra.mxu0 %v8599_v57  ;;  %5298 = vmatpush1.bf16.msra.mxu1 %v8600_v58  ;;  %v8610_v57 = vld [vmem:[#allocation48_spill] sm:$0xff]  ;;  %v8611_v58 = vld [vmem:[#allocation49_spill] sm:$0xff] }
 0x86f   :  { %5236 = vmatprep.subr.bf16.mxu0 %v8601_v56  ;;  %5300 = vmatprep.subr.bf16.mxu1 %v8602_v50  ;;  %v8612_v56 = vld [vmem:[#allocation50_spill] sm:$0xff]  ;;  %v8613_v50 = vld [vmem:[#allocation51_spill] sm:$0xff] }
 0x872   :  { %5238 = vmatpush1.bf16.msra.mxu0 %v8603_v7  ;;  %5302 = vmatpush1.bf16.msra.mxu1 %v8604_v20  ;;  %v8614_v7 = vld [vmem:[#allocation52_spill] sm:$0xff]  ;;  %v8615_v20 = vld [vmem:[#allocation53_spill] sm:$0xff] }
 0x873   :  { %5240 = vmatprep.subr.bf16.mxu0 %v8605_v30  ;;  %5304 = vmatprep.subr.bf16.mxu1 %v8606_v46  ;;  %v8616_v30 = vld [vmem:[#allocation54_spill] sm:$0xff]  ;;  %v8617_v46 = vld [vmem:[#allocation55_spill] sm:$0xff] }
 0x876   :  { %5242 = vmatpush1.bf16.msra.mxu0 %v8607_v0  ;;  %5306 = vmatpush1.bf16.msra.mxu1 %v8608_v14  ;;  %v8618_v0 = vld [vmem:[#allocation56_spill] sm:$0xff]  ;;  %v8619_v14 = vld [vmem:[#allocation57_spill] sm:$0xff] }
 0x877   :  { %5244 = vmatprep.subr.bf16.mxu0 %v8609_v1  ;;  %5308 = vmatprep.subr.bf16.mxu1 %v8610_v57  ;;  %v8620_v1 = vld [vmem:[#allocation58_spill] sm:$0xff]  ;;  %v8621_v57 = vld [vmem:[#allocation59_spill] sm:$0xff] }
 0x87a   :  { %5246 = vmatpush1.bf16.msra.mxu0 %v8611_v58  ;;  %5310 = vmatpush1.bf16.msra.mxu1 %v8612_v56  ;;  %v8622_v58 = vld [vmem:[#allocation60_spill] sm:$0xff]  ;;  %v8623_v56 = vld [vmem:[#allocation61_spill] sm:$0xff] }
 0x87b   :  { %5248 = vmatprep.subr.bf16.mxu0 %v8613_v50  ;;  %5312 = vmatprep.subr.bf16.mxu1 %v8614_v7  ;;  %v8624_v50 = vld [vmem:[#allocation62_spill] sm:$0xff]  ;;  %v8625_v7 = vld [vmem:[#allocation63_spill] sm:$0xff] }
 0x87e   :  { %5250 = vmatpush1.bf16.msra.mxu0 %v8615_v20  ;;  %5314 = vmatpush1.bf16.msra.mxu1 %v8616_v30  ;;  %v8626_v20 = vld [vmem:[#allocation64_spill] sm:$0xff]  ;;  %v8627_v30 = vld [vmem:[#allocation65_spill] sm:$0xff] }
 0x87f   :  { %5252 = vmatprep.subr.bf16.mxu0 %v8617_v46  ;;  %5316 = vmatprep.subr.bf16.mxu1 %v8618_v0  ;;  %v8628_v46 = vld [vmem:[#allocation66_spill] sm:$0xff]  ;;  %v8629_v0 = vld [vmem:[#allocation67_spill] sm:$0xff] }
 0x882   :  { %5254 = vmatpush1.bf16.msra.mxu0 %v8619_v14  ;;  %5318 = vmatpush1.bf16.msra.mxu1 %v8620_v1  ;;  %v8630_v14 = vld [vmem:[#allocation68_spill] sm:$0xff]  ;;  %v8631_v1 = vld [vmem:[#allocation69_spill] sm:$0xff] }
 0x883   :  { %5256 = vmatprep.subr.bf16.mxu0 %v8621_v57  ;;  %5320 = vmatprep.subr.bf16.mxu1 %v8622_v58  ;;  %v8632_v57 = vld [vmem:[#allocation70_spill] sm:$0xff]  ;;  %v8633_v58 = vld [vmem:[#allocation71_spill] sm:$0xff] }
 0x886   :  { %5258 = vmatpush1.bf16.msra.mxu0 %v8623_v56  ;;  %5322 = vmatpush1.bf16.msra.mxu1 %v8624_v50  ;;  %v8634_v56 = vld [vmem:[#allocation72_spill] sm:$0xff]  ;;  %v8635_v50 = vld [vmem:[#allocation73_spill] sm:$0xff] }
 0x887   :  { %5260 = vmatprep.subr.bf16.mxu0 %v8625_v7  ;;  %5324 = vmatprep.subr.bf16.mxu1 %v8626_v20  ;;  %v8636_v7 = vld [vmem:[#allocation74_spill] sm:$0xff]  ;;  %v8637_v20 = vld [vmem:[#allocation75_spill] sm:$0xff] }
 0x88a   :  { %5262 = vmatpush1.bf16.msra.mxu0 %v8627_v30  ;;  %5326 = vmatpush1.bf16.msra.mxu1 %v8628_v46  ;;  %v8638_v30 = vld [vmem:[#allocation76_spill] sm:$0xff]  ;;  %v8639_v46 = vld [vmem:[#allocation77_spill] sm:$0xff] }
 0x88b   :  { %5264 = vmatprep.subr.bf16.mxu0 %v8629_v0  ;;  %5328 = vmatprep.subr.bf16.mxu1 %v8630_v14  ;;  %v8640_v0 = vld [vmem:[#allocation78_spill] sm:$0xff]  ;;  %v8641_v14 = vld [vmem:[#allocation79_spill] sm:$0xff] }
 0x88e   :  { %5266 = vmatpush1.bf16.msra.mxu0 %v8631_v1  ;;  %5330 = vmatpush1.bf16.msra.mxu1 %v8632_v57  ;;  %v8642_v1 = vld [vmem:[#allocation80_spill] sm:$0xff]  ;;  %v8643_v57 = vld [vmem:[#allocation81_spill] sm:$0xff] }
 0x88f   :  { %5268 = vmatprep.subr.bf16.mxu0 %v8633_v58  ;;  %5332 = vmatprep.subr.bf16.mxu1 %v8634_v56  ;;  %v8644_v58 = vld [vmem:[#allocation82_spill] sm:$0xff]  ;;  %v8645_v56 = vld [vmem:[#allocation83_spill] sm:$0xff] }
 0x892   :  { %5270 = vmatpush1.bf16.msra.mxu0 %v8635_v50  ;;  %5334 = vmatpush1.bf16.msra.mxu1 %v8636_v7  ;;  %v8646_v50 = vld [vmem:[#allocation84_spill] sm:$0xff] }
 0x893   :  { %5272 = vmatprep.subr.bf16.mxu0 %v8637_v20  ;;  %5336 = vmatprep.subr.bf16.mxu1 %v8638_v30 }
 0x896   :  { %5274 = vmatpush1.bf16.msra.mxu0 %v8639_v46  ;;  %5338 = vmatpush1.bf16.msra.mxu1 %v8640_v0  ;;  %v8647_v46 = vld [vmem:[#allocation85_spill] sm:$0xff]  ;;  %v8648_v0 = vld [vmem:[#allocation86_spill] sm:$0xff] }
 0x897   :  { %5276 = vmatprep.subr.bf16.mxu0 %v8641_v14  ;;  %5340 = vmatprep.subr.bf16.mxu1 %v8642_v1  ;;  %v195_v48 = vmul.f32 %v8647_v46, %v100_v23  ;;  %v197_v26 = vmul.f32 %v8648_v0, %v100_v23  ;;  %v196_v14 = vmul.f32 %v8118_v63, %v100_v23  ;;  %v8649_v1 = vld [vmem:[#allocation35_spill] sm:$0xff] }
 0x898   :  { %v198_v49 = vmul.f32 %v8649_v1, %v100_v23 }
 0x89a   :  { %5278 = vmatpush1.bf16.msra.mxu0 %v8643_v57  ;;  %5342 = vmatpush1.bf16.msra.mxu1 %v8644_v58  ;;  %v8650_v57 = vld [vmem:[#allocation87_spill] sm:$0xff]  ;;  %v298_v58 = vadd.f32 %v8229_v29, %v197_v26  ;;  %v299_v9 = vadd.f32 %v8123_v22, %v198_v49  ;;  %v199_v26 = vmul.f32 %v8124_v43, %v100_v23 }
 0x89b   :  { %5344 = vmatprep.subr.bf16.mxu0 %v8645_v56  ;;  %5408 = vmatprep.subr.bf16.mxu1 %v8646_v50  ;;  %v296_v61 = vadd.f32 %v8650_v57, %v195_v48  ;;  %v297_v50 = vadd.f32 %v8230_v2, %v196_v14 }
 0x8f0   :  { %v2642_v7 = vpop.f32.mrb[24].mxu0  ;;  %v2713_v20 = vpop.f32.mrb[24].mxu1 }
 0x8f1   :  { %v2644_v53 = vpop.f32.mrb[25].mxu0  ;;  %v2715_v30 = vpop.f32.mrb[25].mxu1  ;;  %v2643_v56 = vadd.f32 %v2642_v7, %v296_v61  ;;  %v2714_v3 = vadd.f32 %v2713_v20, %v298_v58  ;;  %v201_v7 = vmul.f32 %v8125_v42, %v100_v23 }
 0x8f2   :  { %v2645_v41 = vadd.f32 %v2644_v53, %v297_v50  ;;  %v2716_v32 = vadd.f32 %v2715_v30, %v299_v9  ;;  %v200_v9 = vmul.f32 %v8126_v28, %v100_v23 }
 0x8f3   :  { %v3361_v44 = vmul.f32 -1.442695, %v2643_v56  ;;  %v3363_v46 = vmul.f32 -1.442695, %v2714_v3  ;;  %v202_v3 = vmul.f32 %v8020_v39, %v100_v23 }
 0x8f4   :  { %v3362_v21 = vmul.f32 -1.442695, %v2645_v41  ;;  %v3364_v0 = vmul.f32 -1.442695, %v2716_v32  ;;  %v301_v30 = vadd.f32 %v8231_v59, %v200_v9 }
 0x8f5   :  { %5716 = vpow2.f32 %v3361_v44  ;;  %v302_v44 = vadd.f32 %v8022_v37, %v201_v7  ;;  %v303_v43 = vadd.f32 %v8024_v51, %v202_v3 }
 0x8f6   :  { %5718 = vpow2.f32 %v3363_v46 }
 0x8f7   :  { %5720 = vpow2.f32 %v3362_v21  ;;  %v300_v21 = vadd.f32 %v8021_v36, %v199_v26 }
 0x8f8   :  { %5722 = vpow2.f32 %v3364_v0 }
 0x8ff   :  { %v5717_v63 = vpop.eup %5716 }
 0x900   :  { %v5719_v48 = vpop.eup %5718  ;;  %v2878_v61 = vadd.f32 1.0, %v5717_v63 }
 0x901   :  { %v5721_v1 = vpop.eup %5720  ;;  %v2880_v49 = vadd.f32 1.0, %v5719_v48 }
 0x902   :  { %v5723_v29 = vpop.eup %5722  ;;  %v2879_v41 = vadd.f32 1.0, %v5721_v1  ;;  %5724 = vrcp.f32 %v2878_v61 }
 0x903   :  { %v2881_v32 = vadd.f32 1.0, %v5723_v29  ;;  %5726 = vrcp.f32 %v2880_v49 }
 0x904   :  { %5728 = vrcp.f32 %v2879_v41 }
 0x905   :  { %5730 = vrcp.f32 %v2881_v32 }
 0x90c   :  { %v5725_v37 = vpop.eup %5724 }
 0x90d   :  { %v5727_v56 = vpop.eup %5726 }
 0x90e   :  { %v5729_v50 = vpop.eup %5728  ;;  %v2898_v48 = vmul.f32 %v5727_v56, %v7276_v4  ;;  %v3214_v56 = vld [vmem:[#allocation5 + $0x10] sm:$0xff] }
 0x90f   :  { %v5731_v46 = vpop.eup %5730 }
 0x910   :  { %v2899_v61 = vmul.f32 %v5731_v46, %v7278_v11  ;;  %v8678_v11 = vld [vmem:[#allocation148_spill] sm:$0xff] }
 0x930   :  { %v2784_v53 = vpop.f32.mrb[26].mxu0  ;;  %v2855_v20 = vpop.f32.mrb[26].mxu1 }
 0x931   :  { %v2785_v42 = vadd.f32 %v2784_v53, %v300_v21  ;;  %v2856_v14 = vadd.f32 %v2855_v20, %v302_v44  ;;  %v2786_v28 = vpop.f32.mrb[27].mxu0  ;;  %v2857_v57 = vpop.f32.mrb[27].mxu1 }
 0x932   :  { %v2787_v39 = vadd.f32 %v2786_v28, %v301_v30  ;;  %v2858_v23 = vadd.f32 %v2857_v57, %v303_v43  ;;  %v8679_v30 = vld [vmem:[#allocation149_spill] sm:$0xff]  ;;  %v8680_v43 = vld [vmem:[#allocation150_spill] sm:$0xff] }
 0x933   :  { %v3365_v58 = vmul.f32 -1.442695, %v2785_v42  ;;  %5732 = vtanh.f32 %v2856_v14  ;;  %v8681_v42 = vld [vmem:[#allocation151_spill] sm:$0xff]  ;;  %v8682_v14 = vld [vmem:[#allocation152_spill] sm:$0xff]  ;;  %v8683_v28 = vld [vmem:[#allocation153_spill] sm:$0xff] }
 0x934   :  { %v3366_v36 = vmul.f32 -1.442695, %v2787_v39  ;;  %5734 = vtanh.f32 %v2858_v23  ;;  %v8684_v57 = vld [vmem:[#allocation154_spill] sm:$0xff]  ;;  %v8685_v39 = vld [vmem:[#allocation155_spill] sm:$0xff] }
 0x935   :  { %5736 = vpow2.f32 %v3365_v58  ;;  %v3212_v23 = vld [vmem:[#allocation5] sm:$0xff]  ;;  %v3213_v58 = vld [vmem:[#allocation5 + $0x8] sm:$0xff] }
 0x936   :  { %5738 = vpow2.f32 %v3366_v36  ;;  %v5844_v36 = vmov 0.0|0.0  }
 0x93d   :  { %v5733_v0 = vpop.eup %5732 }
 0x93e   :  { %v5735_v63 = vpop.eup %5734  ;;  %v2900_v1 = vmul.f32 %v5733_v0, %v5725_v37  ;;  %v5472_v37 = vpack.c.bf16 %v3213_v58, %v3212_v23  ;;  %v3216_v0 = vld [vmem:[#allocation5 + $0x20] sm:$0xff] }
 0x93f   :  { %v5737_v29 = vpop.eup %5736  ;;  %v2901_v26 = vmul.f32 %v5735_v63, %v5729_v50  ;;  %v3215_v50 = vld [vmem:[#allocation5 + $0x18] sm:$0xff]  ;;  %v3217_v63 = vld [vmem:[#allocation5 + $0x28] sm:$0xff] }
 0x940   :  { %v5739_v7 = vpop.eup %5738  ;;  %v2882_v49 = vadd.f32 1.0, %v5737_v29  ;;  %v2902_v9 = vadd.f32 %v2900_v1, %v2898_v48  ;;  %v5475_v46 = vpack.c.bf16 %v3215_v50, %v3214_v56  ;;  %v5478_v48 = vpack.c.bf16 %v3217_v63, %v3216_v0  ;;  %v3218_v1 = vld [vmem:[#allocation5 + $0x30] sm:$0xff]  ;;  %v3219_v29 = vld [vmem:[#allocation5 + $0x38] sm:$0xff] }
 0x941   :  { %v2883_v3 = vadd.f32 1.0, %v5739_v7  ;;  %v7434_v41 = vadd.f32 %v2901_v26, %v2899_v61  ;;  %v5481_v61 = vpack.c.bf16 %v3219_v29, %v3218_v1  ;;  %v3220_v26 = vld [vmem:[#allocation5 + $0x40] sm:$0xff]  ;;  %v3221_v7 = vld [vmem:[#allocation5 + $0x48] sm:$0xff] }
 0x942   :  { %5740 = vrcp.f32 %v2882_v49  ;;  %v5484_v49 = vpack.c.bf16 %v3221_v7, %v3220_v26 }
 0x943   :  { %5742 = vtanh.f32 %v2902_v9  ;;  %v3222_v9 = vld [vmem:[#allocation5 + $0x50] sm:$0xff] }
 0x944   :  { %5744 = vrcp.f32 %v2883_v3  ;;  %v3223_v3 = vld [vmem:[#allocation5 + $0x58] sm:$0xff] }
 0x945   :  { %5746 = vtanh.f32 %v7434_v41 }
 0x94c   :  { %v5741_v32 = vpop.eup %5740 }
 0x94d   :  { %v5743_v21 = vpop.eup %5742 }
 0x94e   :  { %v5745_v44 = vpop.eup %5744  ;;  %v7437_v4 = vmul.f32 %v5743_v21, %v5741_v32  ;;  %v5487_v32 = vpack.c.bf16 %v3223_v3, %v3222_v9  ;;  %v3224_v21 = vld [vmem:[#allocation5 + $0x60] sm:$0xff] }
 0x94f   :  { %v5747_v53 = vpop.eup %5746 }
 0x950   :  { %v2907_v20 = vmul.f32 %v5747_v53, %v5745_v44  ;;  %v3225_v44 = vld [vmem:[#allocation5 + $0x68] sm:$0xff] }
 0x951   :  { %v5490_v53 = vpack.c.bf16 %v3225_v44, %v3224_v21 }
 0x952   :  { %2972 = vmatprep.mubr.f32.mxu0 %v2907_v20  ;;  %3042 = vmatprep.mubr.f32.mxu1 %v2907_v20 }
 0x953   :  { %2973 = vmatmul.mubr.f32.vlgmr.msra.gmra.mrb[28].mxu0 %v7437_v4  ;;  %3043 = vmatmul.mubr.f32.vlgmr.msra.gmra.mrb[28].mxu1 %v7437_v4 }
 0x954   :  { %5346 = vmatpush1.bf16.msra.mxu0 %v8026_v52  ;;  %5410 = vmatpush1.bf16.msra.mxu1 %v8027_v6  ;;  %v8651_v52 = vld [vmem:[#allocation121_spill] sm:$0xff]  ;;  %v8652_v6 = vld [vmem:[#allocation122_spill] sm:$0xff] }
 0x955   :  { %3112 = vmatprep.mubr.f32.mxu0 %v2907_v20  ;;  %3182 = vmatprep.mubr.f32.mxu1 %v2907_v20  ;;  %v3226_v20 = vld [vmem:[#allocation5 + $0x70] sm:$0xff] }
 0x956   :  { %5348 = vmatprep.subr.bf16.mxu0 %v8028_v45  ;;  %5412 = vmatprep.subr.bf16.mxu1 %v8029_v16  ;;  %v8653_v45 = vld [vmem:[#allocation123_spill] sm:$0xff]  ;;  %v8654_v16 = vld [vmem:[#allocation124_spill] sm:$0xff] }
 0x958   :  { %5350 = vmatpush1.bf16.msra.mxu0 %v8030_v12  ;;  %5414 = vmatpush1.bf16.msra.mxu1 %v8031_v27  ;;  %v8655_v12 = vld [vmem:[#allocation125_spill] sm:$0xff]  ;;  %v8656_v27 = vld [vmem:[#allocation126_spill] sm:$0xff] }
 0x959   :  { %5352 = vmatprep.subr.bf16.mxu0 %v8032_v40  ;;  %5416 = vmatprep.subr.bf16.mxu1 %v8033_v31  ;;  %v8657_v40 = vld [vmem:[#allocation127_spill] sm:$0xff]  ;;  %v8658_v31 = vld [vmem:[#allocation128_spill] sm:$0xff] }
 0x95c   :  { %5354 = vmatpush1.bf16.msra.mxu0 %v8128_v10  ;;  %5418 = vmatpush1.bf16.msra.mxu1 %v8129_v13  ;;  %v8659_v10 = vld [vmem:[#allocation129_spill] sm:$0xff]  ;;  %v8660_v13 = vld [vmem:[#allocation130_spill] sm:$0xff] }
 0x95d   :  { %5356 = vmatprep.subr.bf16.mxu0 %v8130_v17  ;;  %5420 = vmatprep.subr.bf16.mxu1 %v8131_v47  ;;  %v8661_v17 = vld [vmem:[#allocation131_spill] sm:$0xff]  ;;  %v8662_v47 = vld [vmem:[#allocation132_spill] sm:$0xff] }
 0x960   :  { %5358 = vmatpush1.bf16.msra.mxu0 %v8132_v34  ;;  %5422 = vmatpush1.bf16.msra.mxu1 %v8133_v33  ;;  %v8663_v34 = vld [vmem:[#allocation133_spill] sm:$0xff]  ;;  %v8664_v33 = vld [vmem:[#allocation134_spill] sm:$0xff] }
 0x961   :  { %5360 = vmatprep.subr.bf16.mxu0 %v8134_v24  ;;  %5424 = vmatprep.subr.bf16.mxu1 %v8135_v19  ;;  %v8665_v24 = vld [vmem:[#allocation135_spill] sm:$0xff]  ;;  %v8666_v19 = vld [vmem:[#allocation136_spill] sm:$0xff] }
 0x964   :  { %5362 = vmatpush1.bf16.msra.mxu0 %v8136_v15  ;;  %5426 = vmatpush1.bf16.msra.mxu1 %v8137_v5  ;;  %v8667_v15 = vld [vmem:[#allocation137_spill] sm:$0xff]  ;;  %v8668_v5 = vld [vmem:[#allocation138_spill] sm:$0xff] }
 0x965   :  { %5364 = vmatprep.subr.bf16.mxu0 %v8232_v54  ;;  %5428 = vmatprep.subr.bf16.mxu1 %v8233_v55  ;;  %v8669_v54 = vld [vmem:[#allocation139_spill] sm:$0xff]  ;;  %v8670_v55 = vld [vmem:[#allocation140_spill] sm:$0xff] }
 0x968   :  { %5366 = vmatpush1.bf16.msra.mxu0 %v8234_v35  ;;  %5430 = vmatpush1.bf16.msra.mxu1 %v8235_v8  ;;  %v8671_v35 = vld [vmem:[#allocation141_spill] sm:$0xff]  ;;  %v8672_v8 = vld [vmem:[#allocation142_spill] sm:$0xff] }
 0x969   :  { %5368 = vmatprep.subr.bf16.mxu0 %v8236_v60  ;;  %5432 = vmatprep.subr.bf16.mxu1 %v8237_v25  ;;  %v8673_v60 = vld [vmem:[#allocation143_spill] sm:$0xff]  ;;  %v8674_v25 = vld [vmem:[#allocation144_spill] sm:$0xff] }
 0x96c   :  { %5370 = vmatpush1.bf16.msra.mxu0 %v8238_v18  ;;  %5434 = vmatpush1.bf16.msra.mxu1 %v8239_v38  ;;  %v8675_v18 = vld [vmem:[#allocation145_spill] sm:$0xff]  ;;  %v8676_v38 = vld [vmem:[#allocation146_spill] sm:$0xff] }
 0x96d   :  { %5372 = vmatprep.subr.bf16.mxu0 %v8240_v62  ;;  %5436 = vmatprep.subr.bf16.mxu1 %v8651_v52  ;;  %v8677_v62 = vld [vmem:[#allocation147_spill] sm:$0xff]  ;;  %v3227_v52 = vld [vmem:[#allocation5 + $0x78] sm:$0xff] }
 0x970   :  { %5374 = vmatpush1.bf16.msra.mxu0 %v8652_v6  ;;  %5438 = vmatpush1.bf16.msra.mxu1 %v8653_v45  ;;  %v5493_v6 = vpack.c.bf16 %v3227_v52, %v3226_v20 }
 0x971   :  { %5376 = vmatprep.subr.bf16.mxu0 %v8654_v16  ;;  %5440 = vmatprep.subr.bf16.mxu1 %v8655_v12 }
 0x974   :  { %5378 = vmatpush1.bf16.msra.mxu0 %v8656_v27  ;;  %5442 = vmatpush1.bf16.msra.mxu1 %v8657_v40 }
 0x975   :  { %5380 = vmatprep.subr.bf16.mxu0 %v8658_v31  ;;  %5444 = vmatprep.subr.bf16.mxu1 %v8659_v10 }
 0x978   :  { %5382 = vmatpush1.bf16.msra.mxu0 %v8660_v13  ;;  %5446 = vmatpush1.bf16.msra.mxu1 %v8661_v17 }
 0x979   :  { %5384 = vmatprep.subr.bf16.mxu0 %v8662_v47  ;;  %5448 = vmatprep.subr.bf16.mxu1 %v8663_v34 }
 0x97c   :  { %5386 = vmatpush1.bf16.msra.mxu0 %v8664_v33  ;;  %5450 = vmatpush1.bf16.msra.mxu1 %v8665_v24 }
 0x97d   :  { %5388 = vmatprep.subr.bf16.mxu0 %v8666_v19  ;;  %5452 = vmatprep.subr.bf16.mxu1 %v8667_v15 }
 0x980   :  { %5390 = vmatpush1.bf16.msra.mxu0 %v8668_v5  ;;  %5454 = vmatpush1.bf16.msra.mxu1 %v8669_v54 }
 0x981   :  { %5392 = vmatprep.subr.bf16.mxu0 %v8670_v55  ;;  %5456 = vmatprep.subr.bf16.mxu1 %v8671_v35 }
 0x984   :  { %5394 = vmatpush1.bf16.msra.mxu0 %v8672_v8  ;;  %5458 = vmatpush1.bf16.msra.mxu1 %v8673_v60 }
 0x985   :  { %5396 = vmatprep.subr.bf16.mxu0 %v8674_v25  ;;  %5460 = vmatprep.subr.bf16.mxu1 %v8675_v18 }
 0x988   :  { %5398 = vmatpush1.bf16.msra.mxu0 %v8676_v38  ;;  %5462 = vmatpush1.bf16.msra.mxu1 %v8677_v62 }
 0x989   :  { %5400 = vmatprep.subr.bf16.mxu0 %v8678_v11  ;;  %5464 = vmatprep.subr.bf16.mxu1 %v8679_v30 }
 0x98c   :  { %5402 = vmatpush1.bf16.msra.mxu0 %v8680_v43  ;;  %5466 = vmatpush1.bf16.msra.mxu1 %v8681_v42 }
 0x98d   :  { %5404 = vmatprep.subr.bf16.mxu0 %v8682_v14  ;;  %5468 = vmatprep.subr.bf16.mxu1 %v8683_v28 }
 0x990   :  { %5406 = vmatpush1.bf16.msra.mxu0 %v8684_v57  ;;  %5470 = vmatpush1.bf16.msra.mxu1 %v8685_v39 }
 0x991   :  { %5471 = vmatprep.subr.bf16.mxu0 %v5844_v36 }
 0x993   :  { %3113 = vmatmul.mubr.f32.vlgmr.msra.gmra.mrb[30].mxu0 %v7437_v4  ;;  %3183 = vmatmul.mubr.f32.vlgmr.msra.gmra.mrb[30].mxu1 %v7437_v4  ;;  %v8686_v4 = vmov 0.0  }
 0x994   :  { %5473 = vmatpush3.bf16.msra.mxu0 %v5472_v37  ;;  %3420 = vmatprep.mubr.msk.f32.mxu0 %vm5845_vm0, %v8686_v4 }
 0x995   :  { %5474 = vmatprep.subr.bf16.mxu0 %v5844_v36 }
 0x998   :  { %5476 = vmatpush3.bf16.msra.mxu0 %v5475_v46 }
 0x999   :  { %5477 = vmatprep.subr.bf16.mxu0 %v5844_v36 }
 0x99c   :  { %5479 = vmatpush3.bf16.msra.mxu0 %v5478_v48 }
 0x99d   :  { %5480 = vmatprep.subr.bf16.mxu0 %v5844_v36 }
 0x9a0   :  { %5482 = vmatpush3.bf16.msra.mxu0 %v5481_v61 }
 0x9a1   :  { %5483 = vmatprep.subr.bf16.mxu0 %v5844_v36 }
 0x9a4   :  { %5485 = vmatpush3.bf16.msra.mxu0 %v5484_v49 }
 0x9a5   :  { %5486 = vmatprep.subr.bf16.mxu0 %v5844_v36 }
 0x9a8   :  { %5488 = vmatpush3.bf16.msra.mxu0 %v5487_v32 }
 0x9a9   :  { %5489 = vmatprep.subr.bf16.mxu0 %v5844_v36 }
 0x9ac   :  { %5491 = vmatpush3.bf16.msra.mxu0 %v5490_v53 }
 0x9ad   :  { %5492 = vmatprep.subr.bf16.mxu0 %v5844_v36 }
 0x9b0   :  { %5494 = vmatpush3.bf16.msra.mxu0 %v5493_v6 }
 0xa26   :  { %v2974_v45 = vpop.f32.mrb[28].mxu0  ;;  %v3044_v16 = vpop.f32.mrb[28].mxu1 }
 0xa27   :  { %v2975_v12 = vpop.f32.mrb[29].mxu0  ;;  %v3045_v27 = vpop.f32.mrb[29].mxu1 }
 0xa28   :  { %v3046_v40 = vadd.f32 %v3045_v27, %v8123_v22  ;;  %v2976_v31 = vadd.f32 %v2975_v12, %v8230_v2 }
 0xa2a   :  { %v3368_v10 = vmul.f32 -1.442695, %v3046_v40  ;;  %v3367_v13 = vmul.f32 -1.442695, %v2976_v31 }
 0xa2c   :  { %5748 = vpow2.f32 %v3368_v10 }
 0xa2d   :  { %5750 = vpow2.f32 %v3367_v13 }
 0xa36   :  { %v5749_v17 = vpop.eup %5748 }
 0xa37   :  { %v5751_v47 = vpop.eup %5750  ;;  %v3198_v34 = vadd.f32 1.0, %v5749_v17 }
 0xa38   :  { %v3197_v33 = vadd.f32 1.0, %v5751_v47 }
 0xa39   :  { %5752 = vrcp.f32 %v3198_v34 }
 0xa3a   :  { %5754 = vrcp.f32 %v3197_v33 }
 0xa43   :  { %v5753_v2 = vpop.eup %5752 }
 0xa44   :  { %v5755_v35 = vpop.eup %5754  ;;  %v3207_v60 = vmul.f32 %v5753_v2, %v7434_v41 }
 0xa66   :  { %v3114_v24 = vpop.f32.mrb[30].mxu0  ;;  %v3184_v19 = vpop.f32.mrb[30].mxu1 }
 0xa67   :  { %v3115_v15 = vpop.f32.mrb[31].mxu0  ;;  %v3185_v5 = vpop.f32.mrb[31].mxu1 }
 0xa68   :  { %v3116_v54 = vadd.f32 %v3115_v15, %v8231_v59  ;;  %v3186_v55 = vadd.f32 %v3185_v5, %v8024_v51  ;;  %v3370_v51 = vld [vmem:[%s7531_s5] ss:$0 sm:$0xff] }
 0xa6a   :  { %v3369_v22 = vmul.f32 -1.442695, %v3116_v54  ;;  %5756 = vtanh.f32 %v3186_v55 }
 0xa6c   :  { %5758 = vpow2.f32 %v3369_v22 }
 0xa74   :  { %v5757_v8 = vpop.eup %5756 }
 0xa75   :  { %v3208_v25 = vmul.f32 %v5757_v8, %v5755_v35 }
 0xa76   :  { %v5759_v18 = vpop.eup %5758 }
 0xa77   :  { %v3199_v38 = vadd.f32 1.0, %v5759_v18  ;;  %v3209_v62 = vadd.f32 %v3208_v25, %v3207_v60 }
 0xa79   :  { %5760 = vrcp.f32 %v3199_v38 }
 0xa7a   :  { %5762 = vtanh.f32 %v3209_v62 }
 0xa83   :  { %v5761_v11 = vpop.eup %5760 }
 0xa84   :  { %v5763_v30 = vpop.eup %5762 }
 0xa85   :  { %v3211_v59 = vmul.f32 %v5763_v30, %v5761_v11 }
 0xa87   :  { %3421 = vmatmul.mubr.f32.vlgmr.msra.gmra.mrb[32].mxu0 %v3211_v59 }
 0xb5a   :  { %v3301_v43 = vpop.f32.mrb[32].mxu0 }
 0xb5b   :  { %v3302_v42 = vadd.f32 %v3370_v51, %v3301_v43  ;;  %v3422_v14 = vpop.f32.mrb[33].mxu0 }
 0xb5d   :  { %3305 = vst [vmem:[#allocation7] sm:$0xff] %v3302_v42 }
 0xb5e   :  { %5819 = shalt.err (!%p5816_p6)
}
 0xb5f   :  { %s5820_s22 = scalar_lea.hbm %s7532_s6, 128 }
 0xb60   :  { %p5821_p7 = scmp.ne.s32.totalorder %s7532_s6, %s5820_s22  ;;  %p5824_p8 = scmp.lt.u32.totalorder %s5820_s22, %s7532_s6 }
 0xb62   :  { %p5826_p9 = pnand %p5824_p8, %p5821_p7 }
 0xb64   :  { %5829 = shalt.err (!%p5826_p9)
}
 0xb65   :  { %3315 = dma.vmem_to_hbm [thread:$0]  %s3313_s19, 128, %s7532_s6, [#allocation4]  }
 0xb66   :  { %5834 = dma.done.wait [#allocation4], 128  }
 0xb67   :  { %5835 = vsyncadd [#allocation4], 4294967168 }
 0xb68   :  { %3319 = vsyncpa [#allocation3], 1 }
 0xb69   :  { %3320 = vsyncpa [#allocation6], 1 }
 0xb6a   :  { %3321 = vsyncpa [#allocation4], 1 }

</bundles_post_ra>
